<compile_context>
chip_gen: v6e
topology: v6e:2x2x1
jax: 0.10.0
libtpu: 0.0.40
codegen_flags: <defaults>
</compile_context>

<pallas_src>
import jax
import jax.numpy as jnp
from jax import lax
from jax.experimental import pallas as pl
from jax.experimental.pallas import tpu as pltpu

# Problem sizes (consistent with the PyTorch module: Conv2d(3, 6, 3)).
N, C_IN, H, W = 2, 3, 16, 16
C_OUT, KH, KW = 6, 3, 3
OH, OW = H - KH + 1, W - KW + 1      # stride=1, padding=0 -> 14, 14
HW = H * W                           # 256 = 2 x 128 lanes (fully lane-dense)


def conv2d_kernel(x_ref, w_ref, b_ref, o_ref):
    # x_ref: (N*C_IN, H*W)  = (6, 256)   f32, VMEM (whole input, single block)
    # w_ref: (C_OUT*C_IN*KH*KW,) = (162,) f32, SMEM (PyTorch OIHW order, flat)
    # b_ref: (C_OUT,)                     f32, SMEM
    # o_ref: (N*C_OUT, H*W) = (12, 256)  f32, VMEM (full planes; cropped outside)
    x = x_ref[...]

    # Bias-initialized, lane-dense accumulator rows: full 16x16 planes, one per
    # (image, out-channel).  Positions with oh >= 14 or ow >= 14 accumulate
    # garbage that the wrapper crops away.
    bias_rows = [jnp.full((1, HW), b_ref[co], dtype=jnp.float32)
                 for co in range(C_OUT)]
    accs = [[bias_rows[co] for co in range(C_OUT)] for _ in range(N)]

    # 9 lane rotations of the whole slab, one per kernel tap, each reused for
    # all (n, ci, co) combinations.  With jnp.roll semantics,
    # rolled[p] = x[(p + s) % HW]; for every valid output position p <= 221 and
    # s <= 34 we have p + s <= 255, so no wraparound touches the valid region.
    for kh in range(KH):
        for kw in range(KW):
            s = kh * W + kw
            shifted = pltpu.roll(x, (HW - s) % HW, 1) if s else x   # (6, 256)
            for n in range(N):
                for ci in range(C_IN):
                    row = n * C_IN + ci
                    plane = shifted[row:row + 1, :]                 # (1, 256)
                    base = (ci * KH + kh) * KW + kw
                    for co in range(C_OUT):
                        w_val = w_ref[co * (C_IN * KH * KW) + base]
                        accs[n][co] = accs[n][co] + w_val * plane

    # Single merged, fully lane-dense store (12 rows x 2 full vregs).
    out = jnp.concatenate(
        [accs[n][co] for n in range(N) for co in range(C_OUT)], axis=0)
    o_ref[...] = out.astype(o_ref.dtype)


def conv2d_pallas(x_nchw, weight_oihw, bias):
    """x_nchw: (N, C_IN, H, W); weight_oihw: (C_OUT, C_IN, KH, KW); bias: (C_OUT,)."""
    x_flat = x_nchw.reshape(N * C_IN, HW)      # free NCHW-order reshape
    w_flat = weight_oihw.reshape(-1)           # (162,) scalars -> SMEM
    out_flat = pl.pallas_call(
        conv2d_kernel,
        out_shape=jax.ShapeDtypeStruct((N * C_OUT, HW), x_nchw.dtype),
        in_specs=[
            pl.BlockSpec(memory_space=pltpu.MemorySpace.VMEM),   # x slab
            pl.BlockSpec(memory_space=pltpu.MemorySpace.SMEM),   # weights (scalars)
            pl.BlockSpec(memory_space=pltpu.MemorySpace.SMEM),   # bias (scalars)
        ],
        out_specs=pl.BlockSpec(memory_space=pltpu.MemorySpace.VMEM),
    )(x_flat, w_flat, bias)
    # Crop the full 16x16 planes to the valid 14x14 region (tiny XLA slice;
    # the reshape itself is a free NCHW-order view).
    return out_flat.reshape(N, C_OUT, H, W)[:, :, :OH, :OW]


if __name__ == "__main__":
    key = jax.random.PRNGKey(0)
    kx, kw_key, kb = jax.random.split(key, 3)

    # PyTorch Conv2d default-style init: U(-bound, bound), bound = 1/sqrt(fan_in).
    fan_in = C_IN * KH * KW
    bound = 1.0 / jnp.sqrt(jnp.float32(fan_in))
    weight = jax.random.uniform(kw_key, (C_OUT, C_IN, KH, KW), jnp.float32,
                                -bound, bound)
    bias = jax.random.uniform(kb, (C_OUT,), jnp.float32, -bound, bound)
    x = jax.random.normal(kx, (N, C_IN, H, W), jnp.float32)

    conv = jax.jit(conv2d_pallas)
    out = jax.block_until_ready(conv(x, weight, bias))

    # Reference: XLA conv with the same NCHW/OIHW semantics as nn.Conv2d.
    ref = lax.conv_general_dilated(
        x, weight, window_strides=(1, 1), padding="VALID",
        dimension_numbers=("NCHW", "OIHW", "NCHW")) + bias[None, :, None, None]

    assert out.shape == (N, C_OUT, OH, OW)
    assert jnp.allclose(out, ref, atol=1e-4, rtol=1e-4)

    print("KERNEL_OK")
</pallas_src>

<mosaic_0001>
module attributes {stable_mosaic.version = 11 : i64} {
  func.func @conv2d_kernel(%arg0: memref<6x256xf32, #tpu.memory_space<vmem>>, %arg1: memref<162xf32, #tpu.memory_space<smem>>, %arg2: memref<6xf32, #tpu.memory_space<smem>>, %arg3: memref<12x256xf32, #tpu.memory_space<vmem>>) attributes {dimension_semantics = [], scalar_prefetch = 0 : i64, scratch_operands = 0 : i64, tpu.core_type = #tpu.core_type<tc>} {
    %c0 = arith.constant 0 : index
    %c0_0 = arith.constant 0 : index
    %0 = vector.load %arg0[%c0, %c0_0] : memref<6x256xf32, #tpu.memory_space<vmem>>, vector<6x256xf32>
    %c0_1 = arith.constant 0 : index
    %1 = memref.load %arg2[%c0_1] : memref<6xf32, #tpu.memory_space<smem>>
    %2 = vector.broadcast %1 : f32 to vector<1x256xf32>
    %c1 = arith.constant 1 : index
    %3 = memref.load %arg2[%c1] : memref<6xf32, #tpu.memory_space<smem>>
    %4 = vector.broadcast %3 : f32 to vector<1x256xf32>
    %c2 = arith.constant 2 : index
    %5 = memref.load %arg2[%c2] : memref<6xf32, #tpu.memory_space<smem>>
    %6 = vector.broadcast %5 : f32 to vector<1x256xf32>
    %c3 = arith.constant 3 : index
    %7 = memref.load %arg2[%c3] : memref<6xf32, #tpu.memory_space<smem>>
    %8 = vector.broadcast %7 : f32 to vector<1x256xf32>
    %c4 = arith.constant 4 : index
    %9 = memref.load %arg2[%c4] : memref<6xf32, #tpu.memory_space<smem>>
    %10 = vector.broadcast %9 : f32 to vector<1x256xf32>
    %c5 = arith.constant 5 : index
    %11 = memref.load %arg2[%c5] : memref<6xf32, #tpu.memory_space<smem>>
    %12 = vector.broadcast %11 : f32 to vector<1x256xf32>
    %13 = vector.extract_strided_slice %0 {offsets = [0, 0], sizes = [1, 256], strides = [1, 1]} : vector<6x256xf32> to vector<1x256xf32>
    %c0_2 = arith.constant 0 : index
    %14 = memref.load %arg1[%c0_2] : memref<162xf32, #tpu.memory_space<smem>>
    %15 = vector.broadcast %14 : f32 to vector<1x256xf32>
    %16 = arith.mulf %15, %13 : vector<1x256xf32>
    %17 = arith.addf %2, %16 : vector<1x256xf32>
    %c27 = arith.constant 27 : index
    %18 = memref.load %arg1[%c27] : memref<162xf32, #tpu.memory_space<smem>>
    %19 = vector.broadcast %18 : f32 to vector<1x256xf32>
    %20 = arith.mulf %19, %13 : vector<1x256xf32>
    %21 = arith.addf %4, %20 : vector<1x256xf32>
    %c54 = arith.constant 54 : index
    %22 = memref.load %arg1[%c54] : memref<162xf32, #tpu.memory_space<smem>>
    %23 = vector.broadcast %22 : f32 to vector<1x256xf32>
    %24 = arith.mulf %23, %13 : vector<1x256xf32>
    %25 = arith.addf %6, %24 : vector<1x256xf32>
    %c81 = arith.constant 81 : index
    %26 = memref.load %arg1[%c81] : memref<162xf32, #tpu.memory_space<smem>>
    %27 = vector.broadcast %26 : f32 to vector<1x256xf32>
    %28 = arith.mulf %27, %13 : vector<1x256xf32>
    %29 = arith.addf %8, %28 : vector<1x256xf32>
    %c108 = arith.constant 108 : index
    %30 = memref.load %arg1[%c108] : memref<162xf32, #tpu.memory_space<smem>>
    %31 = vector.broadcast %30 : f32 to vector<1x256xf32>
    %32 = arith.mulf %31, %13 : vector<1x256xf32>
    %33 = arith.addf %10, %32 : vector<1x256xf32>
    %c135 = arith.constant 135 : index
    %34 = memref.load %arg1[%c135] : memref<162xf32, #tpu.memory_space<smem>>
    %35 = vector.broadcast %34 : f32 to vector<1x256xf32>
    %36 = arith.mulf %35, %13 : vector<1x256xf32>
    %37 = arith.addf %12, %36 : vector<1x256xf32>
    %38 = vector.extract_strided_slice %0 {offsets = [1, 0], sizes = [1, 256], strides = [1, 1]} : vector<6x256xf32> to vector<1x256xf32>
    %c9 = arith.constant 9 : index
    %39 = memref.load %arg1[%c9] : memref<162xf32, #tpu.memory_space<smem>>
    %40 = vector.broadcast %39 : f32 to vector<1x256xf32>
    %41 = arith.mulf %40, %38 : vector<1x256xf32>
    %42 = arith.addf %17, %41 : vector<1x256xf32>
    %c36 = arith.constant 36 : index
    %43 = memref.load %arg1[%c36] : memref<162xf32, #tpu.memory_space<smem>>
    %44 = vector.broadcast %43 : f32 to vector<1x256xf32>
    %45 = arith.mulf %44, %38 : vector<1x256xf32>
    %46 = arith.addf %21, %45 : vector<1x256xf32>
    %c63 = arith.constant 63 : index
    %47 = memref.load %arg1[%c63] : memref<162xf32, #tpu.memory_space<smem>>
    %48 = vector.broadcast %47 : f32 to vector<1x256xf32>
    %49 = arith.mulf %48, %38 : vector<1x256xf32>
    %50 = arith.addf %25, %49 : vector<1x256xf32>
    %c90 = arith.constant 90 : index
    %51 = memref.load %arg1[%c90] : memref<162xf32, #tpu.memory_space<smem>>
    %52 = vector.broadcast %51 : f32 to vector<1x256xf32>
    %53 = arith.mulf %52, %38 : vector<1x256xf32>
    %54 = arith.addf %29, %53 : vector<1x256xf32>
    %c117 = arith.constant 117 : index
    %55 = memref.load %arg1[%c117] : memref<162xf32, #tpu.memory_space<smem>>
    %56 = vector.broadcast %55 : f32 to vector<1x256xf32>
    %57 = arith.mulf %56, %38 : vector<1x256xf32>
    %58 = arith.addf %33, %57 : vector<1x256xf32>
    %c144 = arith.constant 144 : index
    %59 = memref.load %arg1[%c144] : memref<162xf32, #tpu.memory_space<smem>>
    %60 = vector.broadcast %59 : f32 to vector<1x256xf32>
    %61 = arith.mulf %60, %38 : vector<1x256xf32>
    %62 = arith.addf %37, %61 : vector<1x256xf32>
    %63 = vector.extract_strided_slice %0 {offsets = [2, 0], sizes = [1, 256], strides = [1, 1]} : vector<6x256xf32> to vector<1x256xf32>
    %c18 = arith.constant 18 : index
    %64 = memref.load %arg1[%c18] : memref<162xf32, #tpu.memory_space<smem>>
    %65 = vector.broadcast %64 : f32 to vector<1x256xf32>
    %66 = arith.mulf %65, %63 : vector<1x256xf32>
    %67 = arith.addf %42, %66 : vector<1x256xf32>
    %c45 = arith.constant 45 : index
    %68 = memref.load %arg1[%c45] : memref<162xf32, #tpu.memory_space<smem>>
    %69 = vector.broadcast %68 : f32 to vector<1x256xf32>
    %70 = arith.mulf %69, %63 : vector<1x256xf32>
    %71 = arith.addf %46, %70 : vector<1x256xf32>
    %c72 = arith.constant 72 : index
    %72 = memref.load %arg1[%c72] : memref<162xf32, #tpu.memory_space<smem>>
    %73 = vector.broadcast %72 : f32 to vector<1x256xf32>
    %74 = arith.mulf %73, %63 : vector<1x256xf32>
    %75 = arith.addf %50, %74 : vector<1x256xf32>
    %c99 = arith.constant 99 : index
    %76 = memref.load %arg1[%c99] : memref<162xf32, #tpu.memory_space<smem>>
    %77 = vector.broadcast %76 : f32 to vector<1x256xf32>
    %78 = arith.mulf %77, %63 : vector<1x256xf32>
    %79 = arith.addf %54, %78 : vector<1x256xf32>
    %c126 = arith.constant 126 : index
    %80 = memref.load %arg1[%c126] : memref<162xf32, #tpu.memory_space<smem>>
    %81 = vector.broadcast %80 : f32 to vector<1x256xf32>
    %82 = arith.mulf %81, %63 : vector<1x256xf32>
    %83 = arith.addf %58, %82 : vector<1x256xf32>
    %c153 = arith.constant 153 : index
    %84 = memref.load %arg1[%c153] : memref<162xf32, #tpu.memory_space<smem>>
    %85 = vector.broadcast %84 : f32 to vector<1x256xf32>
    %86 = arith.mulf %85, %63 : vector<1x256xf32>
    %87 = arith.addf %62, %86 : vector<1x256xf32>
    %88 = vector.extract_strided_slice %0 {offsets = [3, 0], sizes = [1, 256], strides = [1, 1]} : vector<6x256xf32> to vector<1x256xf32>
    %c0_3 = arith.constant 0 : index
    %89 = memref.load %arg1[%c0_3] : memref<162xf32, #tpu.memory_space<smem>>
    %90 = vector.broadcast %89 : f32 to vector<1x256xf32>
    %91 = arith.mulf %90, %88 : vector<1x256xf32>
    %92 = arith.addf %2, %91 : vector<1x256xf32>
    %c27_4 = arith.constant 27 : index
    %93 = memref.load %arg1[%c27_4] : memref<162xf32, #tpu.memory_space<smem>>
    %94 = vector.broadcast %93 : f32 to vector<1x256xf32>
    %95 = arith.mulf %94, %88 : vector<1x256xf32>
    %96 = arith.addf %4, %95 : vector<1x256xf32>
    %c54_5 = arith.constant 54 : index
    %97 = memref.load %arg1[%c54_5] : memref<162xf32, #tpu.memory_space<smem>>
    %98 = vector.broadcast %97 : f32 to vector<1x256xf32>
    %99 = arith.mulf %98, %88 : vector<1x256xf32>
    %100 = arith.addf %6, %99 : vector<1x256xf32>
    %c81_6 = arith.constant 81 : index
    %101 = memref.load %arg1[%c81_6] : memref<162xf32, #tpu.memory_space<smem>>
    %102 = vector.broadcast %101 : f32 to vector<1x256xf32>
    %103 = arith.mulf %102, %88 : vector<1x256xf32>
    %104 = arith.addf %8, %103 : vector<1x256xf32>
    %c108_7 = arith.constant 108 : index
    %105 = memref.load %arg1[%c108_7] : memref<162xf32, #tpu.memory_space<smem>>
    %106 = vector.broadcast %105 : f32 to vector<1x256xf32>
    %107 = arith.mulf %106, %88 : vector<1x256xf32>
    %108 = arith.addf %10, %107 : vector<1x256xf32>
    %c135_8 = arith.constant 135 : index
    %109 = memref.load %arg1[%c135_8] : memref<162xf32, #tpu.memory_space<smem>>
    %110 = vector.broadcast %109 : f32 to vector<1x256xf32>
    %111 = arith.mulf %110, %88 : vector<1x256xf32>
    %112 = arith.addf %12, %111 : vector<1x256xf32>
    %113 = vector.extract_strided_slice %0 {offsets = [4, 0], sizes = [1, 256], strides = [1, 1]} : vector<6x256xf32> to vector<1x256xf32>
    %c9_9 = arith.constant 9 : index
    %114 = memref.load %arg1[%c9_9] : memref<162xf32, #tpu.memory_space<smem>>
    %115 = vector.broadcast %114 : f32 to vector<1x256xf32>
    %116 = arith.mulf %115, %113 : vector<1x256xf32>
    %117 = arith.addf %92, %116 : vector<1x256xf32>
    %c36_10 = arith.constant 36 : index
    %118 = memref.load %arg1[%c36_10] : memref<162xf32, #tpu.memory_space<smem>>
    %119 = vector.broadcast %118 : f32 to vector<1x256xf32>
    %120 = arith.mulf %119, %113 : vector<1x256xf32>
    %121 = arith.addf %96, %120 : vector<1x256xf32>
    %c63_11 = arith.constant 63 : index
    %122 = memref.load %arg1[%c63_11] : memref<162xf32, #tpu.memory_space<smem>>
    %123 = vector.broadcast %122 : f32 to vector<1x256xf32>
    %124 = arith.mulf %123, %113 : vector<1x256xf32>
    %125 = arith.addf %100, %124 : vector<1x256xf32>
    %c90_12 = arith.constant 90 : index
    %126 = memref.load %arg1[%c90_12] : memref<162xf32, #tpu.memory_space<smem>>
    %127 = vector.broadcast %126 : f32 to vector<1x256xf32>
    %128 = arith.mulf %127, %113 : vector<1x256xf32>
    %129 = arith.addf %104, %128 : vector<1x256xf32>
    %c117_13 = arith.constant 117 : index
    %130 = memref.load %arg1[%c117_13] : memref<162xf32, #tpu.memory_space<smem>>
    %131 = vector.broadcast %130 : f32 to vector<1x256xf32>
    %132 = arith.mulf %131, %113 : vector<1x256xf32>
    %133 = arith.addf %108, %132 : vector<1x256xf32>
    %c144_14 = arith.constant 144 : index
    %134 = memref.load %arg1[%c144_14] : memref<162xf32, #tpu.memory_space<smem>>
    %135 = vector.broadcast %134 : f32 to vector<1x256xf32>
    %136 = arith.mulf %135, %113 : vector<1x256xf32>
    %137 = arith.addf %112, %136 : vector<1x256xf32>
    %138 = vector.extract_strided_slice %0 {offsets = [5, 0], sizes = [1, 256], strides = [1, 1]} : vector<6x256xf32> to vector<1x256xf32>
    %c18_15 = arith.constant 18 : index
    %139 = memref.load %arg1[%c18_15] : memref<162xf32, #tpu.memory_space<smem>>
    %140 = vector.broadcast %139 : f32 to vector<1x256xf32>
    %141 = arith.mulf %140, %138 : vector<1x256xf32>
    %142 = arith.addf %117, %141 : vector<1x256xf32>
    %c45_16 = arith.constant 45 : index
    %143 = memref.load %arg1[%c45_16] : memref<162xf32, #tpu.memory_space<smem>>
    %144 = vector.broadcast %143 : f32 to vector<1x256xf32>
    %145 = arith.mulf %144, %138 : vector<1x256xf32>
    %146 = arith.addf %121, %145 : vector<1x256xf32>
    %c72_17 = arith.constant 72 : index
    %147 = memref.load %arg1[%c72_17] : memref<162xf32, #tpu.memory_space<smem>>
    %148 = vector.broadcast %147 : f32 to vector<1x256xf32>
    %149 = arith.mulf %148, %138 : vector<1x256xf32>
    %150 = arith.addf %125, %149 : vector<1x256xf32>
    %c99_18 = arith.constant 99 : index
    %151 = memref.load %arg1[%c99_18] : memref<162xf32, #tpu.memory_space<smem>>
    %152 = vector.broadcast %151 : f32 to vector<1x256xf32>
    %153 = arith.mulf %152, %138 : vector<1x256xf32>
    %154 = arith.addf %129, %153 : vector<1x256xf32>
    %c126_19 = arith.constant 126 : index
    %155 = memref.load %arg1[%c126_19] : memref<162xf32, #tpu.memory_space<smem>>
    %156 = vector.broadcast %155 : f32 to vector<1x256xf32>
    %157 = arith.mulf %156, %138 : vector<1x256xf32>
    %158 = arith.addf %133, %157 : vector<1x256xf32>
    %c153_20 = arith.constant 153 : index
    %159 = memref.load %arg1[%c153_20] : memref<162xf32, #tpu.memory_space<smem>>
    %160 = vector.broadcast %159 : f32 to vector<1x256xf32>
    %161 = arith.mulf %160, %138 : vector<1x256xf32>
    %162 = arith.addf %137, %161 : vector<1x256xf32>
    %c255_i32 = arith.constant 255 : i32
    %163 = tpu.dynamic_rotate %0 by %c255_i32 dim 1 : vector<6x256xf32>, i32 -> vector<6x256xf32>
    %164 = vector.extract_strided_slice %163 {offsets = [0, 0], sizes = [1, 256], strides = [1, 1]} : vector<6x256xf32> to vector<1x256xf32>
    %c1_21 = arith.constant 1 : index
    %165 = memref.load %arg1[%c1_21] : memref<162xf32, #tpu.memory_space<smem>>
    %166 = vector.broadcast %165 : f32 to vector<1x256xf32>
    %167 = arith.mulf %166, %164 : vector<1x256xf32>
    %168 = arith.addf %67, %167 : vector<1x256xf32>
    %c28 = arith.constant 28 : index
    %169 = memref.load %arg1[%c28] : memref<162xf32, #tpu.memory_space<smem>>
    %170 = vector.broadcast %169 : f32 to vector<1x256xf32>
    %171 = arith.mulf %170, %164 : vector<1x256xf32>
    %172 = arith.addf %71, %171 : vector<1x256xf32>
    %c55 = arith.constant 55 : index
    %173 = memref.load %arg1[%c55] : memref<162xf32, #tpu.memory_space<smem>>
    %174 = vector.broadcast %173 : f32 to vector<1x256xf32>
    %175 = arith.mulf %174, %164 : vector<1x256xf32>
    %176 = arith.addf %75, %175 : vector<1x256xf32>
    %c82 = arith.constant 82 : index
    %177 = memref.load %arg1[%c82] : memref<162xf32, #tpu.memory_space<smem>>
    %178 = vector.broadcast %177 : f32 to vector<1x256xf32>
    %179 = arith.mulf %178, %164 : vector<1x256xf32>
    %180 = arith.addf %79, %179 : vector<1x256xf32>
    %c109 = arith.constant 109 : index
    %181 = memref.load %arg1[%c109] : memref<162xf32, #tpu.memory_space<smem>>
    %182 = vector.broadcast %181 : f32 to vector<1x256xf32>
    %183 = arith.mulf %182, %164 : vector<1x256xf32>
    %184 = arith.addf %83, %183 : vector<1x256xf32>
    %c136 = arith.constant 136 : index
    %185 = memref.load %arg1[%c136] : memref<162xf32, #tpu.memory_space<smem>>
    %186 = vector.broadcast %185 : f32 to vector<1x256xf32>
    %187 = arith.mulf %186, %164 : vector<1x256xf32>
    %188 = arith.addf %87, %187 : vector<1x256xf32>
    %189 = vector.extract_strided_slice %163 {offsets = [1, 0], sizes = [1, 256], strides = [1, 1]} : vector<6x256xf32> to vector<1x256xf32>
    %c10 = arith.constant 10 : index
    %190 = memref.load %arg1[%c10] : memref<162xf32, #tpu.memory_space<smem>>
    %191 = vector.broadcast %190 : f32 to vector<1x256xf32>
    %192 = arith.mulf %191, %189 : vector<1x256xf32>
    %193 = arith.addf %168, %192 : vector<1x256xf32>
    %c37 = arith.constant 37 : index
    %194 = memref.load %arg1[%c37] : memref<162xf32, #tpu.memory_space<smem>>
    %195 = vector.broadcast %194 : f32 to vector<1x256xf32>
    %196 = arith.mulf %195, %189 : vector<1x256xf32>
    %197 = arith.addf %172, %196 : vector<1x256xf32>
    %c64 = arith.constant 64 : index
    %198 = memref.load %arg1[%c64] : memref<162xf32, #tpu.memory_space<smem>>
    %199 = vector.broadcast %198 : f32 to vector<1x256xf32>
    %200 = arith.mulf %199, %189 : vector<1x256xf32>
    %201 = arith.addf %176, %200 : vector<1x256xf32>
    %c91 = arith.constant 91 : index
    %202 = memref.load %arg1[%c91] : memref<162xf32, #tpu.memory_space<smem>>
    %203 = vector.broadcast %202 : f32 to vector<1x256xf32>
    %204 = arith.mulf %203, %189 : vector<1x256xf32>
    %205 = arith.addf %180, %204 : vector<1x256xf32>
    %c118 = arith.constant 118 : index
    %206 = memref.load %arg1[%c118] : memref<162xf32, #tpu.memory_space<smem>>
    %207 = vector.broadcast %206 : f32 to vector<1x256xf32>
    %208 = arith.mulf %207, %189 : vector<1x256xf32>
    %209 = arith.addf %184, %208 : vector<1x256xf32>
    %c145 = arith.constant 145 : index
    %210 = memref.load %arg1[%c145] : memref<162xf32, #tpu.memory_space<smem>>
    %211 = vector.broadcast %210 : f32 to vector<1x256xf32>
    %212 = arith.mulf %211, %189 : vector<1x256xf32>
    %213 = arith.addf %188, %212 : vector<1x256xf32>
    %214 = vector.extract_strided_slice %163 {offsets = [2, 0], sizes = [1, 256], strides = [1, 1]} : vector<6x256xf32> to vector<1x256xf32>
    %c19 = arith.constant 19 : index
    %215 = memref.load %arg1[%c19] : memref<162xf32, #tpu.memory_space<smem>>
    %216 = vector.broadcast %215 : f32 to vector<1x256xf32>
    %217 = arith.mulf %216, %214 : vector<1x256xf32>
    %218 = arith.addf %193, %217 : vector<1x256xf32>
    %c46 = arith.constant 46 : index
    %219 = memref.load %arg1[%c46] : memref<162xf32, #tpu.memory_space<smem>>
    %220 = vector.broadcast %219 : f32 to vector<1x256xf32>
    %221 = arith.mulf %220, %214 : vector<1x256xf32>
    %222 = arith.addf %197, %221 : vector<1x256xf32>
    %c73 = arith.constant 73 : index
    %223 = memref.load %arg1[%c73] : memref<162xf32, #tpu.memory_space<smem>>
    %224 = vector.broadcast %223 : f32 to vector<1x256xf32>
    %225 = arith.mulf %224, %214 : vector<1x256xf32>
    %226 = arith.addf %201, %225 : vector<1x256xf32>
    %c100 = arith.constant 100 : index
    %227 = memref.load %arg1[%c100] : memref<162xf32, #tpu.memory_space<smem>>
    %228 = vector.broadcast %227 : f32 to vector<1x256xf32>
    %229 = arith.mulf %228, %214 : vector<1x256xf32>
    %230 = arith.addf %205, %229 : vector<1x256xf32>
    %c127 = arith.constant 127 : index
    %231 = memref.load %arg1[%c127] : memref<162xf32, #tpu.memory_space<smem>>
    %232 = vector.broadcast %231 : f32 to vector<1x256xf32>
    %233 = arith.mulf %232, %214 : vector<1x256xf32>
    %234 = arith.addf %209, %233 : vector<1x256xf32>
    %c154 = arith.constant 154 : index
    %235 = memref.load %arg1[%c154] : memref<162xf32, #tpu.memory_space<smem>>
    %236 = vector.broadcast %235 : f32 to vector<1x256xf32>
    %237 = arith.mulf %236, %214 : vector<1x256xf32>
    %238 = arith.addf %213, %237 : vector<1x256xf32>
    %239 = vector.extract_strided_slice %163 {offsets = [3, 0], sizes = [1, 256], strides = [1, 1]} : vector<6x256xf32> to vector<1x256xf32>
    %c1_22 = arith.constant 1 : index
    %240 = memref.load %arg1[%c1_22] : memref<162xf32, #tpu.memory_space<smem>>
    %241 = vector.broadcast %240 : f32 to vector<1x256xf32>
    %242 = arith.mulf %241, %239 : vector<1x256xf32>
    %243 = arith.addf %142, %242 : vector<1x256xf32>
    %c28_23 = arith.constant 28 : index
    %244 = memref.load %arg1[%c28_23] : memref<162xf32, #tpu.memory_space<smem>>
    %245 = vector.broadcast %244 : f32 to vector<1x256xf32>
    %246 = arith.mulf %245, %239 : vector<1x256xf32>
    %247 = arith.addf %146, %246 : vector<1x256xf32>
    %c55_24 = arith.constant 55 : index
    %248 = memref.load %arg1[%c55_24] : memref<162xf32, #tpu.memory_space<smem>>
    %249 = vector.broadcast %248 : f32 to vector<1x256xf32>
    %250 = arith.mulf %249, %239 : vector<1x256xf32>
    %251 = arith.addf %150, %250 : vector<1x256xf32>
    %c82_25 = arith.constant 82 : index
    %252 = memref.load %arg1[%c82_25] : memref<162xf32, #tpu.memory_space<smem>>
    %253 = vector.broadcast %252 : f32 to vector<1x256xf32>
    %254 = arith.mulf %253, %239 : vector<1x256xf32>
    %255 = arith.addf %154, %254 : vector<1x256xf32>
    %c109_26 = arith.constant 109 : index
    %256 = memref.load %arg1[%c109_26] : memref<162xf32, #tpu.memory_space<smem>>
    %257 = vector.broadcast %256 : f32 to vector<1x256xf32>
    %258 = arith.mulf %257, %239 : vector<1x256xf32>
    %259 = arith.addf %158, %258 : vector<1x256xf32>
    %c136_27 = arith.constant 136 : index
    %260 = memref.load %arg1[%c136_27] : memref<162xf32, #tpu.memory_space<smem>>
    %261 = vector.broadcast %260 : f32 to vector<1x256xf32>
    %262 = arith.mulf %261, %239 : vector<1x256xf32>
    %263 = arith.addf %162, %262 : vector<1x256xf32>
    %264 = vector.extract_strided_slice %163 {offsets = [4, 0], sizes = [1, 256], strides = [1, 1]} : vector<6x256xf32> to vector<1x256xf32>
    %c10_28 = arith.constant 10 : index
    %265 = memref.load %arg1[%c10_28] : memref<162xf32, #tpu.memory_space<smem>>
    %266 = vector.broadcast %265 : f32 to vector<1x256xf32>
    %267 = arith.mulf %266, %264 : vector<1x256xf32>
    %268 = arith.addf %243, %267 : vector<1x256xf32>
    %c37_29 = arith.constant 37 : index
    %269 = memref.load %arg1[%c37_29] : memref<162xf32, #tpu.memory_space<smem>>
    %270 = vector.broadcast %269 : f32 to vector<1x256xf32>
    %271 = arith.mulf %270, %264 : vector<1x256xf32>
    %272 = arith.addf %247, %271 : vector<1x256xf32>
    %c64_30 = arith.constant 64 : index
    %273 = memref.load %arg1[%c64_30] : memref<162xf32, #tpu.memory_space<smem>>
    %274 = vector.broadcast %273 : f32 to vector<1x256xf32>
    %275 = arith.mulf %274, %264 : vector<1x256xf32>
    %276 = arith.addf %251, %275 : vector<1x256xf32>
    %c91_31 = arith.constant 91 : index
    %277 = memref.load %arg1[%c91_31] : memref<162xf32, #tpu.memory_space<smem>>
    %278 = vector.broadcast %277 : f32 to vector<1x256xf32>
    %279 = arith.mulf %278, %264 : vector<1x256xf32>
    %280 = arith.addf %255, %279 : vector<1x256xf32>
    %c118_32 = arith.constant 118 : index
    %281 = memref.load %arg1[%c118_32] : memref<162xf32, #tpu.memory_space<smem>>
    %282 = vector.broadcast %281 : f32 to vector<1x256xf32>
    %283 = arith.mulf %282, %264 : vector<1x256xf32>
    %284 = arith.addf %259, %283 : vector<1x256xf32>
    %c145_33 = arith.constant 145 : index
    %285 = memref.load %arg1[%c145_33] : memref<162xf32, #tpu.memory_space<smem>>
    %286 = vector.broadcast %285 : f32 to vector<1x256xf32>
    %287 = arith.mulf %286, %264 : vector<1x256xf32>
    %288 = arith.addf %263, %287 : vector<1x256xf32>
    %289 = vector.extract_strided_slice %163 {offsets = [5, 0], sizes = [1, 256], strides = [1, 1]} : vector<6x256xf32> to vector<1x256xf32>
    %c19_34 = arith.constant 19 : index
    %290 = memref.load %arg1[%c19_34] : memref<162xf32, #tpu.memory_space<smem>>
    %291 = vector.broadcast %290 : f32 to vector<1x256xf32>
    %292 = arith.mulf %291, %289 : vector<1x256xf32>
    %293 = arith.addf %268, %292 : vector<1x256xf32>
    %c46_35 = arith.constant 46 : index
    %294 = memref.load %arg1[%c46_35] : memref<162xf32, #tpu.memory_space<smem>>
    %295 = vector.broadcast %294 : f32 to vector<1x256xf32>
    %296 = arith.mulf %295, %289 : vector<1x256xf32>
    %297 = arith.addf %272, %296 : vector<1x256xf32>
    %c73_36 = arith.constant 73 : index
    %298 = memref.load %arg1[%c73_36] : memref<162xf32, #tpu.memory_space<smem>>
    %299 = vector.broadcast %298 : f32 to vector<1x256xf32>
    %300 = arith.mulf %299, %289 : vector<1x256xf32>
    %301 = arith.addf %276, %300 : vector<1x256xf32>
    %c100_37 = arith.constant 100 : index
    %302 = memref.load %arg1[%c100_37] : memref<162xf32, #tpu.memory_space<smem>>
    %303 = vector.broadcast %302 : f32 to vector<1x256xf32>
    %304 = arith.mulf %303, %289 : vector<1x256xf32>
    %305 = arith.addf %280, %304 : vector<1x256xf32>
    %c127_38 = arith.constant 127 : index
    %306 = memref.load %arg1[%c127_38] : memref<162xf32, #tpu.memory_space<smem>>
    %307 = vector.broadcast %306 : f32 to vector<1x256xf32>
    %308 = arith.mulf %307, %289 : vector<1x256xf32>
    %309 = arith.addf %284, %308 : vector<1x256xf32>
    %c154_39 = arith.constant 154 : index
    %310 = memref.load %arg1[%c154_39] : memref<162xf32, #tpu.memory_space<smem>>
    %311 = vector.broadcast %310 : f32 to vector<1x256xf32>
    %312 = arith.mulf %311, %289 : vector<1x256xf32>
    %313 = arith.addf %288, %312 : vector<1x256xf32>
    %c254_i32 = arith.constant 254 : i32
    %314 = tpu.dynamic_rotate %0 by %c254_i32 dim 1 : vector<6x256xf32>, i32 -> vector<6x256xf32>
    %315 = vector.extract_strided_slice %314 {offsets = [0, 0], sizes = [1, 256], strides = [1, 1]} : vector<6x256xf32> to vector<1x256xf32>
    %c2_40 = arith.constant 2 : index
    %316 = memref.load %arg1[%c2_40] : memref<162xf32, #tpu.memory_space<smem>>
    %317 = vector.broadcast %316 : f32 to vector<1x256xf32>
    %318 = arith.mulf %317, %315 : vector<1x256xf32>
    %319 = arith.addf %218, %318 : vector<1x256xf32>
    %c29 = arith.constant 29 : index
    %320 = memref.load %arg1[%c29] : memref<162xf32, #tpu.memory_space<smem>>
    %321 = vector.broadcast %320 : f32 to vector<1x256xf32>
    %322 = arith.mulf %321, %315 : vector<1x256xf32>
    %323 = arith.addf %222, %322 : vector<1x256xf32>
    %c56 = arith.constant 56 : index
    %324 = memref.load %arg1[%c56] : memref<162xf32, #tpu.memory_space<smem>>
    %325 = vector.broadcast %324 : f32 to vector<1x256xf32>
    %326 = arith.mulf %325, %315 : vector<1x256xf32>
    %327 = arith.addf %226, %326 : vector<1x256xf32>
    %c83 = arith.constant 83 : index
    %328 = memref.load %arg1[%c83] : memref<162xf32, #tpu.memory_space<smem>>
    %329 = vector.broadcast %328 : f32 to vector<1x256xf32>
    %330 = arith.mulf %329, %315 : vector<1x256xf32>
    %331 = arith.addf %230, %330 : vector<1x256xf32>
    %c110 = arith.constant 110 : index
    %332 = memref.load %arg1[%c110] : memref<162xf32, #tpu.memory_space<smem>>
    %333 = vector.broadcast %332 : f32 to vector<1x256xf32>
    %334 = arith.mulf %333, %315 : vector<1x256xf32>
    %335 = arith.addf %234, %334 : vector<1x256xf32>
    %c137 = arith.constant 137 : index
    %336 = memref.load %arg1[%c137] : memref<162xf32, #tpu.memory_space<smem>>
    %337 = vector.broadcast %336 : f32 to vector<1x256xf32>
    %338 = arith.mulf %337, %315 : vector<1x256xf32>
    %339 = arith.addf %238, %338 : vector<1x256xf32>
    %340 = vector.extract_strided_slice %314 {offsets = [1, 0], sizes = [1, 256], strides = [1, 1]} : vector<6x256xf32> to vector<1x256xf32>
    %c11 = arith.constant 11 : index
    %341 = memref.load %arg1[%c11] : memref<162xf32, #tpu.memory_space<smem>>
    %342 = vector.broadcast %341 : f32 to vector<1x256xf32>
    %343 = arith.mulf %342, %340 : vector<1x256xf32>
    %344 = arith.addf %319, %343 : vector<1x256xf32>
    %c38 = arith.constant 38 : index
    %345 = memref.load %arg1[%c38] : memref<162xf32, #tpu.memory_space<smem>>
    %346 = vector.broadcast %345 : f32 to vector<1x256xf32>
    %347 = arith.mulf %346, %340 : vector<1x256xf32>
    %348 = arith.addf %323, %347 : vector<1x256xf32>
    %c65 = arith.constant 65 : index
    %349 = memref.load %arg1[%c65] : memref<162xf32, #tpu.memory_space<smem>>
    %350 = vector.broadcast %349 : f32 to vector<1x256xf32>
    %351 = arith.mulf %350, %340 : vector<1x256xf32>
    %352 = arith.addf %327, %351 : vector<1x256xf32>
    %c92 = arith.constant 92 : index
    %353 = memref.load %arg1[%c92] : memref<162xf32, #tpu.memory_space<smem>>
    %354 = vector.broadcast %353 : f32 to vector<1x256xf32>
    %355 = arith.mulf %354, %340 : vector<1x256xf32>
    %356 = arith.addf %331, %355 : vector<1x256xf32>
    %c119 = arith.constant 119 : index
    %357 = memref.load %arg1[%c119] : memref<162xf32, #tpu.memory_space<smem>>
    %358 = vector.broadcast %357 : f32 to vector<1x256xf32>
    %359 = arith.mulf %358, %340 : vector<1x256xf32>
    %360 = arith.addf %335, %359 : vector<1x256xf32>
    %c146 = arith.constant 146 : index
    %361 = memref.load %arg1[%c146] : memref<162xf32, #tpu.memory_space<smem>>
    %362 = vector.broadcast %361 : f32 to vector<1x256xf32>
    %363 = arith.mulf %362, %340 : vector<1x256xf32>
    %364 = arith.addf %339, %363 : vector<1x256xf32>
    %365 = vector.extract_strided_slice %314 {offsets = [2, 0], sizes = [1, 256], strides = [1, 1]} : vector<6x256xf32> to vector<1x256xf32>
    %c20 = arith.constant 20 : index
    %366 = memref.load %arg1[%c20] : memref<162xf32, #tpu.memory_space<smem>>
    %367 = vector.broadcast %366 : f32 to vector<1x256xf32>
    %368 = arith.mulf %367, %365 : vector<1x256xf32>
    %369 = arith.addf %344, %368 : vector<1x256xf32>
    %c47 = arith.constant 47 : index
    %370 = memref.load %arg1[%c47] : memref<162xf32, #tpu.memory_space<smem>>
    %371 = vector.broadcast %370 : f32 to vector<1x256xf32>
    %372 = arith.mulf %371, %365 : vector<1x256xf32>
    %373 = arith.addf %348, %372 : vector<1x256xf32>
    %c74 = arith.constant 74 : index
    %374 = memref.load %arg1[%c74] : memref<162xf32, #tpu.memory_space<smem>>
    %375 = vector.broadcast %374 : f32 to vector<1x256xf32>
    %376 = arith.mulf %375, %365 : vector<1x256xf32>
    %377 = arith.addf %352, %376 : vector<1x256xf32>
    %c101 = arith.constant 101 : index
    %378 = memref.load %arg1[%c101] : memref<162xf32, #tpu.memory_space<smem>>
    %379 = vector.broadcast %378 : f32 to vector<1x256xf32>
    %380 = arith.mulf %379, %365 : vector<1x256xf32>
    %381 = arith.addf %356, %380 : vector<1x256xf32>
    %c128 = arith.constant 128 : index
    %382 = memref.load %arg1[%c128] : memref<162xf32, #tpu.memory_space<smem>>
    %383 = vector.broadcast %382 : f32 to vector<1x256xf32>
    %384 = arith.mulf %383, %365 : vector<1x256xf32>
    %385 = arith.addf %360, %384 : vector<1x256xf32>
    %c155 = arith.constant 155 : index
    %386 = memref.load %arg1[%c155] : memref<162xf32, #tpu.memory_space<smem>>
    %387 = vector.broadcast %386 : f32 to vector<1x256xf32>
    %388 = arith.mulf %387, %365 : vector<1x256xf32>
    %389 = arith.addf %364, %388 : vector<1x256xf32>
    %390 = vector.extract_strided_slice %314 {offsets = [3, 0], sizes = [1, 256], strides = [1, 1]} : vector<6x256xf32> to vector<1x256xf32>
    %c2_41 = arith.constant 2 : index
    %391 = memref.load %arg1[%c2_41] : memref<162xf32, #tpu.memory_space<smem>>
    %392 = vector.broadcast %391 : f32 to vector<1x256xf32>
    %393 = arith.mulf %392, %390 : vector<1x256xf32>
    %394 = arith.addf %293, %393 : vector<1x256xf32>
    %c29_42 = arith.constant 29 : index
    %395 = memref.load %arg1[%c29_42] : memref<162xf32, #tpu.memory_space<smem>>
    %396 = vector.broadcast %395 : f32 to vector<1x256xf32>
    %397 = arith.mulf %396, %390 : vector<1x256xf32>
    %398 = arith.addf %297, %397 : vector<1x256xf32>
    %c56_43 = arith.constant 56 : index
    %399 = memref.load %arg1[%c56_43] : memref<162xf32, #tpu.memory_space<smem>>
    %400 = vector.broadcast %399 : f32 to vector<1x256xf32>
    %401 = arith.mulf %400, %390 : vector<1x256xf32>
    %402 = arith.addf %301, %401 : vector<1x256xf32>
    %c83_44 = arith.constant 83 : index
    %403 = memref.load %arg1[%c83_44] : memref<162xf32, #tpu.memory_space<smem>>
    %404 = vector.broadcast %403 : f32 to vector<1x256xf32>
    %405 = arith.mulf %404, %390 : vector<1x256xf32>
    %406 = arith.addf %305, %405 : vector<1x256xf32>
    %c110_45 = arith.constant 110 : index
    %407 = memref.load %arg1[%c110_45] : memref<162xf32, #tpu.memory_space<smem>>
    %408 = vector.broadcast %407 : f32 to vector<1x256xf32>
    %409 = arith.mulf %408, %390 : vector<1x256xf32>
    %410 = arith.addf %309, %409 : vector<1x256xf32>
    %c137_46 = arith.constant 137 : index
    %411 = memref.load %arg1[%c137_46] : memref<162xf32, #tpu.memory_space<smem>>
    %412 = vector.broadcast %411 : f32 to vector<1x256xf32>
    %413 = arith.mulf %412, %390 : vector<1x256xf32>
    %414 = arith.addf %313, %413 : vector<1x256xf32>
    %415 = vector.extract_strided_slice %314 {offsets = [4, 0], sizes = [1, 256], strides = [1, 1]} : vector<6x256xf32> to vector<1x256xf32>
    %c11_47 = arith.constant 11 : index
    %416 = memref.load %arg1[%c11_47] : memref<162xf32, #tpu.memory_space<smem>>
    %417 = vector.broadcast %416 : f32 to vector<1x256xf32>
    %418 = arith.mulf %417, %415 : vector<1x256xf32>
    %419 = arith.addf %394, %418 : vector<1x256xf32>
    %c38_48 = arith.constant 38 : index
    %420 = memref.load %arg1[%c38_48] : memref<162xf32, #tpu.memory_space<smem>>
    %421 = vector.broadcast %420 : f32 to vector<1x256xf32>
    %422 = arith.mulf %421, %415 : vector<1x256xf32>
    %423 = arith.addf %398, %422 : vector<1x256xf32>
    %c65_49 = arith.constant 65 : index
    %424 = memref.load %arg1[%c65_49] : memref<162xf32, #tpu.memory_space<smem>>
    %425 = vector.broadcast %424 : f32 to vector<1x256xf32>
    %426 = arith.mulf %425, %415 : vector<1x256xf32>
    %427 = arith.addf %402, %426 : vector<1x256xf32>
    %c92_50 = arith.constant 92 : index
    %428 = memref.load %arg1[%c92_50] : memref<162xf32, #tpu.memory_space<smem>>
    %429 = vector.broadcast %428 : f32 to vector<1x256xf32>
    %430 = arith.mulf %429, %415 : vector<1x256xf32>
    %431 = arith.addf %406, %430 : vector<1x256xf32>
    %c119_51 = arith.constant 119 : index
    %432 = memref.load %arg1[%c119_51] : memref<162xf32, #tpu.memory_space<smem>>
    %433 = vector.broadcast %432 : f32 to vector<1x256xf32>
    %434 = arith.mulf %433, %415 : vector<1x256xf32>
    %435 = arith.addf %410, %434 : vector<1x256xf32>
    %c146_52 = arith.constant 146 : index
    %436 = memref.load %arg1[%c146_52] : memref<162xf32, #tpu.memory_space<smem>>
    %437 = vector.broadcast %436 : f32 to vector<1x256xf32>
    %438 = arith.mulf %437, %415 : vector<1x256xf32>
    %439 = arith.addf %414, %438 : vector<1x256xf32>
    %440 = vector.extract_strided_slice %314 {offsets = [5, 0], sizes = [1, 256], strides = [1, 1]} : vector<6x256xf32> to vector<1x256xf32>
    %c20_53 = arith.constant 20 : index
    %441 = memref.load %arg1[%c20_53] : memref<162xf32, #tpu.memory_space<smem>>
    %442 = vector.broadcast %441 : f32 to vector<1x256xf32>
    %443 = arith.mulf %442, %440 : vector<1x256xf32>
    %444 = arith.addf %419, %443 : vector<1x256xf32>
    %c47_54 = arith.constant 47 : index
    %445 = memref.load %arg1[%c47_54] : memref<162xf32, #tpu.memory_space<smem>>
    %446 = vector.broadcast %445 : f32 to vector<1x256xf32>
    %447 = arith.mulf %446, %440 : vector<1x256xf32>
    %448 = arith.addf %423, %447 : vector<1x256xf32>
    %c74_55 = arith.constant 74 : index
    %449 = memref.load %arg1[%c74_55] : memref<162xf32, #tpu.memory_space<smem>>
    %450 = vector.broadcast %449 : f32 to vector<1x256xf32>
    %451 = arith.mulf %450, %440 : vector<1x256xf32>
    %452 = arith.addf %427, %451 : vector<1x256xf32>
    %c101_56 = arith.constant 101 : index
    %453 = memref.load %arg1[%c101_56] : memref<162xf32, #tpu.memory_space<smem>>
    %454 = vector.broadcast %453 : f32 to vector<1x256xf32>
    %455 = arith.mulf %454, %440 : vector<1x256xf32>
    %456 = arith.addf %431, %455 : vector<1x256xf32>
    %c128_57 = arith.constant 128 : index
    %457 = memref.load %arg1[%c128_57] : memref<162xf32, #tpu.memory_space<smem>>
    %458 = vector.broadcast %457 : f32 to vector<1x256xf32>
    %459 = arith.mulf %458, %440 : vector<1x256xf32>
    %460 = arith.addf %435, %459 : vector<1x256xf32>
    %c155_58 = arith.constant 155 : index
    %461 = memref.load %arg1[%c155_58] : memref<162xf32, #tpu.memory_space<smem>>
    %462 = vector.broadcast %461 : f32 to vector<1x256xf32>
    %463 = arith.mulf %462, %440 : vector<1x256xf32>
    %464 = arith.addf %439, %463 : vector<1x256xf32>
    %c240_i32 = arith.constant 240 : i32
    %465 = tpu.dynamic_rotate %0 by %c240_i32 dim 1 : vector<6x256xf32>, i32 -> vector<6x256xf32>
    %466 = vector.extract_strided_slice %465 {offsets = [0, 0], sizes = [1, 256], strides = [1, 1]} : vector<6x256xf32> to vector<1x256xf32>
    %c3_59 = arith.constant 3 : index
    %467 = memref.load %arg1[%c3_59] : memref<162xf32, #tpu.memory_space<smem>>
    %468 = vector.broadcast %467 : f32 to vector<1x256xf32>
    %469 = arith.mulf %468, %466 : vector<1x256xf32>
    %470 = arith.addf %369, %469 : vector<1x256xf32>
    %c30 = arith.constant 30 : index
    %471 = memref.load %arg1[%c30] : memref<162xf32, #tpu.memory_space<smem>>
    %472 = vector.broadcast %471 : f32 to vector<1x256xf32>
    %473 = arith.mulf %472, %466 : vector<1x256xf32>
    %474 = arith.addf %373, %473 : vector<1x256xf32>
    %c57 = arith.constant 57 : index
    %475 = memref.load %arg1[%c57] : memref<162xf32, #tpu.memory_space<smem>>
    %476 = vector.broadcast %475 : f32 to vector<1x256xf32>
    %477 = arith.mulf %476, %466 : vector<1x256xf32>
    %478 = arith.addf %377, %477 : vector<1x256xf32>
    %c84 = arith.constant 84 : index
    %479 = memref.load %arg1[%c84] : memref<162xf32, #tpu.memory_space<smem>>
    %480 = vector.broadcast %479 : f32 to vector<1x256xf32>
    %481 = arith.mulf %480, %466 : vector<1x256xf32>
    %482 = arith.addf %381, %481 : vector<1x256xf32>
    %c111 = arith.constant 111 : index
    %483 = memref.load %arg1[%c111] : memref<162xf32, #tpu.memory_space<smem>>
    %484 = vector.broadcast %483 : f32 to vector<1x256xf32>
    %485 = arith.mulf %484, %466 : vector<1x256xf32>
    %486 = arith.addf %385, %485 : vector<1x256xf32>
    %c138 = arith.constant 138 : index
    %487 = memref.load %arg1[%c138] : memref<162xf32, #tpu.memory_space<smem>>
    %488 = vector.broadcast %487 : f32 to vector<1x256xf32>
    %489 = arith.mulf %488, %466 : vector<1x256xf32>
    %490 = arith.addf %389, %489 : vector<1x256xf32>
    %491 = vector.extract_strided_slice %465 {offsets = [1, 0], sizes = [1, 256], strides = [1, 1]} : vector<6x256xf32> to vector<1x256xf32>
    %c12 = arith.constant 12 : index
    %492 = memref.load %arg1[%c12] : memref<162xf32, #tpu.memory_space<smem>>
    %493 = vector.broadcast %492 : f32 to vector<1x256xf32>
    %494 = arith.mulf %493, %491 : vector<1x256xf32>
    %495 = arith.addf %470, %494 : vector<1x256xf32>
    %c39 = arith.constant 39 : index
    %496 = memref.load %arg1[%c39] : memref<162xf32, #tpu.memory_space<smem>>
    %497 = vector.broadcast %496 : f32 to vector<1x256xf32>
    %498 = arith.mulf %497, %491 : vector<1x256xf32>
    %499 = arith.addf %474, %498 : vector<1x256xf32>
    %c66 = arith.constant 66 : index
    %500 = memref.load %arg1[%c66] : memref<162xf32, #tpu.memory_space<smem>>
    %501 = vector.broadcast %500 : f32 to vector<1x256xf32>
    %502 = arith.mulf %501, %491 : vector<1x256xf32>
    %503 = arith.addf %478, %502 : vector<1x256xf32>
    %c93 = arith.constant 93 : index
    %504 = memref.load %arg1[%c93] : memref<162xf32, #tpu.memory_space<smem>>
    %505 = vector.broadcast %504 : f32 to vector<1x256xf32>
    %506 = arith.mulf %505, %491 : vector<1x256xf32>
    %507 = arith.addf %482, %506 : vector<1x256xf32>
    %c120 = arith.constant 120 : index
    %508 = memref.load %arg1[%c120] : memref<162xf32, #tpu.memory_space<smem>>
    %509 = vector.broadcast %508 : f32 to vector<1x256xf32>
    %510 = arith.mulf %509, %491 : vector<1x256xf32>
    %511 = arith.addf %486, %510 : vector<1x256xf32>
    %c147 = arith.constant 147 : index
    %512 = memref.load %arg1[%c147] : memref<162xf32, #tpu.memory_space<smem>>
    %513 = vector.broadcast %512 : f32 to vector<1x256xf32>
    %514 = arith.mulf %513, %491 : vector<1x256xf32>
    %515 = arith.addf %490, %514 : vector<1x256xf32>
    %516 = vector.extract_strided_slice %465 {offsets = [2, 0], sizes = [1, 256], strides = [1, 1]} : vector<6x256xf32> to vector<1x256xf32>
    %c21 = arith.constant 21 : index
    %517 = memref.load %arg1[%c21] : memref<162xf32, #tpu.memory_space<smem>>
    %518 = vector.broadcast %517 : f32 to vector<1x256xf32>
    %519 = arith.mulf %518, %516 : vector<1x256xf32>
    %520 = arith.addf %495, %519 : vector<1x256xf32>
    %c48 = arith.constant 48 : index
    %521 = memref.load %arg1[%c48] : memref<162xf32, #tpu.memory_space<smem>>
    %522 = vector.broadcast %521 : f32 to vector<1x256xf32>
    %523 = arith.mulf %522, %516 : vector<1x256xf32>
    %524 = arith.addf %499, %523 : vector<1x256xf32>
    %c75 = arith.constant 75 : index
    %525 = memref.load %arg1[%c75] : memref<162xf32, #tpu.memory_space<smem>>
    %526 = vector.broadcast %525 : f32 to vector<1x256xf32>
    %527 = arith.mulf %526, %516 : vector<1x256xf32>
    %528 = arith.addf %503, %527 : vector<1x256xf32>
    %c102 = arith.constant 102 : index
    %529 = memref.load %arg1[%c102] : memref<162xf32, #tpu.memory_space<smem>>
    %530 = vector.broadcast %529 : f32 to vector<1x256xf32>
    %531 = arith.mulf %530, %516 : vector<1x256xf32>
    %532 = arith.addf %507, %531 : vector<1x256xf32>
    %c129 = arith.constant 129 : index
    %533 = memref.load %arg1[%c129] : memref<162xf32, #tpu.memory_space<smem>>
    %534 = vector.broadcast %533 : f32 to vector<1x256xf32>
    %535 = arith.mulf %534, %516 : vector<1x256xf32>
    %536 = arith.addf %511, %535 : vector<1x256xf32>
    %c156 = arith.constant 156 : index
    %537 = memref.load %arg1[%c156] : memref<162xf32, #tpu.memory_space<smem>>
    %538 = vector.broadcast %537 : f32 to vector<1x256xf32>
    %539 = arith.mulf %538, %516 : vector<1x256xf32>
    %540 = arith.addf %515, %539 : vector<1x256xf32>
    %541 = vector.extract_strided_slice %465 {offsets = [3, 0], sizes = [1, 256], strides = [1, 1]} : vector<6x256xf32> to vector<1x256xf32>
    %c3_60 = arith.constant 3 : index
    %542 = memref.load %arg1[%c3_60] : memref<162xf32, #tpu.memory_space<smem>>
    %543 = vector.broadcast %542 : f32 to vector<1x256xf32>
    %544 = arith.mulf %543, %541 : vector<1x256xf32>
    %545 = arith.addf %444, %544 : vector<1x256xf32>
    %c30_61 = arith.constant 30 : index
    %546 = memref.load %arg1[%c30_61] : memref<162xf32, #tpu.memory_space<smem>>
    %547 = vector.broadcast %546 : f32 to vector<1x256xf32>
    %548 = arith.mulf %547, %541 : vector<1x256xf32>
    %549 = arith.addf %448, %548 : vector<1x256xf32>
    %c57_62 = arith.constant 57 : index
    %550 = memref.load %arg1[%c57_62] : memref<162xf32, #tpu.memory_space<smem>>
    %551 = vector.broadcast %550 : f32 to vector<1x256xf32>
    %552 = arith.mulf %551, %541 : vector<1x256xf32>
    %553 = arith.addf %452, %552 : vector<1x256xf32>
    %c84_63 = arith.constant 84 : index
    %554 = memref.load %arg1[%c84_63] : memref<162xf32, #tpu.memory_space<smem>>
    %555 = vector.broadcast %554 : f32 to vector<1x256xf32>
    %556 = arith.mulf %555, %541 : vector<1x256xf32>
    %557 = arith.addf %456, %556 : vector<1x256xf32>
    %c111_64 = arith.constant 111 : index
    %558 = memref.load %arg1[%c111_64] : memref<162xf32, #tpu.memory_space<smem>>
    %559 = vector.broadcast %558 : f32 to vector<1x256xf32>
    %560 = arith.mulf %559, %541 : vector<1x256xf32>
    %561 = arith.addf %460, %560 : vector<1x256xf32>
    %c138_65 = arith.constant 138 : index
    %562 = memref.load %arg1[%c138_65] : memref<162xf32, #tpu.memory_space<smem>>
    %563 = vector.broadcast %562 : f32 to vector<1x256xf32>
    %564 = arith.mulf %563, %541 : vector<1x256xf32>
    %565 = arith.addf %464, %564 : vector<1x256xf32>
    %566 = vector.extract_strided_slice %465 {offsets = [4, 0], sizes = [1, 256], strides = [1, 1]} : vector<6x256xf32> to vector<1x256xf32>
    %c12_66 = arith.constant 12 : index
    %567 = memref.load %arg1[%c12_66] : memref<162xf32, #tpu.memory_space<smem>>
    %568 = vector.broadcast %567 : f32 to vector<1x256xf32>
    %569 = arith.mulf %568, %566 : vector<1x256xf32>
    %570 = arith.addf %545, %569 : vector<1x256xf32>
    %c39_67 = arith.constant 39 : index
    %571 = memref.load %arg1[%c39_67] : memref<162xf32, #tpu.memory_space<smem>>
    %572 = vector.broadcast %571 : f32 to vector<1x256xf32>
    %573 = arith.mulf %572, %566 : vector<1x256xf32>
    %574 = arith.addf %549, %573 : vector<1x256xf32>
    %c66_68 = arith.constant 66 : index
    %575 = memref.load %arg1[%c66_68] : memref<162xf32, #tpu.memory_space<smem>>
    %576 = vector.broadcast %575 : f32 to vector<1x256xf32>
    %577 = arith.mulf %576, %566 : vector<1x256xf32>
    %578 = arith.addf %553, %577 : vector<1x256xf32>
    %c93_69 = arith.constant 93 : index
    %579 = memref.load %arg1[%c93_69] : memref<162xf32, #tpu.memory_space<smem>>
    %580 = vector.broadcast %579 : f32 to vector<1x256xf32>
    %581 = arith.mulf %580, %566 : vector<1x256xf32>
    %582 = arith.addf %557, %581 : vector<1x256xf32>
    %c120_70 = arith.constant 120 : index
    %583 = memref.load %arg1[%c120_70] : memref<162xf32, #tpu.memory_space<smem>>
    %584 = vector.broadcast %583 : f32 to vector<1x256xf32>
    %585 = arith.mulf %584, %566 : vector<1x256xf32>
    %586 = arith.addf %561, %585 : vector<1x256xf32>
    %c147_71 = arith.constant 147 : index
    %587 = memref.load %arg1[%c147_71] : memref<162xf32, #tpu.memory_space<smem>>
    %588 = vector.broadcast %587 : f32 to vector<1x256xf32>
    %589 = arith.mulf %588, %566 : vector<1x256xf32>
    %590 = arith.addf %565, %589 : vector<1x256xf32>
    %591 = vector.extract_strided_slice %465 {offsets = [5, 0], sizes = [1, 256], strides = [1, 1]} : vector<6x256xf32> to vector<1x256xf32>
    %c21_72 = arith.constant 21 : index
    %592 = memref.load %arg1[%c21_72] : memref<162xf32, #tpu.memory_space<smem>>
    %593 = vector.broadcast %592 : f32 to vector<1x256xf32>
    %594 = arith.mulf %593, %591 : vector<1x256xf32>
    %595 = arith.addf %570, %594 : vector<1x256xf32>
    %c48_73 = arith.constant 48 : index
    %596 = memref.load %arg1[%c48_73] : memref<162xf32, #tpu.memory_space<smem>>
    %597 = vector.broadcast %596 : f32 to vector<1x256xf32>
    %598 = arith.mulf %597, %591 : vector<1x256xf32>
    %599 = arith.addf %574, %598 : vector<1x256xf32>
    %c75_74 = arith.constant 75 : index
    %600 = memref.load %arg1[%c75_74] : memref<162xf32, #tpu.memory_space<smem>>
    %601 = vector.broadcast %600 : f32 to vector<1x256xf32>
    %602 = arith.mulf %601, %591 : vector<1x256xf32>
    %603 = arith.addf %578, %602 : vector<1x256xf32>
    %c102_75 = arith.constant 102 : index
    %604 = memref.load %arg1[%c102_75] : memref<162xf32, #tpu.memory_space<smem>>
    %605 = vector.broadcast %604 : f32 to vector<1x256xf32>
    %606 = arith.mulf %605, %591 : vector<1x256xf32>
    %607 = arith.addf %582, %606 : vector<1x256xf32>
    %c129_76 = arith.constant 129 : index
    %608 = memref.load %arg1[%c129_76] : memref<162xf32, #tpu.memory_space<smem>>
    %609 = vector.broadcast %608 : f32 to vector<1x256xf32>
    %610 = arith.mulf %609, %591 : vector<1x256xf32>
    %611 = arith.addf %586, %610 : vector<1x256xf32>
    %c156_77 = arith.constant 156 : index
    %612 = memref.load %arg1[%c156_77] : memref<162xf32, #tpu.memory_space<smem>>
    %613 = vector.broadcast %612 : f32 to vector<1x256xf32>
    %614 = arith.mulf %613, %591 : vector<1x256xf32>
    %615 = arith.addf %590, %614 : vector<1x256xf32>
    %c239_i32 = arith.constant 239 : i32
    %616 = tpu.dynamic_rotate %0 by %c239_i32 dim 1 : vector<6x256xf32>, i32 -> vector<6x256xf32>
    %617 = vector.extract_strided_slice %616 {offsets = [0, 0], sizes = [1, 256], strides = [1, 1]} : vector<6x256xf32> to vector<1x256xf32>
    %c4_78 = arith.constant 4 : index
    %618 = memref.load %arg1[%c4_78] : memref<162xf32, #tpu.memory_space<smem>>
    %619 = vector.broadcast %618 : f32 to vector<1x256xf32>
    %620 = arith.mulf %619, %617 : vector<1x256xf32>
    %621 = arith.addf %520, %620 : vector<1x256xf32>
    %c31 = arith.constant 31 : index
    %622 = memref.load %arg1[%c31] : memref<162xf32, #tpu.memory_space<smem>>
    %623 = vector.broadcast %622 : f32 to vector<1x256xf32>
    %624 = arith.mulf %623, %617 : vector<1x256xf32>
    %625 = arith.addf %524, %624 : vector<1x256xf32>
    %c58 = arith.constant 58 : index
    %626 = memref.load %arg1[%c58] : memref<162xf32, #tpu.memory_space<smem>>
    %627 = vector.broadcast %626 : f32 to vector<1x256xf32>
    %628 = arith.mulf %627, %617 : vector<1x256xf32>
    %629 = arith.addf %528, %628 : vector<1x256xf32>
    %c85 = arith.constant 85 : index
    %630 = memref.load %arg1[%c85] : memref<162xf32, #tpu.memory_space<smem>>
    %631 = vector.broadcast %630 : f32 to vector<1x256xf32>
    %632 = arith.mulf %631, %617 : vector<1x256xf32>
    %633 = arith.addf %532, %632 : vector<1x256xf32>
    %c112 = arith.constant 112 : index
    %634 = memref.load %arg1[%c112] : memref<162xf32, #tpu.memory_space<smem>>
    %635 = vector.broadcast %634 : f32 to vector<1x256xf32>
    %636 = arith.mulf %635, %617 : vector<1x256xf32>
    %637 = arith.addf %536, %636 : vector<1x256xf32>
    %c139 = arith.constant 139 : index
    %638 = memref.load %arg1[%c139] : memref<162xf32, #tpu.memory_space<smem>>
    %639 = vector.broadcast %638 : f32 to vector<1x256xf32>
    %640 = arith.mulf %639, %617 : vector<1x256xf32>
    %641 = arith.addf %540, %640 : vector<1x256xf32>
    %642 = vector.extract_strided_slice %616 {offsets = [1, 0], sizes = [1, 256], strides = [1, 1]} : vector<6x256xf32> to vector<1x256xf32>
    %c13 = arith.constant 13 : index
    %643 = memref.load %arg1[%c13] : memref<162xf32, #tpu.memory_space<smem>>
    %644 = vector.broadcast %643 : f32 to vector<1x256xf32>
    %645 = arith.mulf %644, %642 : vector<1x256xf32>
    %646 = arith.addf %621, %645 : vector<1x256xf32>
    %c40 = arith.constant 40 : index
    %647 = memref.load %arg1[%c40] : memref<162xf32, #tpu.memory_space<smem>>
    %648 = vector.broadcast %647 : f32 to vector<1x256xf32>
    %649 = arith.mulf %648, %642 : vector<1x256xf32>
    %650 = arith.addf %625, %649 : vector<1x256xf32>
    %c67 = arith.constant 67 : index
    %651 = memref.load %arg1[%c67] : memref<162xf32, #tpu.memory_space<smem>>
    %652 = vector.broadcast %651 : f32 to vector<1x256xf32>
    %653 = arith.mulf %652, %642 : vector<1x256xf32>
    %654 = arith.addf %629, %653 : vector<1x256xf32>
    %c94 = arith.constant 94 : index
    %655 = memref.load %arg1[%c94] : memref<162xf32, #tpu.memory_space<smem>>
    %656 = vector.broadcast %655 : f32 to vector<1x256xf32>
    %657 = arith.mulf %656, %642 : vector<1x256xf32>
    %658 = arith.addf %633, %657 : vector<1x256xf32>
    %c121 = arith.constant 121 : index
    %659 = memref.load %arg1[%c121] : memref<162xf32, #tpu.memory_space<smem>>
    %660 = vector.broadcast %659 : f32 to vector<1x256xf32>
    %661 = arith.mulf %660, %642 : vector<1x256xf32>
    %662 = arith.addf %637, %661 : vector<1x256xf32>
    %c148 = arith.constant 148 : index
    %663 = memref.load %arg1[%c148] : memref<162xf32, #tpu.memory_space<smem>>
    %664 = vector.broadcast %663 : f32 to vector<1x256xf32>
    %665 = arith.mulf %664, %642 : vector<1x256xf32>
    %666 = arith.addf %641, %665 : vector<1x256xf32>
    %667 = vector.extract_strided_slice %616 {offsets = [2, 0], sizes = [1, 256], strides = [1, 1]} : vector<6x256xf32> to vector<1x256xf32>
    %c22 = arith.constant 22 : index
    %668 = memref.load %arg1[%c22] : memref<162xf32, #tpu.memory_space<smem>>
    %669 = vector.broadcast %668 : f32 to vector<1x256xf32>
    %670 = arith.mulf %669, %667 : vector<1x256xf32>
    %671 = arith.addf %646, %670 : vector<1x256xf32>
    %c49 = arith.constant 49 : index
    %672 = memref.load %arg1[%c49] : memref<162xf32, #tpu.memory_space<smem>>
    %673 = vector.broadcast %672 : f32 to vector<1x256xf32>
    %674 = arith.mulf %673, %667 : vector<1x256xf32>
    %675 = arith.addf %650, %674 : vector<1x256xf32>
    %c76 = arith.constant 76 : index
    %676 = memref.load %arg1[%c76] : memref<162xf32, #tpu.memory_space<smem>>
    %677 = vector.broadcast %676 : f32 to vector<1x256xf32>
    %678 = arith.mulf %677, %667 : vector<1x256xf32>
    %679 = arith.addf %654, %678 : vector<1x256xf32>
    %c103 = arith.constant 103 : index
    %680 = memref.load %arg1[%c103] : memref<162xf32, #tpu.memory_space<smem>>
    %681 = vector.broadcast %680 : f32 to vector<1x256xf32>
    %682 = arith.mulf %681, %667 : vector<1x256xf32>
    %683 = arith.addf %658, %682 : vector<1x256xf32>
    %c130 = arith.constant 130 : index
    %684 = memref.load %arg1[%c130] : memref<162xf32, #tpu.memory_space<smem>>
    %685 = vector.broadcast %684 : f32 to vector<1x256xf32>
    %686 = arith.mulf %685, %667 : vector<1x256xf32>
    %687 = arith.addf %662, %686 : vector<1x256xf32>
    %c157 = arith.constant 157 : index
    %688 = memref.load %arg1[%c157] : memref<162xf32, #tpu.memory_space<smem>>
    %689 = vector.broadcast %688 : f32 to vector<1x256xf32>
    %690 = arith.mulf %689, %667 : vector<1x256xf32>
    %691 = arith.addf %666, %690 : vector<1x256xf32>
    %692 = vector.extract_strided_slice %616 {offsets = [3, 0], sizes = [1, 256], strides = [1, 1]} : vector<6x256xf32> to vector<1x256xf32>
    %c4_79 = arith.constant 4 : index
    %693 = memref.load %arg1[%c4_79] : memref<162xf32, #tpu.memory_space<smem>>
    %694 = vector.broadcast %693 : f32 to vector<1x256xf32>
    %695 = arith.mulf %694, %692 : vector<1x256xf32>
    %696 = arith.addf %595, %695 : vector<1x256xf32>
    %c31_80 = arith.constant 31 : index
    %697 = memref.load %arg1[%c31_80] : memref<162xf32, #tpu.memory_space<smem>>
    %698 = vector.broadcast %697 : f32 to vector<1x256xf32>
    %699 = arith.mulf %698, %692 : vector<1x256xf32>
    %700 = arith.addf %599, %699 : vector<1x256xf32>
    %c58_81 = arith.constant 58 : index
    %701 = memref.load %arg1[%c58_81] : memref<162xf32, #tpu.memory_space<smem>>
    %702 = vector.broadcast %701 : f32 to vector<1x256xf32>
    %703 = arith.mulf %702, %692 : vector<1x256xf32>
    %704 = arith.addf %603, %703 : vector<1x256xf32>
    %c85_82 = arith.constant 85 : index
    %705 = memref.load %arg1[%c85_82] : memref<162xf32, #tpu.memory_space<smem>>
    %706 = vector.broadcast %705 : f32 to vector<1x256xf32>
    %707 = arith.mulf %706, %692 : vector<1x256xf32>
    %708 = arith.addf %607, %707 : vector<1x256xf32>
    %c112_83 = arith.constant 112 : index
    %709 = memref.load %arg1[%c112_83] : memref<162xf32, #tpu.memory_space<smem>>
    %710 = vector.broadcast %709 : f32 to vector<1x256xf32>
    %711 = arith.mulf %710, %692 : vector<1x256xf32>
    %712 = arith.addf %611, %711 : vector<1x256xf32>
    %c139_84 = arith.constant 139 : index
    %713 = memref.load %arg1[%c139_84] : memref<162xf32, #tpu.memory_space<smem>>
    %714 = vector.broadcast %713 : f32 to vector<1x256xf32>
    %715 = arith.mulf %714, %692 : vector<1x256xf32>
    %716 = arith.addf %615, %715 : vector<1x256xf32>
    %717 = vector.extract_strided_slice %616 {offsets = [4, 0], sizes = [1, 256], strides = [1, 1]} : vector<6x256xf32> to vector<1x256xf32>
    %c13_85 = arith.constant 13 : index
    %718 = memref.load %arg1[%c13_85] : memref<162xf32, #tpu.memory_space<smem>>
    %719 = vector.broadcast %718 : f32 to vector<1x256xf32>
    %720 = arith.mulf %719, %717 : vector<1x256xf32>
    %721 = arith.addf %696, %720 : vector<1x256xf32>
    %c40_86 = arith.constant 40 : index
    %722 = memref.load %arg1[%c40_86] : memref<162xf32, #tpu.memory_space<smem>>
    %723 = vector.broadcast %722 : f32 to vector<1x256xf32>
    %724 = arith.mulf %723, %717 : vector<1x256xf32>
    %725 = arith.addf %700, %724 : vector<1x256xf32>
    %c67_87 = arith.constant 67 : index
    %726 = memref.load %arg1[%c67_87] : memref<162xf32, #tpu.memory_space<smem>>
    %727 = vector.broadcast %726 : f32 to vector<1x256xf32>
    %728 = arith.mulf %727, %717 : vector<1x256xf32>
    %729 = arith.addf %704, %728 : vector<1x256xf32>
    %c94_88 = arith.constant 94 : index
    %730 = memref.load %arg1[%c94_88] : memref<162xf32, #tpu.memory_space<smem>>
    %731 = vector.broadcast %730 : f32 to vector<1x256xf32>
    %732 = arith.mulf %731, %717 : vector<1x256xf32>
    %733 = arith.addf %708, %732 : vector<1x256xf32>
    %c121_89 = arith.constant 121 : index
    %734 = memref.load %arg1[%c121_89] : memref<162xf32, #tpu.memory_space<smem>>
    %735 = vector.broadcast %734 : f32 to vector<1x256xf32>
    %736 = arith.mulf %735, %717 : vector<1x256xf32>
    %737 = arith.addf %712, %736 : vector<1x256xf32>
    %c148_90 = arith.constant 148 : index
    %738 = memref.load %arg1[%c148_90] : memref<162xf32, #tpu.memory_space<smem>>
    %739 = vector.broadcast %738 : f32 to vector<1x256xf32>
    %740 = arith.mulf %739, %717 : vector<1x256xf32>
    %741 = arith.addf %716, %740 : vector<1x256xf32>
    %742 = vector.extract_strided_slice %616 {offsets = [5, 0], sizes = [1, 256], strides = [1, 1]} : vector<6x256xf32> to vector<1x256xf32>
    %c22_91 = arith.constant 22 : index
    %743 = memref.load %arg1[%c22_91] : memref<162xf32, #tpu.memory_space<smem>>
    %744 = vector.broadcast %743 : f32 to vector<1x256xf32>
    %745 = arith.mulf %744, %742 : vector<1x256xf32>
    %746 = arith.addf %721, %745 : vector<1x256xf32>
    %c49_92 = arith.constant 49 : index
    %747 = memref.load %arg1[%c49_92] : memref<162xf32, #tpu.memory_space<smem>>
    %748 = vector.broadcast %747 : f32 to vector<1x256xf32>
    %749 = arith.mulf %748, %742 : vector<1x256xf32>
    %750 = arith.addf %725, %749 : vector<1x256xf32>
    %c76_93 = arith.constant 76 : index
    %751 = memref.load %arg1[%c76_93] : memref<162xf32, #tpu.memory_space<smem>>
    %752 = vector.broadcast %751 : f32 to vector<1x256xf32>
    %753 = arith.mulf %752, %742 : vector<1x256xf32>
    %754 = arith.addf %729, %753 : vector<1x256xf32>
    %c103_94 = arith.constant 103 : index
    %755 = memref.load %arg1[%c103_94] : memref<162xf32, #tpu.memory_space<smem>>
    %756 = vector.broadcast %755 : f32 to vector<1x256xf32>
    %757 = arith.mulf %756, %742 : vector<1x256xf32>
    %758 = arith.addf %733, %757 : vector<1x256xf32>
    %c130_95 = arith.constant 130 : index
    %759 = memref.load %arg1[%c130_95] : memref<162xf32, #tpu.memory_space<smem>>
    %760 = vector.broadcast %759 : f32 to vector<1x256xf32>
    %761 = arith.mulf %760, %742 : vector<1x256xf32>
    %762 = arith.addf %737, %761 : vector<1x256xf32>
    %c157_96 = arith.constant 157 : index
    %763 = memref.load %arg1[%c157_96] : memref<162xf32, #tpu.memory_space<smem>>
    %764 = vector.broadcast %763 : f32 to vector<1x256xf32>
    %765 = arith.mulf %764, %742 : vector<1x256xf32>
    %766 = arith.addf %741, %765 : vector<1x256xf32>
    %c238_i32 = arith.constant 238 : i32
    %767 = tpu.dynamic_rotate %0 by %c238_i32 dim 1 : vector<6x256xf32>, i32 -> vector<6x256xf32>
    %768 = vector.extract_strided_slice %767 {offsets = [0, 0], sizes = [1, 256], strides = [1, 1]} : vector<6x256xf32> to vector<1x256xf32>
    %c5_97 = arith.constant 5 : index
    %769 = memref.load %arg1[%c5_97] : memref<162xf32, #tpu.memory_space<smem>>
    %770 = vector.broadcast %769 : f32 to vector<1x256xf32>
    %771 = arith.mulf %770, %768 : vector<1x256xf32>
    %772 = arith.addf %671, %771 : vector<1x256xf32>
    %c32 = arith.constant 32 : index
    %773 = memref.load %arg1[%c32] : memref<162xf32, #tpu.memory_space<smem>>
    %774 = vector.broadcast %773 : f32 to vector<1x256xf32>
    %775 = arith.mulf %774, %768 : vector<1x256xf32>
    %776 = arith.addf %675, %775 : vector<1x256xf32>
    %c59 = arith.constant 59 : index
    %777 = memref.load %arg1[%c59] : memref<162xf32, #tpu.memory_space<smem>>
    %778 = vector.broadcast %777 : f32 to vector<1x256xf32>
    %779 = arith.mulf %778, %768 : vector<1x256xf32>
    %780 = arith.addf %679, %779 : vector<1x256xf32>
    %c86 = arith.constant 86 : index
    %781 = memref.load %arg1[%c86] : memref<162xf32, #tpu.memory_space<smem>>
    %782 = vector.broadcast %781 : f32 to vector<1x256xf32>
    %783 = arith.mulf %782, %768 : vector<1x256xf32>
    %784 = arith.addf %683, %783 : vector<1x256xf32>
    %c113 = arith.constant 113 : index
    %785 = memref.load %arg1[%c113] : memref<162xf32, #tpu.memory_space<smem>>
    %786 = vector.broadcast %785 : f32 to vector<1x256xf32>
    %787 = arith.mulf %786, %768 : vector<1x256xf32>
    %788 = arith.addf %687, %787 : vector<1x256xf32>
    %c140 = arith.constant 140 : index
    %789 = memref.load %arg1[%c140] : memref<162xf32, #tpu.memory_space<smem>>
    %790 = vector.broadcast %789 : f32 to vector<1x256xf32>
    %791 = arith.mulf %790, %768 : vector<1x256xf32>
    %792 = arith.addf %691, %791 : vector<1x256xf32>
    %793 = vector.extract_strided_slice %767 {offsets = [1, 0], sizes = [1, 256], strides = [1, 1]} : vector<6x256xf32> to vector<1x256xf32>
    %c14 = arith.constant 14 : index
    %794 = memref.load %arg1[%c14] : memref<162xf32, #tpu.memory_space<smem>>
    %795 = vector.broadcast %794 : f32 to vector<1x256xf32>
    %796 = arith.mulf %795, %793 : vector<1x256xf32>
    %797 = arith.addf %772, %796 : vector<1x256xf32>
    %c41 = arith.constant 41 : index
    %798 = memref.load %arg1[%c41] : memref<162xf32, #tpu.memory_space<smem>>
    %799 = vector.broadcast %798 : f32 to vector<1x256xf32>
    %800 = arith.mulf %799, %793 : vector<1x256xf32>
    %801 = arith.addf %776, %800 : vector<1x256xf32>
    %c68 = arith.constant 68 : index
    %802 = memref.load %arg1[%c68] : memref<162xf32, #tpu.memory_space<smem>>
    %803 = vector.broadcast %802 : f32 to vector<1x256xf32>
    %804 = arith.mulf %803, %793 : vector<1x256xf32>
    %805 = arith.addf %780, %804 : vector<1x256xf32>
    %c95 = arith.constant 95 : index
    %806 = memref.load %arg1[%c95] : memref<162xf32, #tpu.memory_space<smem>>
    %807 = vector.broadcast %806 : f32 to vector<1x256xf32>
    %808 = arith.mulf %807, %793 : vector<1x256xf32>
    %809 = arith.addf %784, %808 : vector<1x256xf32>
    %c122 = arith.constant 122 : index
    %810 = memref.load %arg1[%c122] : memref<162xf32, #tpu.memory_space<smem>>
    %811 = vector.broadcast %810 : f32 to vector<1x256xf32>
    %812 = arith.mulf %811, %793 : vector<1x256xf32>
    %813 = arith.addf %788, %812 : vector<1x256xf32>
    %c149 = arith.constant 149 : index
    %814 = memref.load %arg1[%c149] : memref<162xf32, #tpu.memory_space<smem>>
    %815 = vector.broadcast %814 : f32 to vector<1x256xf32>
    %816 = arith.mulf %815, %793 : vector<1x256xf32>
    %817 = arith.addf %792, %816 : vector<1x256xf32>
    %818 = vector.extract_strided_slice %767 {offsets = [2, 0], sizes = [1, 256], strides = [1, 1]} : vector<6x256xf32> to vector<1x256xf32>
    %c23 = arith.constant 23 : index
    %819 = memref.load %arg1[%c23] : memref<162xf32, #tpu.memory_space<smem>>
    %820 = vector.broadcast %819 : f32 to vector<1x256xf32>
    %821 = arith.mulf %820, %818 : vector<1x256xf32>
    %822 = arith.addf %797, %821 : vector<1x256xf32>
    %c50 = arith.constant 50 : index
    %823 = memref.load %arg1[%c50] : memref<162xf32, #tpu.memory_space<smem>>
    %824 = vector.broadcast %823 : f32 to vector<1x256xf32>
    %825 = arith.mulf %824, %818 : vector<1x256xf32>
    %826 = arith.addf %801, %825 : vector<1x256xf32>
    %c77 = arith.constant 77 : index
    %827 = memref.load %arg1[%c77] : memref<162xf32, #tpu.memory_space<smem>>
    %828 = vector.broadcast %827 : f32 to vector<1x256xf32>
    %829 = arith.mulf %828, %818 : vector<1x256xf32>
    %830 = arith.addf %805, %829 : vector<1x256xf32>
    %c104 = arith.constant 104 : index
    %831 = memref.load %arg1[%c104] : memref<162xf32, #tpu.memory_space<smem>>
    %832 = vector.broadcast %831 : f32 to vector<1x256xf32>
    %833 = arith.mulf %832, %818 : vector<1x256xf32>
    %834 = arith.addf %809, %833 : vector<1x256xf32>
    %c131 = arith.constant 131 : index
    %835 = memref.load %arg1[%c131] : memref<162xf32, #tpu.memory_space<smem>>
    %836 = vector.broadcast %835 : f32 to vector<1x256xf32>
    %837 = arith.mulf %836, %818 : vector<1x256xf32>
    %838 = arith.addf %813, %837 : vector<1x256xf32>
    %c158 = arith.constant 158 : index
    %839 = memref.load %arg1[%c158] : memref<162xf32, #tpu.memory_space<smem>>
    %840 = vector.broadcast %839 : f32 to vector<1x256xf32>
    %841 = arith.mulf %840, %818 : vector<1x256xf32>
    %842 = arith.addf %817, %841 : vector<1x256xf32>
    %843 = vector.extract_strided_slice %767 {offsets = [3, 0], sizes = [1, 256], strides = [1, 1]} : vector<6x256xf32> to vector<1x256xf32>
    %c5_98 = arith.constant 5 : index
    %844 = memref.load %arg1[%c5_98] : memref<162xf32, #tpu.memory_space<smem>>
    %845 = vector.broadcast %844 : f32 to vector<1x256xf32>
    %846 = arith.mulf %845, %843 : vector<1x256xf32>
    %847 = arith.addf %746, %846 : vector<1x256xf32>
    %c32_99 = arith.constant 32 : index
    %848 = memref.load %arg1[%c32_99] : memref<162xf32, #tpu.memory_space<smem>>
    %849 = vector.broadcast %848 : f32 to vector<1x256xf32>
    %850 = arith.mulf %849, %843 : vector<1x256xf32>
    %851 = arith.addf %750, %850 : vector<1x256xf32>
    %c59_100 = arith.constant 59 : index
    %852 = memref.load %arg1[%c59_100] : memref<162xf32, #tpu.memory_space<smem>>
    %853 = vector.broadcast %852 : f32 to vector<1x256xf32>
    %854 = arith.mulf %853, %843 : vector<1x256xf32>
    %855 = arith.addf %754, %854 : vector<1x256xf32>
    %c86_101 = arith.constant 86 : index
    %856 = memref.load %arg1[%c86_101] : memref<162xf32, #tpu.memory_space<smem>>
    %857 = vector.broadcast %856 : f32 to vector<1x256xf32>
    %858 = arith.mulf %857, %843 : vector<1x256xf32>
    %859 = arith.addf %758, %858 : vector<1x256xf32>
    %c113_102 = arith.constant 113 : index
    %860 = memref.load %arg1[%c113_102] : memref<162xf32, #tpu.memory_space<smem>>
    %861 = vector.broadcast %860 : f32 to vector<1x256xf32>
    %862 = arith.mulf %861, %843 : vector<1x256xf32>
    %863 = arith.addf %762, %862 : vector<1x256xf32>
    %c140_103 = arith.constant 140 : index
    %864 = memref.load %arg1[%c140_103] : memref<162xf32, #tpu.memory_space<smem>>
    %865 = vector.broadcast %864 : f32 to vector<1x256xf32>
    %866 = arith.mulf %865, %843 : vector<1x256xf32>
    %867 = arith.addf %766, %866 : vector<1x256xf32>
    %868 = vector.extract_strided_slice %767 {offsets = [4, 0], sizes = [1, 256], strides = [1, 1]} : vector<6x256xf32> to vector<1x256xf32>
    %c14_104 = arith.constant 14 : index
    %869 = memref.load %arg1[%c14_104] : memref<162xf32, #tpu.memory_space<smem>>
    %870 = vector.broadcast %869 : f32 to vector<1x256xf32>
    %871 = arith.mulf %870, %868 : vector<1x256xf32>
    %872 = arith.addf %847, %871 : vector<1x256xf32>
    %c41_105 = arith.constant 41 : index
    %873 = memref.load %arg1[%c41_105] : memref<162xf32, #tpu.memory_space<smem>>
    %874 = vector.broadcast %873 : f32 to vector<1x256xf32>
    %875 = arith.mulf %874, %868 : vector<1x256xf32>
    %876 = arith.addf %851, %875 : vector<1x256xf32>
    %c68_106 = arith.constant 68 : index
    %877 = memref.load %arg1[%c68_106] : memref<162xf32, #tpu.memory_space<smem>>
    %878 = vector.broadcast %877 : f32 to vector<1x256xf32>
    %879 = arith.mulf %878, %868 : vector<1x256xf32>
    %880 = arith.addf %855, %879 : vector<1x256xf32>
    %c95_107 = arith.constant 95 : index
    %881 = memref.load %arg1[%c95_107] : memref<162xf32, #tpu.memory_space<smem>>
    %882 = vector.broadcast %881 : f32 to vector<1x256xf32>
    %883 = arith.mulf %882, %868 : vector<1x256xf32>
    %884 = arith.addf %859, %883 : vector<1x256xf32>
    %c122_108 = arith.constant 122 : index
    %885 = memref.load %arg1[%c122_108] : memref<162xf32, #tpu.memory_space<smem>>
    %886 = vector.broadcast %885 : f32 to vector<1x256xf32>
    %887 = arith.mulf %886, %868 : vector<1x256xf32>
    %888 = arith.addf %863, %887 : vector<1x256xf32>
    %c149_109 = arith.constant 149 : index
    %889 = memref.load %arg1[%c149_109] : memref<162xf32, #tpu.memory_space<smem>>
    %890 = vector.broadcast %889 : f32 to vector<1x256xf32>
    %891 = arith.mulf %890, %868 : vector<1x256xf32>
    %892 = arith.addf %867, %891 : vector<1x256xf32>
    %893 = vector.extract_strided_slice %767 {offsets = [5, 0], sizes = [1, 256], strides = [1, 1]} : vector<6x256xf32> to vector<1x256xf32>
    %c23_110 = arith.constant 23 : index
    %894 = memref.load %arg1[%c23_110] : memref<162xf32, #tpu.memory_space<smem>>
    %895 = vector.broadcast %894 : f32 to vector<1x256xf32>
    %896 = arith.mulf %895, %893 : vector<1x256xf32>
    %897 = arith.addf %872, %896 : vector<1x256xf32>
    %c50_111 = arith.constant 50 : index
    %898 = memref.load %arg1[%c50_111] : memref<162xf32, #tpu.memory_space<smem>>
    %899 = vector.broadcast %898 : f32 to vector<1x256xf32>
    %900 = arith.mulf %899, %893 : vector<1x256xf32>
    %901 = arith.addf %876, %900 : vector<1x256xf32>
    %c77_112 = arith.constant 77 : index
    %902 = memref.load %arg1[%c77_112] : memref<162xf32, #tpu.memory_space<smem>>
    %903 = vector.broadcast %902 : f32 to vector<1x256xf32>
    %904 = arith.mulf %903, %893 : vector<1x256xf32>
    %905 = arith.addf %880, %904 : vector<1x256xf32>
    %c104_113 = arith.constant 104 : index
    %906 = memref.load %arg1[%c104_113] : memref<162xf32, #tpu.memory_space<smem>>
    %907 = vector.broadcast %906 : f32 to vector<1x256xf32>
    %908 = arith.mulf %907, %893 : vector<1x256xf32>
    %909 = arith.addf %884, %908 : vector<1x256xf32>
    %c131_114 = arith.constant 131 : index
    %910 = memref.load %arg1[%c131_114] : memref<162xf32, #tpu.memory_space<smem>>
    %911 = vector.broadcast %910 : f32 to vector<1x256xf32>
    %912 = arith.mulf %911, %893 : vector<1x256xf32>
    %913 = arith.addf %888, %912 : vector<1x256xf32>
    %c158_115 = arith.constant 158 : index
    %914 = memref.load %arg1[%c158_115] : memref<162xf32, #tpu.memory_space<smem>>
    %915 = vector.broadcast %914 : f32 to vector<1x256xf32>
    %916 = arith.mulf %915, %893 : vector<1x256xf32>
    %917 = arith.addf %892, %916 : vector<1x256xf32>
    %c224_i32 = arith.constant 224 : i32
    %918 = tpu.dynamic_rotate %0 by %c224_i32 dim 1 : vector<6x256xf32>, i32 -> vector<6x256xf32>
    %919 = vector.extract_strided_slice %918 {offsets = [0, 0], sizes = [1, 256], strides = [1, 1]} : vector<6x256xf32> to vector<1x256xf32>
    %c6 = arith.constant 6 : index
    %920 = memref.load %arg1[%c6] : memref<162xf32, #tpu.memory_space<smem>>
    %921 = vector.broadcast %920 : f32 to vector<1x256xf32>
    %922 = arith.mulf %921, %919 : vector<1x256xf32>
    %923 = arith.addf %822, %922 : vector<1x256xf32>
    %c33 = arith.constant 33 : index
    %924 = memref.load %arg1[%c33] : memref<162xf32, #tpu.memory_space<smem>>
    %925 = vector.broadcast %924 : f32 to vector<1x256xf32>
    %926 = arith.mulf %925, %919 : vector<1x256xf32>
    %927 = arith.addf %826, %926 : vector<1x256xf32>
    %c60 = arith.constant 60 : index
    %928 = memref.load %arg1[%c60] : memref<162xf32, #tpu.memory_space<smem>>
    %929 = vector.broadcast %928 : f32 to vector<1x256xf32>
    %930 = arith.mulf %929, %919 : vector<1x256xf32>
    %931 = arith.addf %830, %930 : vector<1x256xf32>
    %c87 = arith.constant 87 : index
    %932 = memref.load %arg1[%c87] : memref<162xf32, #tpu.memory_space<smem>>
    %933 = vector.broadcast %932 : f32 to vector<1x256xf32>
    %934 = arith.mulf %933, %919 : vector<1x256xf32>
    %935 = arith.addf %834, %934 : vector<1x256xf32>
    %c114 = arith.constant 114 : index
    %936 = memref.load %arg1[%c114] : memref<162xf32, #tpu.memory_space<smem>>
    %937 = vector.broadcast %936 : f32 to vector<1x256xf32>
    %938 = arith.mulf %937, %919 : vector<1x256xf32>
    %939 = arith.addf %838, %938 : vector<1x256xf32>
    %c141 = arith.constant 141 : index
    %940 = memref.load %arg1[%c141] : memref<162xf32, #tpu.memory_space<smem>>
    %941 = vector.broadcast %940 : f32 to vector<1x256xf32>
    %942 = arith.mulf %941, %919 : vector<1x256xf32>
    %943 = arith.addf %842, %942 : vector<1x256xf32>
    %944 = vector.extract_strided_slice %918 {offsets = [1, 0], sizes = [1, 256], strides = [1, 1]} : vector<6x256xf32> to vector<1x256xf32>
    %c15 = arith.constant 15 : index
    %945 = memref.load %arg1[%c15] : memref<162xf32, #tpu.memory_space<smem>>
    %946 = vector.broadcast %945 : f32 to vector<1x256xf32>
    %947 = arith.mulf %946, %944 : vector<1x256xf32>
    %948 = arith.addf %923, %947 : vector<1x256xf32>
    %c42 = arith.constant 42 : index
    %949 = memref.load %arg1[%c42] : memref<162xf32, #tpu.memory_space<smem>>
    %950 = vector.broadcast %949 : f32 to vector<1x256xf32>
    %951 = arith.mulf %950, %944 : vector<1x256xf32>
    %952 = arith.addf %927, %951 : vector<1x256xf32>
    %c69 = arith.constant 69 : index
    %953 = memref.load %arg1[%c69] : memref<162xf32, #tpu.memory_space<smem>>
    %954 = vector.broadcast %953 : f32 to vector<1x256xf32>
    %955 = arith.mulf %954, %944 : vector<1x256xf32>
    %956 = arith.addf %931, %955 : vector<1x256xf32>
    %c96 = arith.constant 96 : index
    %957 = memref.load %arg1[%c96] : memref<162xf32, #tpu.memory_space<smem>>
    %958 = vector.broadcast %957 : f32 to vector<1x256xf32>
    %959 = arith.mulf %958, %944 : vector<1x256xf32>
    %960 = arith.addf %935, %959 : vector<1x256xf32>
    %c123 = arith.constant 123 : index
    %961 = memref.load %arg1[%c123] : memref<162xf32, #tpu.memory_space<smem>>
    %962 = vector.broadcast %961 : f32 to vector<1x256xf32>
    %963 = arith.mulf %962, %944 : vector<1x256xf32>
    %964 = arith.addf %939, %963 : vector<1x256xf32>
    %c150 = arith.constant 150 : index
    %965 = memref.load %arg1[%c150] : memref<162xf32, #tpu.memory_space<smem>>
    %966 = vector.broadcast %965 : f32 to vector<1x256xf32>
    %967 = arith.mulf %966, %944 : vector<1x256xf32>
    %968 = arith.addf %943, %967 : vector<1x256xf32>
    %969 = vector.extract_strided_slice %918 {offsets = [2, 0], sizes = [1, 256], strides = [1, 1]} : vector<6x256xf32> to vector<1x256xf32>
    %c24 = arith.constant 24 : index
    %970 = memref.load %arg1[%c24] : memref<162xf32, #tpu.memory_space<smem>>
    %971 = vector.broadcast %970 : f32 to vector<1x256xf32>
    %972 = arith.mulf %971, %969 : vector<1x256xf32>
    %973 = arith.addf %948, %972 : vector<1x256xf32>
    %c51 = arith.constant 51 : index
    %974 = memref.load %arg1[%c51] : memref<162xf32, #tpu.memory_space<smem>>
    %975 = vector.broadcast %974 : f32 to vector<1x256xf32>
    %976 = arith.mulf %975, %969 : vector<1x256xf32>
    %977 = arith.addf %952, %976 : vector<1x256xf32>
    %c78 = arith.constant 78 : index
    %978 = memref.load %arg1[%c78] : memref<162xf32, #tpu.memory_space<smem>>
    %979 = vector.broadcast %978 : f32 to vector<1x256xf32>
    %980 = arith.mulf %979, %969 : vector<1x256xf32>
    %981 = arith.addf %956, %980 : vector<1x256xf32>
    %c105 = arith.constant 105 : index
    %982 = memref.load %arg1[%c105] : memref<162xf32, #tpu.memory_space<smem>>
    %983 = vector.broadcast %982 : f32 to vector<1x256xf32>
    %984 = arith.mulf %983, %969 : vector<1x256xf32>
    %985 = arith.addf %960, %984 : vector<1x256xf32>
    %c132 = arith.constant 132 : index
    %986 = memref.load %arg1[%c132] : memref<162xf32, #tpu.memory_space<smem>>
    %987 = vector.broadcast %986 : f32 to vector<1x256xf32>
    %988 = arith.mulf %987, %969 : vector<1x256xf32>
    %989 = arith.addf %964, %988 : vector<1x256xf32>
    %c159 = arith.constant 159 : index
    %990 = memref.load %arg1[%c159] : memref<162xf32, #tpu.memory_space<smem>>
    %991 = vector.broadcast %990 : f32 to vector<1x256xf32>
    %992 = arith.mulf %991, %969 : vector<1x256xf32>
    %993 = arith.addf %968, %992 : vector<1x256xf32>
    %994 = vector.extract_strided_slice %918 {offsets = [3, 0], sizes = [1, 256], strides = [1, 1]} : vector<6x256xf32> to vector<1x256xf32>
    %c6_116 = arith.constant 6 : index
    %995 = memref.load %arg1[%c6_116] : memref<162xf32, #tpu.memory_space<smem>>
    %996 = vector.broadcast %995 : f32 to vector<1x256xf32>
    %997 = arith.mulf %996, %994 : vector<1x256xf32>
    %998 = arith.addf %897, %997 : vector<1x256xf32>
    %c33_117 = arith.constant 33 : index
    %999 = memref.load %arg1[%c33_117] : memref<162xf32, #tpu.memory_space<smem>>
    %1000 = vector.broadcast %999 : f32 to vector<1x256xf32>
    %1001 = arith.mulf %1000, %994 : vector<1x256xf32>
    %1002 = arith.addf %901, %1001 : vector<1x256xf32>
    %c60_118 = arith.constant 60 : index
    %1003 = memref.load %arg1[%c60_118] : memref<162xf32, #tpu.memory_space<smem>>
    %1004 = vector.broadcast %1003 : f32 to vector<1x256xf32>
    %1005 = arith.mulf %1004, %994 : vector<1x256xf32>
    %1006 = arith.addf %905, %1005 : vector<1x256xf32>
    %c87_119 = arith.constant 87 : index
    %1007 = memref.load %arg1[%c87_119] : memref<162xf32, #tpu.memory_space<smem>>
    %1008 = vector.broadcast %1007 : f32 to vector<1x256xf32>
    %1009 = arith.mulf %1008, %994 : vector<1x256xf32>
    %1010 = arith.addf %909, %1009 : vector<1x256xf32>
    %c114_120 = arith.constant 114 : index
    %1011 = memref.load %arg1[%c114_120] : memref<162xf32, #tpu.memory_space<smem>>
    %1012 = vector.broadcast %1011 : f32 to vector<1x256xf32>
    %1013 = arith.mulf %1012, %994 : vector<1x256xf32>
    %1014 = arith.addf %913, %1013 : vector<1x256xf32>
    %c141_121 = arith.constant 141 : index
    %1015 = memref.load %arg1[%c141_121] : memref<162xf32, #tpu.memory_space<smem>>
    %1016 = vector.broadcast %1015 : f32 to vector<1x256xf32>
    %1017 = arith.mulf %1016, %994 : vector<1x256xf32>
    %1018 = arith.addf %917, %1017 : vector<1x256xf32>
    %1019 = vector.extract_strided_slice %918 {offsets = [4, 0], sizes = [1, 256], strides = [1, 1]} : vector<6x256xf32> to vector<1x256xf32>
    %c15_122 = arith.constant 15 : index
    %1020 = memref.load %arg1[%c15_122] : memref<162xf32, #tpu.memory_space<smem>>
    %1021 = vector.broadcast %1020 : f32 to vector<1x256xf32>
    %1022 = arith.mulf %1021, %1019 : vector<1x256xf32>
    %1023 = arith.addf %998, %1022 : vector<1x256xf32>
    %c42_123 = arith.constant 42 : index
    %1024 = memref.load %arg1[%c42_123] : memref<162xf32, #tpu.memory_space<smem>>
    %1025 = vector.broadcast %1024 : f32 to vector<1x256xf32>
    %1026 = arith.mulf %1025, %1019 : vector<1x256xf32>
    %1027 = arith.addf %1002, %1026 : vector<1x256xf32>
    %c69_124 = arith.constant 69 : index
    %1028 = memref.load %arg1[%c69_124] : memref<162xf32, #tpu.memory_space<smem>>
    %1029 = vector.broadcast %1028 : f32 to vector<1x256xf32>
    %1030 = arith.mulf %1029, %1019 : vector<1x256xf32>
    %1031 = arith.addf %1006, %1030 : vector<1x256xf32>
    %c96_125 = arith.constant 96 : index
    %1032 = memref.load %arg1[%c96_125] : memref<162xf32, #tpu.memory_space<smem>>
    %1033 = vector.broadcast %1032 : f32 to vector<1x256xf32>
    %1034 = arith.mulf %1033, %1019 : vector<1x256xf32>
    %1035 = arith.addf %1010, %1034 : vector<1x256xf32>
    %c123_126 = arith.constant 123 : index
    %1036 = memref.load %arg1[%c123_126] : memref<162xf32, #tpu.memory_space<smem>>
    %1037 = vector.broadcast %1036 : f32 to vector<1x256xf32>
    %1038 = arith.mulf %1037, %1019 : vector<1x256xf32>
    %1039 = arith.addf %1014, %1038 : vector<1x256xf32>
    %c150_127 = arith.constant 150 : index
    %1040 = memref.load %arg1[%c150_127] : memref<162xf32, #tpu.memory_space<smem>>
    %1041 = vector.broadcast %1040 : f32 to vector<1x256xf32>
    %1042 = arith.mulf %1041, %1019 : vector<1x256xf32>
    %1043 = arith.addf %1018, %1042 : vector<1x256xf32>
    %1044 = vector.extract_strided_slice %918 {offsets = [5, 0], sizes = [1, 256], strides = [1, 1]} : vector<6x256xf32> to vector<1x256xf32>
    %c24_128 = arith.constant 24 : index
    %1045 = memref.load %arg1[%c24_128] : memref<162xf32, #tpu.memory_space<smem>>
    %1046 = vector.broadcast %1045 : f32 to vector<1x256xf32>
    %1047 = arith.mulf %1046, %1044 : vector<1x256xf32>
    %1048 = arith.addf %1023, %1047 : vector<1x256xf32>
    %c51_129 = arith.constant 51 : index
    %1049 = memref.load %arg1[%c51_129] : memref<162xf32, #tpu.memory_space<smem>>
    %1050 = vector.broadcast %1049 : f32 to vector<1x256xf32>
    %1051 = arith.mulf %1050, %1044 : vector<1x256xf32>
    %1052 = arith.addf %1027, %1051 : vector<1x256xf32>
    %c78_130 = arith.constant 78 : index
    %1053 = memref.load %arg1[%c78_130] : memref<162xf32, #tpu.memory_space<smem>>
    %1054 = vector.broadcast %1053 : f32 to vector<1x256xf32>
    %1055 = arith.mulf %1054, %1044 : vector<1x256xf32>
    %1056 = arith.addf %1031, %1055 : vector<1x256xf32>
    %c105_131 = arith.constant 105 : index
    %1057 = memref.load %arg1[%c105_131] : memref<162xf32, #tpu.memory_space<smem>>
    %1058 = vector.broadcast %1057 : f32 to vector<1x256xf32>
    %1059 = arith.mulf %1058, %1044 : vector<1x256xf32>
    %1060 = arith.addf %1035, %1059 : vector<1x256xf32>
    %c132_132 = arith.constant 132 : index
    %1061 = memref.load %arg1[%c132_132] : memref<162xf32, #tpu.memory_space<smem>>
    %1062 = vector.broadcast %1061 : f32 to vector<1x256xf32>
    %1063 = arith.mulf %1062, %1044 : vector<1x256xf32>
    %1064 = arith.addf %1039, %1063 : vector<1x256xf32>
    %c159_133 = arith.constant 159 : index
    %1065 = memref.load %arg1[%c159_133] : memref<162xf32, #tpu.memory_space<smem>>
    %1066 = vector.broadcast %1065 : f32 to vector<1x256xf32>
    %1067 = arith.mulf %1066, %1044 : vector<1x256xf32>
    %1068 = arith.addf %1043, %1067 : vector<1x256xf32>
    %c223_i32 = arith.constant 223 : i32
    %1069 = tpu.dynamic_rotate %0 by %c223_i32 dim 1 : vector<6x256xf32>, i32 -> vector<6x256xf32>
    %1070 = vector.extract_strided_slice %1069 {offsets = [0, 0], sizes = [1, 256], strides = [1, 1]} : vector<6x256xf32> to vector<1x256xf32>
    %c7 = arith.constant 7 : index
    %1071 = memref.load %arg1[%c7] : memref<162xf32, #tpu.memory_space<smem>>
    %1072 = vector.broadcast %1071 : f32 to vector<1x256xf32>
    %1073 = arith.mulf %1072, %1070 : vector<1x256xf32>
    %1074 = arith.addf %973, %1073 : vector<1x256xf32>
    %c34 = arith.constant 34 : index
    %1075 = memref.load %arg1[%c34] : memref<162xf32, #tpu.memory_space<smem>>
    %1076 = vector.broadcast %1075 : f32 to vector<1x256xf32>
    %1077 = arith.mulf %1076, %1070 : vector<1x256xf32>
    %1078 = arith.addf %977, %1077 : vector<1x256xf32>
    %c61 = arith.constant 61 : index
    %1079 = memref.load %arg1[%c61] : memref<162xf32, #tpu.memory_space<smem>>
    %1080 = vector.broadcast %1079 : f32 to vector<1x256xf32>
    %1081 = arith.mulf %1080, %1070 : vector<1x256xf32>
    %1082 = arith.addf %981, %1081 : vector<1x256xf32>
    %c88 = arith.constant 88 : index
    %1083 = memref.load %arg1[%c88] : memref<162xf32, #tpu.memory_space<smem>>
    %1084 = vector.broadcast %1083 : f32 to vector<1x256xf32>
    %1085 = arith.mulf %1084, %1070 : vector<1x256xf32>
    %1086 = arith.addf %985, %1085 : vector<1x256xf32>
    %c115 = arith.constant 115 : index
    %1087 = memref.load %arg1[%c115] : memref<162xf32, #tpu.memory_space<smem>>
    %1088 = vector.broadcast %1087 : f32 to vector<1x256xf32>
    %1089 = arith.mulf %1088, %1070 : vector<1x256xf32>
    %1090 = arith.addf %989, %1089 : vector<1x256xf32>
    %c142 = arith.constant 142 : index
    %1091 = memref.load %arg1[%c142] : memref<162xf32, #tpu.memory_space<smem>>
    %1092 = vector.broadcast %1091 : f32 to vector<1x256xf32>
    %1093 = arith.mulf %1092, %1070 : vector<1x256xf32>
    %1094 = arith.addf %993, %1093 : vector<1x256xf32>
    %1095 = vector.extract_strided_slice %1069 {offsets = [1, 0], sizes = [1, 256], strides = [1, 1]} : vector<6x256xf32> to vector<1x256xf32>
    %c16 = arith.constant 16 : index
    %1096 = memref.load %arg1[%c16] : memref<162xf32, #tpu.memory_space<smem>>
    %1097 = vector.broadcast %1096 : f32 to vector<1x256xf32>
    %1098 = arith.mulf %1097, %1095 : vector<1x256xf32>
    %1099 = arith.addf %1074, %1098 : vector<1x256xf32>
    %c43 = arith.constant 43 : index
    %1100 = memref.load %arg1[%c43] : memref<162xf32, #tpu.memory_space<smem>>
    %1101 = vector.broadcast %1100 : f32 to vector<1x256xf32>
    %1102 = arith.mulf %1101, %1095 : vector<1x256xf32>
    %1103 = arith.addf %1078, %1102 : vector<1x256xf32>
    %c70 = arith.constant 70 : index
    %1104 = memref.load %arg1[%c70] : memref<162xf32, #tpu.memory_space<smem>>
    %1105 = vector.broadcast %1104 : f32 to vector<1x256xf32>
    %1106 = arith.mulf %1105, %1095 : vector<1x256xf32>
    %1107 = arith.addf %1082, %1106 : vector<1x256xf32>
    %c97 = arith.constant 97 : index
    %1108 = memref.load %arg1[%c97] : memref<162xf32, #tpu.memory_space<smem>>
    %1109 = vector.broadcast %1108 : f32 to vector<1x256xf32>
    %1110 = arith.mulf %1109, %1095 : vector<1x256xf32>
    %1111 = arith.addf %1086, %1110 : vector<1x256xf32>
    %c124 = arith.constant 124 : index
    %1112 = memref.load %arg1[%c124] : memref<162xf32, #tpu.memory_space<smem>>
    %1113 = vector.broadcast %1112 : f32 to vector<1x256xf32>
    %1114 = arith.mulf %1113, %1095 : vector<1x256xf32>
    %1115 = arith.addf %1090, %1114 : vector<1x256xf32>
    %c151 = arith.constant 151 : index
    %1116 = memref.load %arg1[%c151] : memref<162xf32, #tpu.memory_space<smem>>
    %1117 = vector.broadcast %1116 : f32 to vector<1x256xf32>
    %1118 = arith.mulf %1117, %1095 : vector<1x256xf32>
    %1119 = arith.addf %1094, %1118 : vector<1x256xf32>
    %1120 = vector.extract_strided_slice %1069 {offsets = [2, 0], sizes = [1, 256], strides = [1, 1]} : vector<6x256xf32> to vector<1x256xf32>
    %c25 = arith.constant 25 : index
    %1121 = memref.load %arg1[%c25] : memref<162xf32, #tpu.memory_space<smem>>
    %1122 = vector.broadcast %1121 : f32 to vector<1x256xf32>
    %1123 = arith.mulf %1122, %1120 : vector<1x256xf32>
    %1124 = arith.addf %1099, %1123 : vector<1x256xf32>
    %c52 = arith.constant 52 : index
    %1125 = memref.load %arg1[%c52] : memref<162xf32, #tpu.memory_space<smem>>
    %1126 = vector.broadcast %1125 : f32 to vector<1x256xf32>
    %1127 = arith.mulf %1126, %1120 : vector<1x256xf32>
    %1128 = arith.addf %1103, %1127 : vector<1x256xf32>
    %c79 = arith.constant 79 : index
    %1129 = memref.load %arg1[%c79] : memref<162xf32, #tpu.memory_space<smem>>
    %1130 = vector.broadcast %1129 : f32 to vector<1x256xf32>
    %1131 = arith.mulf %1130, %1120 : vector<1x256xf32>
    %1132 = arith.addf %1107, %1131 : vector<1x256xf32>
    %c106 = arith.constant 106 : index
    %1133 = memref.load %arg1[%c106] : memref<162xf32, #tpu.memory_space<smem>>
    %1134 = vector.broadcast %1133 : f32 to vector<1x256xf32>
    %1135 = arith.mulf %1134, %1120 : vector<1x256xf32>
    %1136 = arith.addf %1111, %1135 : vector<1x256xf32>
    %c133 = arith.constant 133 : index
    %1137 = memref.load %arg1[%c133] : memref<162xf32, #tpu.memory_space<smem>>
    %1138 = vector.broadcast %1137 : f32 to vector<1x256xf32>
    %1139 = arith.mulf %1138, %1120 : vector<1x256xf32>
    %1140 = arith.addf %1115, %1139 : vector<1x256xf32>
    %c160 = arith.constant 160 : index
    %1141 = memref.load %arg1[%c160] : memref<162xf32, #tpu.memory_space<smem>>
    %1142 = vector.broadcast %1141 : f32 to vector<1x256xf32>
    %1143 = arith.mulf %1142, %1120 : vector<1x256xf32>
    %1144 = arith.addf %1119, %1143 : vector<1x256xf32>
    %1145 = vector.extract_strided_slice %1069 {offsets = [3, 0], sizes = [1, 256], strides = [1, 1]} : vector<6x256xf32> to vector<1x256xf32>
    %c7_134 = arith.constant 7 : index
    %1146 = memref.load %arg1[%c7_134] : memref<162xf32, #tpu.memory_space<smem>>
    %1147 = vector.broadcast %1146 : f32 to vector<1x256xf32>
    %1148 = arith.mulf %1147, %1145 : vector<1x256xf32>
    %1149 = arith.addf %1048, %1148 : vector<1x256xf32>
    %c34_135 = arith.constant 34 : index
    %1150 = memref.load %arg1[%c34_135] : memref<162xf32, #tpu.memory_space<smem>>
    %1151 = vector.broadcast %1150 : f32 to vector<1x256xf32>
    %1152 = arith.mulf %1151, %1145 : vector<1x256xf32>
    %1153 = arith.addf %1052, %1152 : vector<1x256xf32>
    %c61_136 = arith.constant 61 : index
    %1154 = memref.load %arg1[%c61_136] : memref<162xf32, #tpu.memory_space<smem>>
    %1155 = vector.broadcast %1154 : f32 to vector<1x256xf32>
    %1156 = arith.mulf %1155, %1145 : vector<1x256xf32>
    %1157 = arith.addf %1056, %1156 : vector<1x256xf32>
    %c88_137 = arith.constant 88 : index
    %1158 = memref.load %arg1[%c88_137] : memref<162xf32, #tpu.memory_space<smem>>
    %1159 = vector.broadcast %1158 : f32 to vector<1x256xf32>
    %1160 = arith.mulf %1159, %1145 : vector<1x256xf32>
    %1161 = arith.addf %1060, %1160 : vector<1x256xf32>
    %c115_138 = arith.constant 115 : index
    %1162 = memref.load %arg1[%c115_138] : memref<162xf32, #tpu.memory_space<smem>>
    %1163 = vector.broadcast %1162 : f32 to vector<1x256xf32>
    %1164 = arith.mulf %1163, %1145 : vector<1x256xf32>
    %1165 = arith.addf %1064, %1164 : vector<1x256xf32>
    %c142_139 = arith.constant 142 : index
    %1166 = memref.load %arg1[%c142_139] : memref<162xf32, #tpu.memory_space<smem>>
    %1167 = vector.broadcast %1166 : f32 to vector<1x256xf32>
    %1168 = arith.mulf %1167, %1145 : vector<1x256xf32>
    %1169 = arith.addf %1068, %1168 : vector<1x256xf32>
    %1170 = vector.extract_strided_slice %1069 {offsets = [4, 0], sizes = [1, 256], strides = [1, 1]} : vector<6x256xf32> to vector<1x256xf32>
    %c16_140 = arith.constant 16 : index
    %1171 = memref.load %arg1[%c16_140] : memref<162xf32, #tpu.memory_space<smem>>
    %1172 = vector.broadcast %1171 : f32 to vector<1x256xf32>
    %1173 = arith.mulf %1172, %1170 : vector<1x256xf32>
    %1174 = arith.addf %1149, %1173 : vector<1x256xf32>
    %c43_141 = arith.constant 43 : index
    %1175 = memref.load %arg1[%c43_141] : memref<162xf32, #tpu.memory_space<smem>>
    %1176 = vector.broadcast %1175 : f32 to vector<1x256xf32>
    %1177 = arith.mulf %1176, %1170 : vector<1x256xf32>
    %1178 = arith.addf %1153, %1177 : vector<1x256xf32>
    %c70_142 = arith.constant 70 : index
    %1179 = memref.load %arg1[%c70_142] : memref<162xf32, #tpu.memory_space<smem>>
    %1180 = vector.broadcast %1179 : f32 to vector<1x256xf32>
    %1181 = arith.mulf %1180, %1170 : vector<1x256xf32>
    %1182 = arith.addf %1157, %1181 : vector<1x256xf32>
    %c97_143 = arith.constant 97 : index
    %1183 = memref.load %arg1[%c97_143] : memref<162xf32, #tpu.memory_space<smem>>
    %1184 = vector.broadcast %1183 : f32 to vector<1x256xf32>
    %1185 = arith.mulf %1184, %1170 : vector<1x256xf32>
    %1186 = arith.addf %1161, %1185 : vector<1x256xf32>
    %c124_144 = arith.constant 124 : index
    %1187 = memref.load %arg1[%c124_144] : memref<162xf32, #tpu.memory_space<smem>>
    %1188 = vector.broadcast %1187 : f32 to vector<1x256xf32>
    %1189 = arith.mulf %1188, %1170 : vector<1x256xf32>
    %1190 = arith.addf %1165, %1189 : vector<1x256xf32>
    %c151_145 = arith.constant 151 : index
    %1191 = memref.load %arg1[%c151_145] : memref<162xf32, #tpu.memory_space<smem>>
    %1192 = vector.broadcast %1191 : f32 to vector<1x256xf32>
    %1193 = arith.mulf %1192, %1170 : vector<1x256xf32>
    %1194 = arith.addf %1169, %1193 : vector<1x256xf32>
    %1195 = vector.extract_strided_slice %1069 {offsets = [5, 0], sizes = [1, 256], strides = [1, 1]} : vector<6x256xf32> to vector<1x256xf32>
    %c25_146 = arith.constant 25 : index
    %1196 = memref.load %arg1[%c25_146] : memref<162xf32, #tpu.memory_space<smem>>
    %1197 = vector.broadcast %1196 : f32 to vector<1x256xf32>
    %1198 = arith.mulf %1197, %1195 : vector<1x256xf32>
    %1199 = arith.addf %1174, %1198 : vector<1x256xf32>
    %c52_147 = arith.constant 52 : index
    %1200 = memref.load %arg1[%c52_147] : memref<162xf32, #tpu.memory_space<smem>>
    %1201 = vector.broadcast %1200 : f32 to vector<1x256xf32>
    %1202 = arith.mulf %1201, %1195 : vector<1x256xf32>
    %1203 = arith.addf %1178, %1202 : vector<1x256xf32>
    %c79_148 = arith.constant 79 : index
    %1204 = memref.load %arg1[%c79_148] : memref<162xf32, #tpu.memory_space<smem>>
    %1205 = vector.broadcast %1204 : f32 to vector<1x256xf32>
    %1206 = arith.mulf %1205, %1195 : vector<1x256xf32>
    %1207 = arith.addf %1182, %1206 : vector<1x256xf32>
    %c106_149 = arith.constant 106 : index
    %1208 = memref.load %arg1[%c106_149] : memref<162xf32, #tpu.memory_space<smem>>
    %1209 = vector.broadcast %1208 : f32 to vector<1x256xf32>
    %1210 = arith.mulf %1209, %1195 : vector<1x256xf32>
    %1211 = arith.addf %1186, %1210 : vector<1x256xf32>
    %c133_150 = arith.constant 133 : index
    %1212 = memref.load %arg1[%c133_150] : memref<162xf32, #tpu.memory_space<smem>>
    %1213 = vector.broadcast %1212 : f32 to vector<1x256xf32>
    %1214 = arith.mulf %1213, %1195 : vector<1x256xf32>
    %1215 = arith.addf %1190, %1214 : vector<1x256xf32>
    %c160_151 = arith.constant 160 : index
    %1216 = memref.load %arg1[%c160_151] : memref<162xf32, #tpu.memory_space<smem>>
    %1217 = vector.broadcast %1216 : f32 to vector<1x256xf32>
    %1218 = arith.mulf %1217, %1195 : vector<1x256xf32>
    %1219 = arith.addf %1194, %1218 : vector<1x256xf32>
    %c222_i32 = arith.constant 222 : i32
    %1220 = tpu.dynamic_rotate %0 by %c222_i32 dim 1 : vector<6x256xf32>, i32 -> vector<6x256xf32>
    %1221 = vector.extract_strided_slice %1220 {offsets = [0, 0], sizes = [1, 256], strides = [1, 1]} : vector<6x256xf32> to vector<1x256xf32>
    %c8 = arith.constant 8 : index
    %1222 = memref.load %arg1[%c8] : memref<162xf32, #tpu.memory_space<smem>>
    %1223 = vector.broadcast %1222 : f32 to vector<1x256xf32>
    %1224 = arith.mulf %1223, %1221 : vector<1x256xf32>
    %1225 = arith.addf %1124, %1224 : vector<1x256xf32>
    %c35 = arith.constant 35 : index
    %1226 = memref.load %arg1[%c35] : memref<162xf32, #tpu.memory_space<smem>>
    %1227 = vector.broadcast %1226 : f32 to vector<1x256xf32>
    %1228 = arith.mulf %1227, %1221 : vector<1x256xf32>
    %1229 = arith.addf %1128, %1228 : vector<1x256xf32>
    %c62 = arith.constant 62 : index
    %1230 = memref.load %arg1[%c62] : memref<162xf32, #tpu.memory_space<smem>>
    %1231 = vector.broadcast %1230 : f32 to vector<1x256xf32>
    %1232 = arith.mulf %1231, %1221 : vector<1x256xf32>
    %1233 = arith.addf %1132, %1232 : vector<1x256xf32>
    %c89 = arith.constant 89 : index
    %1234 = memref.load %arg1[%c89] : memref<162xf32, #tpu.memory_space<smem>>
    %1235 = vector.broadcast %1234 : f32 to vector<1x256xf32>
    %1236 = arith.mulf %1235, %1221 : vector<1x256xf32>
    %1237 = arith.addf %1136, %1236 : vector<1x256xf32>
    %c116 = arith.constant 116 : index
    %1238 = memref.load %arg1[%c116] : memref<162xf32, #tpu.memory_space<smem>>
    %1239 = vector.broadcast %1238 : f32 to vector<1x256xf32>
    %1240 = arith.mulf %1239, %1221 : vector<1x256xf32>
    %1241 = arith.addf %1140, %1240 : vector<1x256xf32>
    %c143 = arith.constant 143 : index
    %1242 = memref.load %arg1[%c143] : memref<162xf32, #tpu.memory_space<smem>>
    %1243 = vector.broadcast %1242 : f32 to vector<1x256xf32>
    %1244 = arith.mulf %1243, %1221 : vector<1x256xf32>
    %1245 = arith.addf %1144, %1244 : vector<1x256xf32>
    %1246 = vector.extract_strided_slice %1220 {offsets = [1, 0], sizes = [1, 256], strides = [1, 1]} : vector<6x256xf32> to vector<1x256xf32>
    %c17 = arith.constant 17 : index
    %1247 = memref.load %arg1[%c17] : memref<162xf32, #tpu.memory_space<smem>>
    %1248 = vector.broadcast %1247 : f32 to vector<1x256xf32>
    %1249 = arith.mulf %1248, %1246 : vector<1x256xf32>
    %1250 = arith.addf %1225, %1249 : vector<1x256xf32>
    %c44 = arith.constant 44 : index
    %1251 = memref.load %arg1[%c44] : memref<162xf32, #tpu.memory_space<smem>>
    %1252 = vector.broadcast %1251 : f32 to vector<1x256xf32>
    %1253 = arith.mulf %1252, %1246 : vector<1x256xf32>
    %1254 = arith.addf %1229, %1253 : vector<1x256xf32>
    %c71 = arith.constant 71 : index
    %1255 = memref.load %arg1[%c71] : memref<162xf32, #tpu.memory_space<smem>>
    %1256 = vector.broadcast %1255 : f32 to vector<1x256xf32>
    %1257 = arith.mulf %1256, %1246 : vector<1x256xf32>
    %1258 = arith.addf %1233, %1257 : vector<1x256xf32>
    %c98 = arith.constant 98 : index
    %1259 = memref.load %arg1[%c98] : memref<162xf32, #tpu.memory_space<smem>>
    %1260 = vector.broadcast %1259 : f32 to vector<1x256xf32>
    %1261 = arith.mulf %1260, %1246 : vector<1x256xf32>
    %1262 = arith.addf %1237, %1261 : vector<1x256xf32>
    %c125 = arith.constant 125 : index
    %1263 = memref.load %arg1[%c125] : memref<162xf32, #tpu.memory_space<smem>>
    %1264 = vector.broadcast %1263 : f32 to vector<1x256xf32>
    %1265 = arith.mulf %1264, %1246 : vector<1x256xf32>
    %1266 = arith.addf %1241, %1265 : vector<1x256xf32>
    %c152 = arith.constant 152 : index
    %1267 = memref.load %arg1[%c152] : memref<162xf32, #tpu.memory_space<smem>>
    %1268 = vector.broadcast %1267 : f32 to vector<1x256xf32>
    %1269 = arith.mulf %1268, %1246 : vector<1x256xf32>
    %1270 = arith.addf %1245, %1269 : vector<1x256xf32>
    %1271 = vector.extract_strided_slice %1220 {offsets = [2, 0], sizes = [1, 256], strides = [1, 1]} : vector<6x256xf32> to vector<1x256xf32>
    %c26 = arith.constant 26 : index
    %1272 = memref.load %arg1[%c26] : memref<162xf32, #tpu.memory_space<smem>>
    %1273 = vector.broadcast %1272 : f32 to vector<1x256xf32>
    %1274 = arith.mulf %1273, %1271 : vector<1x256xf32>
    %1275 = arith.addf %1250, %1274 : vector<1x256xf32>
    %c53 = arith.constant 53 : index
    %1276 = memref.load %arg1[%c53] : memref<162xf32, #tpu.memory_space<smem>>
    %1277 = vector.broadcast %1276 : f32 to vector<1x256xf32>
    %1278 = arith.mulf %1277, %1271 : vector<1x256xf32>
    %1279 = arith.addf %1254, %1278 : vector<1x256xf32>
    %c80 = arith.constant 80 : index
    %1280 = memref.load %arg1[%c80] : memref<162xf32, #tpu.memory_space<smem>>
    %1281 = vector.broadcast %1280 : f32 to vector<1x256xf32>
    %1282 = arith.mulf %1281, %1271 : vector<1x256xf32>
    %1283 = arith.addf %1258, %1282 : vector<1x256xf32>
    %c107 = arith.constant 107 : index
    %1284 = memref.load %arg1[%c107] : memref<162xf32, #tpu.memory_space<smem>>
    %1285 = vector.broadcast %1284 : f32 to vector<1x256xf32>
    %1286 = arith.mulf %1285, %1271 : vector<1x256xf32>
    %1287 = arith.addf %1262, %1286 : vector<1x256xf32>
    %c134 = arith.constant 134 : index
    %1288 = memref.load %arg1[%c134] : memref<162xf32, #tpu.memory_space<smem>>
    %1289 = vector.broadcast %1288 : f32 to vector<1x256xf32>
    %1290 = arith.mulf %1289, %1271 : vector<1x256xf32>
    %1291 = arith.addf %1266, %1290 : vector<1x256xf32>
    %c161 = arith.constant 161 : index
    %1292 = memref.load %arg1[%c161] : memref<162xf32, #tpu.memory_space<smem>>
    %1293 = vector.broadcast %1292 : f32 to vector<1x256xf32>
    %1294 = arith.mulf %1293, %1271 : vector<1x256xf32>
    %1295 = arith.addf %1270, %1294 : vector<1x256xf32>
    %1296 = vector.extract_strided_slice %1220 {offsets = [3, 0], sizes = [1, 256], strides = [1, 1]} : vector<6x256xf32> to vector<1x256xf32>
    %c8_152 = arith.constant 8 : index
    %1297 = memref.load %arg1[%c8_152] : memref<162xf32, #tpu.memory_space<smem>>
    %1298 = vector.broadcast %1297 : f32 to vector<1x256xf32>
    %1299 = arith.mulf %1298, %1296 : vector<1x256xf32>
    %1300 = arith.addf %1199, %1299 : vector<1x256xf32>
    %c35_153 = arith.constant 35 : index
    %1301 = memref.load %arg1[%c35_153] : memref<162xf32, #tpu.memory_space<smem>>
    %1302 = vector.broadcast %1301 : f32 to vector<1x256xf32>
    %1303 = arith.mulf %1302, %1296 : vector<1x256xf32>
    %1304 = arith.addf %1203, %1303 : vector<1x256xf32>
    %c62_154 = arith.constant 62 : index
    %1305 = memref.load %arg1[%c62_154] : memref<162xf32, #tpu.memory_space<smem>>
    %1306 = vector.broadcast %1305 : f32 to vector<1x256xf32>
    %1307 = arith.mulf %1306, %1296 : vector<1x256xf32>
    %1308 = arith.addf %1207, %1307 : vector<1x256xf32>
    %c89_155 = arith.constant 89 : index
    %1309 = memref.load %arg1[%c89_155] : memref<162xf32, #tpu.memory_space<smem>>
    %1310 = vector.broadcast %1309 : f32 to vector<1x256xf32>
    %1311 = arith.mulf %1310, %1296 : vector<1x256xf32>
    %1312 = arith.addf %1211, %1311 : vector<1x256xf32>
    %c116_156 = arith.constant 116 : index
    %1313 = memref.load %arg1[%c116_156] : memref<162xf32, #tpu.memory_space<smem>>
    %1314 = vector.broadcast %1313 : f32 to vector<1x256xf32>
    %1315 = arith.mulf %1314, %1296 : vector<1x256xf32>
    %1316 = arith.addf %1215, %1315 : vector<1x256xf32>
    %c143_157 = arith.constant 143 : index
    %1317 = memref.load %arg1[%c143_157] : memref<162xf32, #tpu.memory_space<smem>>
    %1318 = vector.broadcast %1317 : f32 to vector<1x256xf32>
    %1319 = arith.mulf %1318, %1296 : vector<1x256xf32>
    %1320 = arith.addf %1219, %1319 : vector<1x256xf32>
    %1321 = vector.extract_strided_slice %1220 {offsets = [4, 0], sizes = [1, 256], strides = [1, 1]} : vector<6x256xf32> to vector<1x256xf32>
    %c17_158 = arith.constant 17 : index
    %1322 = memref.load %arg1[%c17_158] : memref<162xf32, #tpu.memory_space<smem>>
    %1323 = vector.broadcast %1322 : f32 to vector<1x256xf32>
    %1324 = arith.mulf %1323, %1321 : vector<1x256xf32>
    %1325 = arith.addf %1300, %1324 : vector<1x256xf32>
    %c44_159 = arith.constant 44 : index
    %1326 = memref.load %arg1[%c44_159] : memref<162xf32, #tpu.memory_space<smem>>
    %1327 = vector.broadcast %1326 : f32 to vector<1x256xf32>
    %1328 = arith.mulf %1327, %1321 : vector<1x256xf32>
    %1329 = arith.addf %1304, %1328 : vector<1x256xf32>
    %c71_160 = arith.constant 71 : index
    %1330 = memref.load %arg1[%c71_160] : memref<162xf32, #tpu.memory_space<smem>>
    %1331 = vector.broadcast %1330 : f32 to vector<1x256xf32>
    %1332 = arith.mulf %1331, %1321 : vector<1x256xf32>
    %1333 = arith.addf %1308, %1332 : vector<1x256xf32>
    %c98_161 = arith.constant 98 : index
    %1334 = memref.load %arg1[%c98_161] : memref<162xf32, #tpu.memory_space<smem>>
    %1335 = vector.broadcast %1334 : f32 to vector<1x256xf32>
    %1336 = arith.mulf %1335, %1321 : vector<1x256xf32>
    %1337 = arith.addf %1312, %1336 : vector<1x256xf32>
    %c125_162 = arith.constant 125 : index
    %1338 = memref.load %arg1[%c125_162] : memref<162xf32, #tpu.memory_space<smem>>
    %1339 = vector.broadcast %1338 : f32 to vector<1x256xf32>
    %1340 = arith.mulf %1339, %1321 : vector<1x256xf32>
    %1341 = arith.addf %1316, %1340 : vector<1x256xf32>
    %c152_163 = arith.constant 152 : index
    %1342 = memref.load %arg1[%c152_163] : memref<162xf32, #tpu.memory_space<smem>>
    %1343 = vector.broadcast %1342 : f32 to vector<1x256xf32>
    %1344 = arith.mulf %1343, %1321 : vector<1x256xf32>
    %1345 = arith.addf %1320, %1344 : vector<1x256xf32>
    %1346 = vector.extract_strided_slice %1220 {offsets = [5, 0], sizes = [1, 256], strides = [1, 1]} : vector<6x256xf32> to vector<1x256xf32>
    %c26_164 = arith.constant 26 : index
    %1347 = memref.load %arg1[%c26_164] : memref<162xf32, #tpu.memory_space<smem>>
    %1348 = vector.broadcast %1347 : f32 to vector<1x256xf32>
    %1349 = arith.mulf %1348, %1346 : vector<1x256xf32>
    %1350 = arith.addf %1325, %1349 : vector<1x256xf32>
    %c53_165 = arith.constant 53 : index
    %1351 = memref.load %arg1[%c53_165] : memref<162xf32, #tpu.memory_space<smem>>
    %1352 = vector.broadcast %1351 : f32 to vector<1x256xf32>
    %1353 = arith.mulf %1352, %1346 : vector<1x256xf32>
    %1354 = arith.addf %1329, %1353 : vector<1x256xf32>
    %c80_166 = arith.constant 80 : index
    %1355 = memref.load %arg1[%c80_166] : memref<162xf32, #tpu.memory_space<smem>>
    %1356 = vector.broadcast %1355 : f32 to vector<1x256xf32>
    %1357 = arith.mulf %1356, %1346 : vector<1x256xf32>
    %1358 = arith.addf %1333, %1357 : vector<1x256xf32>
    %c107_167 = arith.constant 107 : index
    %1359 = memref.load %arg1[%c107_167] : memref<162xf32, #tpu.memory_space<smem>>
    %1360 = vector.broadcast %1359 : f32 to vector<1x256xf32>
    %1361 = arith.mulf %1360, %1346 : vector<1x256xf32>
    %1362 = arith.addf %1337, %1361 : vector<1x256xf32>
    %c134_168 = arith.constant 134 : index
    %1363 = memref.load %arg1[%c134_168] : memref<162xf32, #tpu.memory_space<smem>>
    %1364 = vector.broadcast %1363 : f32 to vector<1x256xf32>
    %1365 = arith.mulf %1364, %1346 : vector<1x256xf32>
    %1366 = arith.addf %1341, %1365 : vector<1x256xf32>
    %c161_169 = arith.constant 161 : index
    %1367 = memref.load %arg1[%c161_169] : memref<162xf32, #tpu.memory_space<smem>>
    %1368 = vector.broadcast %1367 : f32 to vector<1x256xf32>
    %1369 = arith.mulf %1368, %1346 : vector<1x256xf32>
    %1370 = arith.addf %1345, %1369 : vector<1x256xf32>
    %1371 = tpu.concatenate %1275, %1279, %1283, %1287, %1291, %1295, %1350, %1354, %1358, %1362, %1366, %1370 in 0 : vector<1x256xf32>, vector<1x256xf32>, vector<1x256xf32>, vector<1x256xf32>, vector<1x256xf32>, vector<1x256xf32>, vector<1x256xf32>, vector<1x256xf32>, vector<1x256xf32>, vector<1x256xf32>, vector<1x256xf32>, vector<1x256xf32> -> vector<12x256xf32>
    %c0_170 = arith.constant 0 : index
    %c0_171 = arith.constant 0 : index
    %1372 = vector.load %arg3[%c0_170, %c0_171] : memref<12x256xf32, #tpu.memory_space<vmem>>, vector<12x256xf32>
    tpu.vector_store %arg3[%c0_170, %c0_171], %1371 {strides = array<i32>} : memref<12x256xf32, #tpu.memory_space<vmem>>, vector<12x256xf32>,
    return
  }
}

</mosaic_0001>

<bundles_post_ra>
// kernel: conv2d_pallas.1
= control target key start
LH: loop header
LB: loop body
LE: loop exit
PB: predicated region body
PF: predicated region fallthrough
CT: control target
= control target key end

     0   :  { %s3584_s0 = inlined_call_operand.vmem [shape: f32[6,256], index: 0, kind: input, shape index: {}]   ;;  %s3585_s1 = inlined_call_operand.vmem [shape: f32[162], index: 1, kind: input, shape index: {}]   ;;  %s3586_s2 = inlined_call_operand.vmem [shape: f32[6], index: 2, kind: input, shape index: {}]   ;;  %s3587_s3 = inlined_call_operand.vmem [shape: f32[12,256], index: 3, kind: output, shape index: {}]  }
   0x1   :  { %3687 = sst [smem:[#allocation81_spill]] %s3587_s3 }
   0x2   :  { %8 = vsyncpa [#allocation3], 0  ;;  %s18_s14 = sshll.u32 %s3585_s1, 4  ;;  %s19_s14 = int_to_ptr.vmem [resolvable:$true] %s18_s14 }
   0x3   :  { %9 = vsyncpa [#allocation5], 0  ;;  %s28_s17 = sshll.u32 %s3586_s2, 4  ;;  %s1996_s18 = scalar_lea.vmem %s19_s14, 32  ;;  %s29_s17 = int_to_ptr.vmem [resolvable:$true] %s28_s17 }
   0x4   :  { %p1997_p0 = scmp.ne.s32.totalorder %s19_s14, %s1996_s18  ;;  %p2001_p1 = scmp.lt.s32.totalorder %s19_s14, %s19_s14 }
   0x5   :  { %p2002_p2 = scmp.lt.s32.totalorder %s1996_s18, %s1996_s18 }
   0x7   :  { %p2003_p3 = por %p2002_p2, %p2001_p1 }
   0x9   :  { %p2004_p4 = pnand %p2003_p3, %p1997_p0 }
   0xb   :  { %2007 = shalt.err (!%p2004_p4)
}
   0xc   :  { %s2024_s19 = smov [#allocation2]   ;;  %s2008_s20 = scalar_lea.vmem %s29_s17, 16 }
   0xd   :  { %21 = dma.vmem_to_smem %s19_s14, 32, %s2024_s19, [#allocation3]  }
   0xe   :  { %p2009_p5 = scmp.ne.s32.totalorder %s29_s17, %s2008_s20  ;;  %p2013_p6 = scmp.lt.s32.totalorder %s29_s17, %s29_s17 }
   0xf   :  { %p2014_p7 = scmp.lt.s32.totalorder %s2008_s20, %s2008_s20 }
  0x11   :  { %p2015_p8 = por %p2014_p7, %p2013_p6 }
  0x13   :  { %p2016_p9 = pnand %p2015_p8, %p2009_p5 }
  0x15   :  { %2019 = shalt.err (!%p2016_p9)
}
  0x16   :  { %s2025_s1 = smov [#allocation4]  }
  0x17   :  { %31 = dma.vmem_to_smem %s29_s17, 16, %s2025_s1, [#allocation5]  }
  0x18   :  { %2020 = dma.done.wait [#allocation3], 32  }
  0x19   :  { %2021 = vsyncadd [#allocation3], 4294967264 }
  0x1a   :  { %2022 = dma.done.wait [#allocation5], 16  }
  0x1b   :  { %2023 = vsyncadd [#allocation5], 4294967280 }
  0x1c   :  { %38 = sfence }
  0x1d   :  { %v2063_v0 = vld [vmem:[%s3584_s0] sm:$0x3f]  ;;  %s2026_s22 = smov 127   ;;  %s2027_s23 = smov 126   ;;  %v2070_v1 = vld [vmem:[%s3584_s0 + $0x8] sm:$0x3f]  ;;  %v237_v2 = vlaneseq }
  0x1e   :  { %233 = vrot.lane.b32.xlu0 %v2063_v0, %s2026_s22  ;;  %422 = vrot.lane.b32.xlu1 %v2063_v0, %s2027_s23  ;;  %s2074_s26 = sld [smem:[#allocation4]]  ;;  %s2028_s27 = smov 112   ;;  %vm1783_vm8 = vcmask 1040384   ;;  %vm1786_vm9 = vcmask 1041408   ;;  %vm1789_vm10 = vcmask 1042432   ;;  %vm1792_vm11 = vcmask 1043456  }
  0x1f   :  { %s2078_s28 = sld [smem:[#allocation4 + $0x1]]  ;;  %s2029_s0 = smov 111   ;;  %v2220_v9 = vand.u32 127, %v237_v2  ;;  %vm1795_vm12 = vcmask 1044480   ;;  %vm1798_vm13 = vcmask 1045504   ;;  %vm1801_vm14 = vcmask 1046528  }
  0x20   :  { %s2080_s29 = sld [smem:[#allocation4 + $0x2]]  ;;  %s2030_s9 = smov 110  }
  0x21   :  { %s2082_s30 = sld [smem:[#allocation4 + $0x3]]  ;;  %s2031_s14 = smov 96   ;;  %vm239_vm0 = vcmp.lt.s32.totalorder %v2220_v9, 127  ;;  %vm426_vm1 = vcmp.lt.s32.totalorder %v2220_v9, 126  ;;  %vm613_vm2 = vcmp.lt.s32.totalorder %v2220_v9, 112  ;;  %vm800_vm3 = vcmp.lt.s32.totalorder %v2220_v9, 111 }
  0x22   :  { %235 = vrot.lane.b32.xlu0 %v2070_v1, %s2026_s22  ;;  %424 = vrot.lane.b32.xlu1 %v2070_v1, %s2027_s23  ;;  %s2084_s4 = sld [smem:[#allocation4 + $0x4]]  ;;  %s2032_s19 = smov 95   ;;  %vm987_vm4 = vcmp.lt.s32.totalorder %v2220_v9, 110  ;;  %vm1174_vm5 = vcmp.lt.s32.totalorder %v2220_v9, 96  ;;  %vm1361_vm6 = vcmp.lt.s32.totalorder %v2220_v9, 95  ;;  %vm1548_vm7 = vcmp.lt.s32.totalorder %v2220_v9, 94 }
  0x23   :  { %s2088_s5 = sld [smem:[#allocation4 + $0x5]]  ;;  %s2033_s22 = smov 94  }
  0x24   :  { %s2090_s6 = sld [smem:[#allocation2]]  ;;  %v42_v6 = vstv %s2074_s26 }
  0x25   :  { %s2092_s7 = sld [smem:[#allocation2 + $0x1b]]  ;;  %v44_v7 = vstv %s2078_s28 }
  0x26   :  { %611 = vrot.lane.b32.xlu1 %v2070_v1, %s2028_s27  ;;  %609 = vrot.lane.b32.xlu0 %v2063_v0, %s2028_s27  ;;  %s2094_s8 = sld [smem:[#allocation2 + $0x36]]  ;;  %v46_v14 = vstv %s2080_s29 }
  0x27   :  { %s2098_s10 = sld [smem:[#allocation2 + $0x51]]  ;;  %v48_v15 = vstv %s2082_s30 }
  0x28   :  { %s2100_s11 = sld [smem:[#allocation2 + $0x6c]]  ;;  %v50_v16 = vstv %s2084_s4 }
  0x29   :  { %s2102_s12 = sld [smem:[#allocation2 + $0x87]]  ;;  %v52_v18 = vstv %s2088_s5 }
  0x2a   :  { %798 = vrot.lane.b32.xlu1 %v2070_v1, %s2029_s0  ;;  %796 = vrot.lane.b32.xlu0 %v2063_v0, %s2029_s0  ;;  %s2104_s13 = sld [smem:[#allocation2 + $0x9]]  ;;  %v54_v3 = vstv %s2090_s6 }
  0x2b   :  { %s2108_s15 = sld [smem:[#allocation2 + $0x24]]  ;;  %v60_v4 = vstv %s2092_s7  ;;  %v56_v8 = vmul.f32 %v54_v3, %v2070_v1  ;;  %v55_v20 = vmul.f32 %v54_v3, %v2063_v0 }
  0x2c   :  { %s2110_s16 = sld [smem:[#allocation2 + $0x3f]]  ;;  %v66_v5 = vstv %s2094_s8  ;;  %v62_v10 = vmul.f32 %v60_v4, %v2070_v1  ;;  %v61_v21 = vmul.f32 %v60_v4, %v2063_v0 }
  0x2d   :  { %s2112_s17 = sld [smem:[#allocation2 + $0x5a]]  ;;  %v68_v11 = vmul.f32 %v66_v5, %v2070_v1  ;;  %v72_v17 = vstv %s2098_s10  ;;  %v58_v22 = vadd.f32 %v56_v8, %v42_v6  ;;  %v67_v37 = vmul.f32 %v66_v5, %v2063_v0 }
  0x2e   :  { %985 = vrot.lane.b32.xlu1 %v2070_v1, %s2030_s9  ;;  %983 = vrot.lane.b32.xlu0 %v2063_v0, %s2030_s9  ;;  %s2114_s18 = sld [smem:[#allocation2 + $0x75]]  ;;  %v78_v19 = vstv %s2100_s11  ;;  %v64_v26 = vadd.f32 %v62_v10, %v44_v7  ;;  %v74_v28 = vmul.f32 %v72_v17, %v2070_v1  ;;  %v73_v49 = vmul.f32 %v72_v17, %v2063_v0 }
  0x2f   :  { %s2118_s20 = sld [smem:[#allocation2 + $0x90]]  ;;  %v70_v27 = vadd.f32 %v68_v11, %v46_v14  ;;  %v84_v29 = vstv %s2102_s12  ;;  %v80_v30 = vmul.f32 %v78_v19, %v2070_v1  ;;  %v57_v8 = vadd.f32 %v55_v20, %v42_v6 }
  0x30   :  { %s2120_s1 = sld [smem:[#allocation2 + $0x12]]  ;;  %v90_v12 = vstv %s2104_s13  ;;  %v86_v38 = vmul.f32 %v84_v29, %v2070_v1  ;;  %v76_v42 = vadd.f32 %v74_v28, %v48_v15  ;;  %v63_v10 = vadd.f32 %v61_v21, %v44_v7 }
  0x31   :  { %s2122_s2 = sld [smem:[#allocation2 + $0x2d]]  ;;  %v102_v13 = vstv %s2108_s15  ;;  %v92_v23 = vmul.f32 %v90_v12, %v2070_v1  ;;  %v82_v54 = vadd.f32 %v80_v30, %v50_v16  ;;  %v69_v11 = vadd.f32 %v67_v37, %v46_v14 }
  0x32   :  { %1172 = vrot.lane.b32.xlu1 %v2070_v1, %s2031_s14  ;;  %1170 = vrot.lane.b32.xlu0 %v2063_v0, %s2031_s14  ;;  %s2124_s21 = sld [smem:[#allocation2 + $0x48]]  ;;  %v104_v24 = vmul.f32 %v102_v13, %v2070_v1  ;;  %v114_v25 = vstv %s2110_s16  ;;  %v88_v55 = vadd.f32 %v86_v38, %v52_v18  ;;  %v75_v17 = vadd.f32 %v73_v49, %v48_v15 }
  0x33   :  { %s2128_s23 = sld [smem:[#allocation2 + $0x63]]  ;;  %v126_v31 = vstv %s2112_s17  ;;  %v116_v34 = vmul.f32 %v114_v25, %v2070_v1  ;;  %v96_v39 = vrot.slane %v92_v23, 1  ;;  %v103_v28 = vmul.f32 %v102_v13, %v2063_v0 }
  0x34   :  { %s2130_s24 = sld [smem:[#allocation2 + $0x7e]]  ;;  %v138_v32 = vstv %s2114_s18  ;;  %v108_v40 = vrot.slane %v104_v24, 1  ;;  %v128_v43 = vmul.f32 %v126_v31, %v2070_v1  ;;  %v127_v37 = vmul.f32 %v126_v31, %v2063_v0 }
  0x35   :  { %s2132_s25 = sld [smem:[#allocation2 + $0x99]]  ;;  %v150_v33 = vstv %s2118_s20  ;;  %v140_v44 = vmul.f32 %v138_v32, %v2070_v1  ;;  %v120_v50 = vrot.slane %v116_v34, 1  ;;  %v100_v56 = vadd.f32 %v96_v39, %v58_v22 }
  0x36   :  { %1359 = vrot.lane.b32.xlu1 %v2070_v1, %s2032_s19  ;;  %1357 = vrot.lane.b32.xlu0 %v2063_v0, %s2032_s19  ;;  %s2134_s27 = sld [smem:[#allocation2 + $0x1]]  ;;  %v162_v35 = vstv %s2120_s1  ;;  %v152_v45 = vmul.f32 %v150_v33, %v2070_v1  ;;  %v112_v57 = vadd.f32 %v108_v40, %v64_v26  ;;  %v132_v58 = vrot.slane %v128_v43, 1 }
  0x37   :  { %s2136_s0 = sld [smem:[#allocation2 + $0x1c]]  ;;  %v174_v36 = vstv %s2122_s2  ;;  %v164_v46 = vmul.f32 %v162_v35, %v2070_v1  ;;  %v144_v59 = vrot.slane %v140_v44, 1  ;;  %v124_v4 = vadd.f32 %v120_v50, %v70_v27 }
  0x38   :  { %3688 = sst [smem:[#allocation8_spill]] %s2124_s21  ;;  %v176_v47 = vmul.f32 %v174_v36, %v2070_v1  ;;  %v156_v60 = vrot.slane %v152_v45, 1  ;;  %v79_v22 = vmul.f32 %v78_v19, %v2063_v0  ;;  %v136_v6 = vadd.f32 %v132_v58, %v76_v42 }
  0x39   :  { %3689 = sst [smem:[#allocation9_spill]] %s2128_s23  ;;  %v168_v62 = vrot.slane %v164_v46, 2  ;;  %v148_v7 = vadd.f32 %v144_v59, %v82_v54  ;;  %v91_v27 = vmul.f32 %v90_v12, %v2063_v0  ;;  %v115_v34 = vmul.f32 %v114_v25, %v2063_v0 }
  0x3a   :  { %1546 = vrot.lane.b32.xlu1 %v2070_v1, %s2033_s22  ;;  %1544 = vrot.lane.b32.xlu0 %v2063_v0, %s2033_s22  ;;  %3690 = sst [smem:[#allocation10_spill]] %s2130_s24  ;;  %v180_v63 = vrot.slane %v176_v47, 2  ;;  %v160_v20 = vadd.f32 %v156_v60, %v88_v55  ;;  %v81_v30 = vadd.f32 %v79_v22, %v50_v16  ;;  %v139_v13 = vmul.f32 %v138_v32, %v2063_v0 }
  0x3b   :  { %3691 = sst [smem:[#allocation11_spill]] %s2132_s25  ;;  %v2348_v15 = vadd.f32 %v168_v62, %v100_v56  ;;  %v151_v16 = vmul.f32 %v150_v33, %v2063_v0  ;;  %v95_v42 = vrot.slane %v91_v27, 1  ;;  %v107_v32 = vrot.slane %v103_v28, 1 }
  0x3c   :  { %3692 = sst [smem:[#allocation12_spill]] %s2134_s27  ;;  %v2350_v21 = vadd.f32 %v180_v63, %v112_v57  ;;  %v163_v33 = vmul.f32 %v162_v35, %v2063_v0  ;;  %v175_v43 = vmul.f32 %v174_v36, %v2063_v0  ;;  %v119_v44 = vrot.slane %v115_v34, 1 }
  0x3d   :  { %3693 = sst [smem:[#allocation13_spill]] %s2136_s0  ;;  %v131_v45 = vrot.slane %v127_v37, 1  ;;  %v143_v47 = vrot.slane %v139_v13, 1  ;;  %v155_v49 = vrot.slane %v151_v16, 1 }
  0x3e   :  { %s2138_s9 = sld [smem:[#allocation2 + $0x37]]  ;;  %v167_v56 = vrot.slane %v163_v33, 2  ;;  %v179_v57 = vrot.slane %v175_v43, 2 }
  0x3f   :  { %s2140_s14 = sld [smem:[#allocation2 + $0x52]]  ;;  %v147_v59 = vadd.f32 %v143_v47, %v81_v30 }
  0x40   :  { %s2142_s19 = sld [smem:[#allocation2 + $0x6d]] }
  0x41   :  { %s2144_s3 = sld [smem:[#allocation2 + $0x88]] }
  0x42   :  { %s2146_s21 = sld [smem:[#allocation2 + $0xa]] }
  0x43   :  { %s2148_s22 = sld [smem:[#allocation2 + $0x25]] }
  0x44   :  { %3694 = sst [smem:[#allocation14_spill]] %s2138_s9 }
  0x45   :  { %3695 = sst [smem:[#allocation15_spill]] %s2140_s14 }
  0x46   :  { %3696 = sst [smem:[#allocation16_spill]] %s2142_s19 }
  0x47   :  { %3697 = sst [smem:[#allocation17_spill]] %s2144_s3 }
  0x48   :  { %3698 = sst [smem:[#allocation18_spill]] %s2146_s21 }
  0x49   :  { %3699 = sst [smem:[#allocation19_spill]] %s2148_s22 }
  0x4a   :  { %s2150_s23 = sld [smem:[#allocation2 + $0x40]] }
  0x4b   :  { %s2152_s24 = sld [smem:[#allocation2 + $0x5b]] }
  0x4c   :  { %s2154_s25 = sld [smem:[#allocation2 + $0x76]] }
  0x4d   :  { %s2156_s27 = sld [smem:[#allocation2 + $0x91]] }
  0x4e   :  { %s2158_s0 = sld [smem:[#allocation2 + $0x13]] }
  0x4f   :  { %s2160_s9 = sld [smem:[#allocation2 + $0x2e]] }
  0x50   :  { %3700 = sst [smem:[#allocation20_spill]] %s2150_s23 }
  0x51   :  { %3701 = sst [smem:[#allocation21_spill]] %s2152_s24 }
  0x52   :  { %3702 = sst [smem:[#allocation22_spill]] %s2154_s25 }
  0x53   :  { %3703 = sst [smem:[#allocation23_spill]] %s2156_s27 }
  0x54   :  { %3704 = sst [smem:[#allocation24_spill]] %s2158_s0 }
  0x55   :  { %3705 = sst [smem:[#allocation25_spill]] %s2160_s9 }
  0x56   :  { %s2162_s14 = sld [smem:[#allocation2 + $0x49]] }
  0x57   :  { %s2164_s19 = sld [smem:[#allocation2 + $0x64]] }
  0x58   :  { %s2166_s3 = sld [smem:[#allocation2 + $0x7f]] }
  0x59   :  { %s2168_s21 = sld [smem:[#allocation2 + $0x9a]] }
  0x5a   :  { %s2170_s22 = sld [smem:[#allocation2 + $0x2]] }
  0x5b   :  { %s2172_s23 = sld [smem:[#allocation2 + $0x1d]] }
  0x5c   :  { %3706 = sst [smem:[#allocation26_spill]] %s2162_s14 }
  0x5d   :  { %3707 = sst [smem:[#allocation27_spill]] %s2164_s19 }
  0x5e   :  { %3708 = sst [smem:[#allocation28_spill]] %s2166_s3 }
  0x5f   :  { %3709 = sst [smem:[#allocation29_spill]] %s2168_s21 }
  0x60   :  { %3710 = sst [smem:[#allocation30_spill]] %s2170_s22 }
  0x61   :  { %3711 = sst [smem:[#allocation31_spill]] %s2172_s23 }
  0x62   :  { %s2174_s24 = sld [smem:[#allocation2 + $0x38]] }
  0x63   :  { %s2176_s25 = sld [smem:[#allocation2 + $0x53]] }
  0x64   :  { %s2178_s27 = sld [smem:[#allocation2 + $0x6e]] }
  0x65   :  { %s2180_s9 = sld [smem:[#allocation2 + $0x89]] }
  0x66   :  { %s2182_s14 = sld [smem:[#allocation2 + $0xb]] }
  0x67   :  { %s2184_s19 = sld [smem:[#allocation2 + $0x26]] }
  0x68   :  { %3712 = sst [smem:[#allocation32_spill]] %s2174_s24 }
  0x69   :  { %3713 = sst [smem:[#allocation33_spill]] %s2176_s25 }
  0x6a   :  { %3714 = sst [smem:[#allocation34_spill]] %s2178_s27 }
  0x6b   :  { %3715 = sst [smem:[#allocation35_spill]] %s2180_s9 }
  0x6c   :  { %3716 = sst [smem:[#allocation36_spill]] %s2182_s14 }
  0x6d   :  { %3717 = sst [smem:[#allocation37_spill]] %s2184_s19 }
  0x6e   :  { %s2186_s21 = sld [smem:[#allocation2 + $0x41]] }
  0x6f   :  { %s2188_s22 = sld [smem:[#allocation2 + $0x5c]] }
  0x70   :  { %s2190_s23 = sld [smem:[#allocation2 + $0x77]] }
  0x71   :  { %s2192_s24 = sld [smem:[#allocation2 + $0x92]] }
  0x72   :  { %s2194_s27 = sld [smem:[#allocation2 + $0x14]] }
  0x73   :  { %s2196_s25 = sld [smem:[#allocation2 + $0x2f]] }
  0x74   :  { %3718 = sst [smem:[#allocation38_spill]] %s2186_s21 }
  0x75   :  { %3719 = sst [smem:[#allocation39_spill]] %s2188_s22 }
  0x76   :  { %3720 = sst [smem:[#allocation40_spill]] %s2190_s23 }
  0x77   :  { %3721 = sst [smem:[#allocation41_spill]] %s2192_s24 }
  0x78   :  { %3722 = sst [smem:[#allocation42_spill]] %s2194_s27  ;;  %v538_v43 = vstv %s2194_s27 }
  0x79   :  { %3723 = sst [smem:[#allocation43_spill]] %s2196_s25 }
  0x7a   :  { %s2198_s9 = sld [smem:[#allocation2 + $0x4a]] }
  0x7b   :  { %s2200_s14 = sld [smem:[#allocation2 + $0x65]] }
  0x7c   :  { %s2202_s19 = sld [smem:[#allocation2 + $0x80]] }
  0x7d   :  { %s2204_s3 = sld [smem:[#allocation2 + $0x9b]] }
  0x7e   :  { %s2206_s23 = sld [smem:[#allocation2 + $0x3]] }
  0x7f   :  { %s2209_s24 = sld [smem:[#allocation2 + $0x1e]] }
  0x80   :  { %3724 = sst [smem:[#allocation44_spill]] %s2198_s9 }
  0x81   :  { %3725 = sst [smem:[#allocation45_spill]] %s2200_s14 }
  0x82   :  { %3726 = sst [smem:[#allocation46_spill]] %s2202_s19 }
  0x83   :  { %s2213_s9 = sld [smem:[#allocation2 + $0x39]] }
  0x84   :  { %3727 = sst [smem:[#allocation47_spill]] %s2206_s23 }
  0x85   :  { %3728 = sst [smem:[#allocation48_spill]] %s2209_s24 }
  0x86   :  { %s2215_s14 = sld [smem:[#allocation2 + $0x54]] }
  0x87   :  { %s2222_s6 = sld [smem:[#allocation2 + $0x6f]] }
  0x88   :  { %s2228_s7 = sld [smem:[#allocation2 + $0x8a]] }
  0x89   :  { %3729 = sst [smem:[#allocation49_spill]] %s2213_s9 }
  0x8a   :  { %s2234_s8 = sld [smem:[#allocation2 + $0xc]] }
  0x8b   :  { %s2251_s10 = sld [smem:[#allocation2 + $0x42]] }
  0x8c   :  { %3730 = sst [smem:[#allocation50_spill]] %s2215_s14 }
  0x8d   :  { %3731 = sst [smem:[#allocation51_spill]] %s2222_s6 }
  0x8e   :  { %3732 = sst [smem:[#allocation52_spill]] %s2228_s7 }
  0x8f   :  { %s2240_s7 = sld [smem:[#allocation2 + $0x27]] }
  0x90   :  { %3733 = sst [smem:[#allocation53_spill]] %s2234_s8 }
  0x91   :  { %3735 = sst [smem:[#allocation55_spill]] %s2251_s10 }
  0x92   :  { %s2259_s8 = sld [smem:[#allocation2 + $0x5d]] }
  0x93   :  { %s2267_s10 = sld [smem:[#allocation2 + $0x78]] }
  0x94   :  { %s3739_s12 = sld [smem:[#allocation9_spill]] }
  0x95   :  { %3734 = sst [smem:[#allocation54_spill]] %s2240_s7 }
  0x96   :  { %s3736_s7 = sld [smem:[#allocation8_spill]] }
  0x97   :  { %s3741_s6 = sld [smem:[#allocation10_spill]] }
  0x98   :  { %3737 = sst [smem:[#allocation8_spill]] %s2259_s8 }
  0x99   :  { %3738 = sst [smem:[#allocation56_spill]] %s2267_s10 }
  0x9a   :  { %s2275_s8 = sld [smem:[#allocation2 + $0x93]]  ;;  %v198_v48 = vstv %s3739_s12 }
  0x9b   :  { %s3742_s14 = sld [smem:[#allocation11_spill]]  ;;  %v200_v61 = vmul.f32 %v198_v48, %v2070_v1  ;;  %v199_v46 = vmul.f32 %v198_v48, %v2063_v0  ;;  %v111_v48 = vadd.f32 %v107_v32, %v63_v10 }
  0x9c   :  { %v186_v41 = vstv %s3736_s7  ;;  %s2279_s10 = sld [smem:[#allocation2 + $0x15]] }
  0x9d   :  { %v188_v51 = vmul.f32 %v186_v41, %v2070_v1  ;;  %v210_v52 = vstv %s3741_s6  ;;  %s2315_s9 = sld [smem:[#allocation2 + $0x81]]  ;;  %v204_v14 = vrot.slane %v200_v61, 2  ;;  %v203_v58 = vrot.slane %v199_v46, 2 }
  0x9e   :  { %v212_v2 = vmul.f32 %v210_v52, %v2070_v1  ;;  %s3753_s26 = sld [smem:[#allocation13_spill]]  ;;  %v211_v35 = vmul.f32 %v210_v52, %v2063_v0  ;;  %v135_v52 = vadd.f32 %v131_v45, %v75_v17 }
  0x9f   :  { %v192_v5 = vrot.slane %v188_v51, 2  ;;  %s2346_s28 = sld [smem:[#allocation2 + $0x55]]  ;;  %v2376_v12 = vadd.f32 %v204_v14, %v136_v6 }
  0xa0   :  { %3740 = sst [smem:[#allocation9_spill]] %s2275_s8  ;;  %v216_v19 = vrot.slane %v212_v2, 2  ;;  %v215_v61 = vrot.slane %v211_v35, 2  ;;  %v2450_v6 = vadd.f32 %v203_v58, %v135_v52  ;;  %v423_v52 = vpop.permute.xlu1 %422 }
  0xa1   :  { %s2292_s8 = sld [smem:[#allocation2 + $0x30]]  ;;  %v222_v53 = vstv %s3742_s14  ;;  %v2354_v24 = vadd.f32 %v192_v5, %v124_v4  ;;  %v351_v5 = vstv %s2158_s0 }
  0xa2   :  { %3743 = sst [smem:[#allocation10_spill]] %s2279_s10  ;;  %v224_v3 = vmul.f32 %v222_v53, %v2070_v1  ;;  %v85_v1 = vmul.f32 %v84_v29, %v2063_v0  ;;  %v2387_v25 = vadd.f32 %v216_v19, %v148_v7  ;;  %v223_v36 = vmul.f32 %v222_v53, %v2063_v0 }
  0xa3   :  { %s2302_s10 = sld [smem:[#allocation2 + $0x4b]]  ;;  %v2456_v14 = vadd.f32 %v215_v61, %v147_v59 }
  0xa4   :  { %3747 = sst [smem:[#allocation59_spill]] %s2315_s9  ;;  %v228_v23 = vrot.slane %v224_v3, 2  ;;  %v249_v29 = vstv %s3753_s26  ;;  %v87_v40 = vadd.f32 %v85_v1, %v52_v18  ;;  %v187_v18 = vmul.f32 %v186_v41, %v2063_v0 }
  0xa5   :  { %s2328_s9 = sld [smem:[#allocation2 + $0x4]]  ;;  %v99_v41 = vadd.f32 %v95_v42, %v57_v8  ;;  %v123_v0 = vadd.f32 %v119_v44, %v69_v11  ;;  %v227_v62 = vrot.slane %v223_v36, 2  ;;  %v2442_v11 = vadd.f32 %v179_v57, %v111_v48 }
  0xa6   :  { %3754 = sst [smem:[#allocation64_spill]] %s2346_s28  ;;  %v2389_v39 = vadd.f32 %v228_v23, %v160_v20  ;;  %v191_v53 = vrot.slane %v187_v18, 2  ;;  %v159_v60 = vadd.f32 %v155_v49, %v87_v40  ;;  %v490_v40 = vstv %s2186_s21 }
  0xa7   :  { %3744 = sst [smem:[#allocation11_spill]] %s2292_s8  ;;  %v2440_v10 = vadd.f32 %v167_v56, %v99_v41  ;;  %v502_v42 = vstv %s2188_s22  ;;  %v550_v44 = vstv %s2196_s25  ;;  %v425_v56 = vpop.permute.xlu1 %424 }
  0xa8   :  { %s2309_s8 = sld [smem:[#allocation2 + $0x66]]  ;;  %v2448_v1 = vadd.f32 %v191_v53, %v123_v0  ;;  %v2458_v19 = vadd.f32 %v227_v62, %v159_v60  ;;  %v234_v60 = vpop.permute.xlu0 %233  ;;  %v2588_v58 = vsel %vm426_vm1, %v423_v52, %v425_v56  ;;  %v2592_v59 = vsel %vm426_vm1, %v425_v56, %v423_v52 }
  0xa9   :  { %3745 = sst [smem:[#allocation57_spill]] %s2302_s10 }
  0xaa   :  { %s2334_s10 = sld [smem:[#allocation2 + $0x1f]] }
  0xab   :  { %3749 = sst [smem:[#allocation61_spill]] %s2328_s9 }
  0xac   :  { %s2344_s9 = sld [smem:[#allocation2 + $0x3a]]  ;;  %v236_v57 = vpop.permute.xlu0 %235 }
  0xad   :  { %s3755_s29 = sld [smem:[#allocation14_spill]]  ;;  %v2546_v41 = vsel %vm239_vm0, %v234_v60, %v236_v57  ;;  %v2550_v62 = vsel %vm239_vm0, %v236_v57, %v234_v60 }
  0xae   :  { %3746 = sst [smem:[#allocation58_spill]] %s2309_s8  ;;  %v250_v57 = vmul.f32 %v249_v29, %v2546_v41  ;;  %v251_v60 = vmul.f32 %v249_v29, %v2550_v62 }
  0xaf   :  { %s2320_s8 = sld [smem:[#allocation2 + $0x9c]] }
  0xb0   :  { %3750 = sst [smem:[#allocation62_spill]] %s2334_s10  ;;  %v253_v47 = vadd.f32 %v251_v60, %v2350_v21 }
  0xb1   :  { %s2352_s30 = sld [smem:[#allocation2 + $0x70]] }
  0xb2   :  { %3752 = sst [smem:[#allocation63_spill]] %s2344_s9 }
  0xb3   :  { %s3756_s11 = sld [smem:[#allocation15_spill]]  ;;  %v255_v38 = vstv %s3755_s29 }
  0xb4   :  { %s2363_s28 = sld [smem:[#allocation2 + $0x8b]]  ;;  %v256_v0 = vmul.f32 %v255_v38, %v2546_v41 }
  0xb5   :  { %3748 = sst [smem:[#allocation60_spill]] %s2320_s8 }
  0xb6   :  { %s3751_s8 = sld [smem:[#allocation12_spill]] }
  0xb7   :  { %s2374_s13 = sld [smem:[#allocation2 + $0xd]] }
  0xb8   :  { %s2385_s4 = sld [smem:[#allocation2 + $0x28]] }
  0xb9   :  { %v261_v31 = vstv %s3756_s11  ;;  %s2394_s15 = sld [smem:[#allocation2 + $0x43]] }
  0xba   :  { %3757 = sst [smem:[#allocation65_spill]] %s2363_s28  ;;  %v262_v35 = vmul.f32 %v261_v31, %v2546_v41  ;;  %v263_v29 = vmul.f32 %v261_v31, %v2550_v62  ;;  %v252_v31 = vadd.f32 %v250_v57, %v2442_v11 }
  0xbb   :  { %s3760_s16 = sld [smem:[#allocation16_spill]] }
  0xbc   :  { %v243_v26 = vstv %s3751_s8  ;;  %s3761_s17 = sld [smem:[#allocation17_spill]]  ;;  %v264_v21 = vadd.f32 %v262_v35, %v2450_v6 }
  0xbd   :  { %s3762_s18 = sld [smem:[#allocation18_spill]]  ;;  %v244_v53 = vmul.f32 %v243_v26, %v2546_v41  ;;  %v245_v36 = vmul.f32 %v243_v26, %v2550_v62  ;;  %v257_v26 = vmul.f32 %v255_v38, %v2550_v62 }
  0xbe   :  { %3758 = sst [smem:[#allocation66_spill]] %s2385_s4 }
  0xbf   :  { %3759 = sst [smem:[#allocation67_spill]] %s2394_s15  ;;  %v246_v38 = vadd.f32 %v244_v53, %v2440_v10  ;;  %v247_v49 = vadd.f32 %v245_v36, %v2348_v15  ;;  %v258_v15 = vadd.f32 %v256_v0, %v2448_v1  ;;  %v259_v11 = vadd.f32 %v257_v26, %v2354_v24 }
  0xc0   :  { %s3763_s20 = sld [smem:[#allocation19_spill]]  ;;  %v265_v36 = vadd.f32 %v263_v29, %v2376_v12 }
  0xc1   :  { %s2402_s29 = sld [smem:[#allocation2 + $0x5e]]  ;;  %v267_v50 = vstv %s3760_s16 }
  0xc2   :  { %s2410_s5 = sld [smem:[#allocation2 + $0x79]]  ;;  %v273_v51 = vstv %s3761_s17  ;;  %v269_v53 = vmul.f32 %v267_v50, %v2550_v62 }
  0xc3   :  { %s2418_s1 = sld [smem:[#allocation2 + $0x94]]  ;;  %v279_v54 = vstv %s3762_s18  ;;  %v275_v1 = vmul.f32 %v273_v51, %v2550_v62 }
  0xc4   :  { %s2424_s2 = sld [smem:[#allocation2 + $0x16]]  ;;  %v280_v56 = vmul.f32 %v279_v54, %v2546_v41  ;;  %v281_v52 = vmul.f32 %v279_v54, %v2550_v62  ;;  %v268_v54 = vmul.f32 %v267_v50, %v2546_v41 }
  0xc5   :  { %s3768_s7 = sld [smem:[#allocation20_spill]] }
  0xc6   :  { %v291_v55 = vstv %s3763_s20  ;;  %s3769_s12 = sld [smem:[#allocation21_spill]]  ;;  %v284_v0 = vrot.slane %v280_v56, 1  ;;  %v285_v50 = vrot.slane %v281_v52, 1  ;;  %v270_v48 = vadd.f32 %v268_v54, %v2456_v14 }
  0xc7   :  { %3764 = sst [smem:[#allocation68_spill]] %s2402_s29  ;;  %v292_v61 = vmul.f32 %v291_v55, %v2546_v41  ;;  %v293_v10 = vmul.f32 %v291_v55, %v2550_v62  ;;  %v274_v55 = vmul.f32 %v273_v51, %v2546_v41  ;;  %v277_v56 = vadd.f32 %v275_v1, %v2389_v39 }
  0xc8   :  { %3765 = sst [smem:[#allocation69_spill]] %s2410_s5  ;;  %v288_v18 = vadd.f32 %v284_v0, %v246_v38  ;;  %v289_v45 = vadd.f32 %v285_v50, %v247_v49  ;;  %v352_v39 = vmul.f32 %v351_v5, %v2546_v41 }
  0xc9   :  { %3766 = sst [smem:[#allocation70_spill]] %s2418_s1  ;;  %v296_v57 = vrot.slane %v292_v61, 1  ;;  %v297_v60 = vrot.slane %v293_v10, 1  ;;  %v276_v61 = vadd.f32 %v274_v55, %v2458_v19  ;;  %v353_v55 = vmul.f32 %v351_v5, %v2550_v62 }
  0xca   :  { %3767 = sst [smem:[#allocation71_spill]] %s2424_s2 }
  0xcb   :  { %s3770_s11 = sld [smem:[#allocation22_spill]]  ;;  %v303_v63 = vstv %s3768_s7  ;;  %v301_v14 = vadd.f32 %v297_v60, %v253_v47  ;;  %v357_v50 = vrot.slane %v353_v55, 2 }
  0xcc   :  { %s3771_s26 = sld [smem:[#allocation23_spill]]  ;;  %v315_v2 = vstv %s3769_s12  ;;  %v304_v24 = vmul.f32 %v303_v63, %v2546_v41  ;;  %v305_v6 = vmul.f32 %v303_v63, %v2550_v62 }
  0xcd   :  { %s2426_s6 = sld [smem:[#allocation2 + $0x31]]  ;;  %v316_v12 = vmul.f32 %v315_v2, %v2546_v41  ;;  %v317_v35 = vmul.f32 %v315_v2, %v2550_v62  ;;  %v271_v2 = vadd.f32 %v269_v53, %v2387_v25 }
  0xce   :  { %s3773_s14 = sld [smem:[#allocation25_spill]]  ;;  %v308_v52 = vrot.slane %v304_v24, 1 }
  0xcf   :  { %s2428_s17 = sld [smem:[#allocation2 + $0x4c]]  ;;  %v320_v10 = vrot.slane %v316_v12, 1  ;;  %v321_v46 = vrot.slane %v317_v35, 1 }
  0xd0   :  { %s3775_s16 = sld [smem:[#allocation26_spill]] }
  0xd1   :  { %s3776_s20 = sld [smem:[#allocation27_spill]]  ;;  %v327_v3 = vstv %s3770_s11  ;;  %v324_v1 = vadd.f32 %v320_v10, %v264_v21  ;;  %v325_v24 = vadd.f32 %v321_v46, %v265_v36  ;;  %v356_v21 = vrot.slane %v352_v39, 2 }
  0xd2   :  { %s2430_s18 = sld [smem:[#allocation2 + $0x67]]  ;;  %v339_v4 = vstv %s3771_s26  ;;  %v328_v26 = vmul.f32 %v327_v3, %v2546_v41  ;;  %v329_v51 = vmul.f32 %v327_v3, %v2550_v62  ;;  %v309_v3 = vrot.slane %v305_v6, 1 }
  0xd3   :  { %3772 = sst [smem:[#allocation72_spill]] %s2426_s6  ;;  %v340_v29 = vmul.f32 %v339_v4, %v2546_v41  ;;  %v341_v63 = vmul.f32 %v339_v4, %v2550_v62  ;;  %v300_v4 = vadd.f32 %v296_v57, %v252_v31  ;;  %v312_v31 = vadd.f32 %v308_v52, %v258_v15 }
  0xd4   :  { %s3778_s8 = sld [smem:[#allocation28_spill]]  ;;  %v363_v8 = vstv %s3773_s14  ;;  %v332_v25 = vrot.slane %v328_v26, 1  ;;  %v333_v54 = vrot.slane %v329_v51, 1  ;;  %v313_v47 = vadd.f32 %v309_v3, %v259_v11 }
  0xd5   :  { %3774 = sst [smem:[#allocation73_spill]] %s2428_s17  ;;  %v344_v53 = vrot.slane %v340_v29, 1  ;;  %v345_v19 = vrot.slane %v341_v63, 1  ;;  %v364_v38 = vmul.f32 %v363_v8, %v2546_v41  ;;  %v365_v49 = vmul.f32 %v363_v8, %v2550_v62 }
  0xd6   :  { %s3779_s2 = sld [smem:[#allocation29_spill]]  ;;  %v375_v17 = vstv %s3775_s16  ;;  %v336_v15 = vadd.f32 %v332_v25, %v270_v48  ;;  %v337_v35 = vadd.f32 %v333_v54, %v271_v2  ;;  %v360_v63 = vadd.f32 %v356_v21, %v288_v18 }
  0xd7   :  { %s2436_s6 = sld [smem:[#allocation2 + $0x82]]  ;;  %v387_v22 = vstv %s3776_s20  ;;  %v376_v6 = vmul.f32 %v375_v17, %v2546_v41  ;;  %v377_v5 = vmul.f32 %v375_v17, %v2550_v62  ;;  %v348_v11 = vadd.f32 %v344_v53, %v276_v61 }
  0xd8   :  { %3777 = sst [smem:[#allocation74_spill]] %s2430_s18  ;;  %v388_v12 = vmul.f32 %v387_v22, %v2546_v41  ;;  %v389_v8 = vmul.f32 %v387_v22, %v2550_v62  ;;  %v349_v0 = vadd.f32 %v345_v19, %v277_v56  ;;  %v368_v46 = vrot.slane %v364_v38, 2 }
  0xd9   :  { %s3781_s1 = sld [smem:[#allocation30_spill]]  ;;  %v369_v36 = vrot.slane %v365_v49, 2  ;;  %v380_v48 = vrot.slane %v376_v6, 2  ;;  %v381_v26 = vrot.slane %v377_v5, 2  ;;  %v361_v2 = vadd.f32 %v357_v50, %v289_v45 }
  0xda   :  { %s3782_s5 = sld [smem:[#allocation31_spill]]  ;;  %v399_v7 = vstv %s3778_s8  ;;  %v392_v51 = vrot.slane %v388_v12, 2  ;;  %v393_v29 = vrot.slane %v389_v8, 2  ;;  %v372_v61 = vadd.f32 %v368_v46, %v300_v4 }
  0xdb   :  { %s3783_s17 = sld [smem:[#allocation32_spill]]  ;;  %v400_v57 = vmul.f32 %v399_v7, %v2546_v41  ;;  %v401_v17 = vmul.f32 %v399_v7, %v2550_v62  ;;  %v373_v56 = vadd.f32 %v369_v36, %v301_v14  ;;  %v384_v52 = vadd.f32 %v380_v48, %v312_v31 }
  0xdc   :  { %s3784_s29 = sld [smem:[#allocation33_spill]]  ;;  %v411_v20 = vstv %s3779_s2  ;;  %v385_v7 = vadd.f32 %v381_v26, %v313_v47  ;;  %v396_v3 = vadd.f32 %v392_v51, %v324_v1  ;;  %v397_v10 = vadd.f32 %v393_v29, %v325_v24 }
  0xdd   :  { %3780 = sst [smem:[#allocation75_spill]] %s2436_s6  ;;  %v412_v60 = vmul.f32 %v411_v20, %v2546_v41  ;;  %v413_v22 = vmul.f32 %v411_v20, %v2550_v62  ;;  %v404_v41 = vrot.slane %v400_v57, 2  ;;  %v405_v25 = vrot.slane %v401_v17, 2 }
  0xde   :  { %s2444_s15 = sld [smem:[#allocation2 + $0x9d]] }
  0xdf   :  { %s3786_s18 = sld [smem:[#allocation34_spill]]  ;;  %v430_v23 = vstv %s3781_s1  ;;  %v416_v20 = vrot.slane %v412_v60, 2  ;;  %v417_v62 = vrot.slane %v413_v22, 2  ;;  %v408_v14 = vadd.f32 %v404_v41, %v336_v15 }
  0xe0   :  { %s3787_s7 = sld [smem:[#allocation35_spill]]  ;;  %v436_v27 = vstv %s3782_s5  ;;  %v431_v54 = vmul.f32 %v430_v23, %v2588_v58  ;;  %v432_v45 = vmul.f32 %v430_v23, %v2592_v59  ;;  %v409_v53 = vadd.f32 %v405_v25, %v337_v35 }
  0xe1   :  { %s3788_s11 = sld [smem:[#allocation36_spill]]  ;;  %v442_v28 = vstv %s3783_s17  ;;  %v437_v18 = vmul.f32 %v436_v27, %v2588_v58  ;;  %v438_v4 = vmul.f32 %v436_v27, %v2592_v59  ;;  %v420_v19 = vadd.f32 %v416_v20, %v348_v11 }
  0xe2   :  { %s3789_s26 = sld [smem:[#allocation37_spill]]  ;;  %v448_v30 = vstv %s3784_s29  ;;  %v421_v39 = vadd.f32 %v417_v62, %v349_v0  ;;  %v433_v55 = vadd.f32 %v431_v54, %v360_v63  ;;  %v434_v23 = vadd.f32 %v432_v45, %v361_v2 }
  0xe3   :  { %s2452_s0 = sld [smem:[#allocation2 + $0x5]]  ;;  %v439_v38 = vadd.f32 %v437_v18, %v372_v61  ;;  %v440_v49 = vadd.f32 %v438_v4, %v373_v56  ;;  %v443_v27 = vmul.f32 %v442_v28, %v2588_v58  ;;  %v444_v31 = vmul.f32 %v442_v28, %v2592_v59 }
  0xe4   :  { %3785 = sst [smem:[#allocation76_spill]] %s2444_s15  ;;  %v449_v47 = vmul.f32 %v448_v30, %v2588_v58  ;;  %v450_v1 = vmul.f32 %v448_v30, %v2592_v59  ;;  %v492_v35 = vmul.f32 %v490_v40, %v2592_v59  ;;  %v504_v11 = vmul.f32 %v502_v42, %v2592_v59 }
  0xe5   :  { %s3791_s14 = sld [smem:[#allocation40_spill]]  ;;  %v454_v34 = vstv %s3786_s18  ;;  %v445_v0 = vadd.f32 %v443_v27, %v384_v52  ;;  %v539_v56 = vmul.f32 %v538_v43, %v2588_v58  ;;  %v540_v52 = vmul.f32 %v538_v43, %v2592_v59 }
  0xe6   :  { %s3792_s12 = sld [smem:[#allocation41_spill]]  ;;  %v460_v37 = vstv %s3787_s7  ;;  %v455_v24 = vmul.f32 %v454_v34, %v2588_v58  ;;  %v456_v6 = vmul.f32 %v454_v34, %v2592_v59  ;;  %v491_v34 = vmul.f32 %v490_v40, %v2588_v58 }
  0xe7   :  { %s2460_s16 = sld [smem:[#allocation2 + $0x20]]  ;;  %v466_v13 = vstv %s3788_s11  ;;  %v461_v5 = vmul.f32 %v460_v37, %v2588_v58  ;;  %v462_v12 = vmul.f32 %v460_v37, %v2592_v59  ;;  %v503_v37 = vmul.f32 %v502_v42, %v2588_v58 }
  0xe8   :  { %s2466_s15 = sld [smem:[#allocation2 + $0x3b]]  ;;  %v478_v16 = vstv %s3789_s26  ;;  %v467_v28 = vmul.f32 %v466_v13, %v2588_v58  ;;  %v468_v8 = vmul.f32 %v466_v13, %v2592_v59  ;;  %v446_v13 = vadd.f32 %v444_v31, %v385_v7 }
  0xe9   :  { %3790 = sst [smem:[#allocation77_spill]] %s2452_s0  ;;  %v479_v30 = vmul.f32 %v478_v16, %v2588_v58  ;;  %v480_v15 = vmul.f32 %v478_v16, %v2592_v59  ;;  %v451_v21 = vadd.f32 %v449_v47, %v396_v3  ;;  %v452_v50 = vadd.f32 %v450_v1, %v397_v10 }
  0xea   :  { %s2472_s2 = sld [smem:[#allocation2 + $0x56]]  ;;  %v457_v16 = vadd.f32 %v455_v24, %v408_v14  ;;  %v458_v46 = vadd.f32 %v456_v6, %v409_v53  ;;  %v463_v36 = vadd.f32 %v461_v5, %v420_v19  ;;  %v464_v40 = vadd.f32 %v462_v12, %v421_v39 }
  0xeb   :  { %s3797_s1 = sld [smem:[#allocation49_spill]]  ;;  %v514_v32 = vstv %s3791_s14  ;;  %v471_v57 = vrot.slane %v467_v28, 1  ;;  %v472_v17 = vrot.slane %v468_v8, 1  ;;  %v483_v60 = vrot.slane %v479_v30, 1 }
  0xec   :  { %v526_v33 = vstv %s3792_s12  ;;  %s2478_s8 = sld [smem:[#allocation2 + $0x71]]  ;;  %v484_v42 = vrot.slane %v480_v15, 1  ;;  %v495_v22 = vrot.slane %v491_v34, 1  ;;  %v496_v48 = vrot.slane %v492_v35, 1 }
  0xed   :  { %s2485_s21 = sld [smem:[#allocation2 + $0x8c]]  ;;  %v507_v26 = vrot.slane %v503_v37, 1  ;;  %v508_v51 = vrot.slane %v504_v11, 1  ;;  %v515_v29 = vmul.f32 %v514_v32, %v2588_v58  ;;  %v516_v63 = vmul.f32 %v514_v32, %v2592_v59  ;;  %v612_v11 = vpop.permute.xlu1 %611 }
  0xee   :  { %3795 = sst [smem:[#allocation78_spill]] %s2466_s15  ;;  %v527_v2 = vmul.f32 %v526_v33, %v2588_v58  ;;  %v528_v61 = vmul.f32 %v526_v33, %v2592_v59  ;;  %v551_v7 = vmul.f32 %v550_v44, %v2588_v58  ;;  %v552_v32 = vmul.f32 %v550_v44, %v2592_v59 }
  0xef   :  { %s3811_s27 = sld [smem:[#allocation57_spill]]  ;;  %v475_v3 = vadd.f32 %v471_v57, %v433_v55  ;;  %v476_v10 = vadd.f32 %v472_v17, %v434_v23  ;;  %v487_v41 = vadd.f32 %v483_v60, %v439_v38  ;;  %v488_v33 = vadd.f32 %v484_v42, %v440_v49 }
  0xf0   :  { %3796 = sst [smem:[#allocation79_spill]] %s2472_s2  ;;  %v499_v25 = vadd.f32 %v495_v22, %v445_v0  ;;  %v500_v20 = vadd.f32 %v496_v48, %v446_v13  ;;  %v511_v62 = vadd.f32 %v507_v26, %v451_v21  ;;  %v512_v54 = vadd.f32 %v508_v51, %v452_v50  ;;  %v610_v0 = vpop.permute.xlu0 %609 }
  0xf1   :  { %s2497_s15 = sld [smem:[#allocation2 + $0x29]]  ;;  %v519_v43 = vrot.slane %v515_v29, 1  ;;  %v520_v45 = vrot.slane %v516_v63, 1  ;;  %v531_v18 = vrot.slane %v527_v2, 1  ;;  %v532_v4 = vrot.slane %v528_v61, 1 }
  0xf2   :  { %3801 = sst [smem:[#allocation49_spill]] %s2478_s8  ;;  %v543_v44 = vrot.slane %v539_v56, 2  ;;  %v544_v14 = vrot.slane %v540_v52, 2  ;;  %v555_v53 = vrot.slane %v551_v7, 2  ;;  %v556_v19 = vrot.slane %v552_v32, 2  ;;  %v799_v32 = vpop.permute.xlu1 %798 }
  0xf3   :  { %3806 = sst [smem:[#allocation80_spill]] %s2485_s21  ;;  %v523_v1 = vadd.f32 %v519_v43, %v457_v16  ;;  %v524_v24 = vadd.f32 %v520_v45, %v458_v46  ;;  %v535_v8 = vadd.f32 %v531_v18, %v463_v36  ;;  %v536_v30 = vadd.f32 %v532_v4, %v464_v40 }
  0xf4   :  { %s2491_s8 = sld [smem:[#allocation2 + $0xe]]  ;;  %v3874_v15 = vstv %s2204_s3  ;;  %v547_v13 = vadd.f32 %v543_v44, %v475_v3  ;;  %v548_v21 = vadd.f32 %v544_v14, %v476_v10  ;;  %v559_v50 = vadd.f32 %v555_v53, %v487_v41  ;;  %v797_v3 = vpop.permute.xlu0 %796 }
  0xf5   :  { %s2503_s24 = sld [smem:[#allocation2 + $0x44]]  ;;  %v599_v34 = vmul.f32 %v3874_v15, %v2588_v58  ;;  %v3875_v35 = vmov %v3874_v15  ;;  %v560_v16 = vadd.f32 %v556_v19, %v488_v33  ;;  %v2836_v19 = vsel %vm800_vm3, %v797_v3, %v799_v32 }
  0xf6   :  { %s2509_s29 = sld [smem:[#allocation2 + $0x5f]]  ;;  %v600_v37 = vmul.f32 %v3875_v35, %v2592_v59 }
  0xf7   :  { %s3817_s26 = sld [smem:[#allocation67_spill]]  ;;  %v603_v48 = vrot.slane %v599_v34, 2 }
  0xf8   :  { %s3818_s18 = sld [smem:[#allocation68_spill]]  ;;  %v604_v26 = vrot.slane %v600_v37, 2 }
  0xf9   :  { %s3819_s17 = sld [smem:[#allocation69_spill]] }
  0xfa   :  { %s2516_s11 = sld [smem:[#allocation2 + $0x7a]] }
  0xfb   :  { %s3820_s14 = sld [smem:[#allocation70_spill]] }
  0xfc   :  { %s3821_s2 = sld [smem:[#allocation71_spill]] }
  0xfd   :  { %s3822_s12 = sld [smem:[#allocation72_spill]] }
  0xfe   :  { %s3823_s22 = sld [smem:[#allocation73_spill]] }
  0xff   :  { %s2522_s5 = sld [smem:[#allocation2 + $0x95]] }
 0x100   :  { %s3826_s20 = sld [smem:[#allocation76_spill]] }
 0x101   :  { %s3827_s0 = sld [smem:[#allocation77_spill]] }
 0x102   :  { %s2528_s25 = sld [smem:[#allocation2 + $0x17]] }
 0x103   :  { %s3829_s10 = sld [smem:[#allocation78_spill]] }
 0x104   :  { %s3830_s9 = sld [smem:[#allocation79_spill]] }
 0x105   :  { %3825 = sst [smem:[#allocation57_spill]] %s2522_s5 }
 0x106   :  { %s2534_s19 = sld [smem:[#allocation2 + $0x32]] }
 0x107   :  { %s3865_s5 = sld [smem:[#allocation44_spill]] }
 0x108   :  { %3828 = sst [smem:[#allocation67_spill]] %s2528_s25 }
 0x109   :  { %s3866_s25 = sld [smem:[#allocation45_spill]] }
 0x10a   :  { %s3867_s28 = sld [smem:[#allocation46_spill]] }
 0x10b   :  { %s3876_s4 = sld [smem:[#allocation47_spill]] }
 0x10c   :  { %3832 = sst [smem:[#allocation68_spill]] %s2534_s19 }
 0x10d   :  { %v3868_v39 = vstv %s3865_s5  ;;  %s3877_s7 = sld [smem:[#allocation48_spill]] }
 0x10e   :  { %v563_v55 = vmul.f32 %v3868_v39, %v2588_v58  ;;  %v3869_v23 = vmov %v3868_v39  ;;  %s3878_s3 = sld [smem:[#allocation50_spill]]  ;;  %v2840_v39 = vsel %vm800_vm3, %v799_v32, %v797_v3 }
 0x10f   :  { %v564_v38 = vmul.f32 %v3869_v23, %v2592_v59  ;;  %v3870_v49 = vstv %s3866_s25  ;;  %s3883_s6 = sld [smem:[#allocation53_spill]] }
 0x110   :  { %v575_v27 = vmul.f32 %v3870_v49, %v2588_v58  ;;  %v3871_v31 = vmov %v3870_v49  ;;  %v3872_v6 = vstv %s3867_s28  ;;  %v567_v46 = vrot.slane %v563_v55, 2  ;;  %s3884_s21 = sld [smem:[#allocation54_spill]] }
 0x111   :  { %v576_v47 = vmul.f32 %v3871_v31, %v2592_v59  ;;  %v587_v5 = vmul.f32 %v3872_v6, %v2588_v58  ;;  %v3873_v12 = vmov %v3872_v6  ;;  %v568_v57 = vrot.slane %v564_v38, 2  ;;  %s3889_s23 = sld [smem:[#allocation51_spill]] }
 0x112   :  { %v588_v28 = vmul.f32 %v3873_v12, %v2592_v59  ;;  %v579_v36 = vrot.slane %v575_v27, 2  ;;  %v2804_v58 = vsel %vm613_vm2, %v610_v0, %v612_v11  ;;  %v2808_v59 = vsel %vm613_vm2, %v612_v11, %v610_v0  ;;  %s3890_s19 = sld [smem:[#allocation52_spill]] }
 0x113   :  { %v580_v40 = vrot.slane %v576_v47, 2  ;;  %v591_v17 = vrot.slane %v587_v5, 2  ;;  %v571_v42 = vadd.f32 %v567_v46, %v499_v25  ;;  %v572_v22 = vadd.f32 %v568_v57, %v500_v20  ;;  %s3892_s5 = sld [smem:[#allocation8_spill]] }
 0x114   :  { %v592_v60 = vrot.slane %v588_v28, 2  ;;  %v3879_v51 = vstv %s3876_s4  ;;  %v3881_v61 = vstv %s3877_s7  ;;  %v583_v10 = vadd.f32 %v579_v36, %v511_v62  ;;  %s3897_s25 = sld [smem:[#allocation56_spill]] }
 0x115   :  { %v618_v29 = vmul.f32 %v3879_v51, %v2804_v58  ;;  %v3880_v63 = vmov %v3879_v51  ;;  %v624_v56 = vmul.f32 %v3881_v61, %v2804_v58  ;;  %v3882_v52 = vmov %v3881_v61  ;;  %s3898_s28 = sld [smem:[#allocation9_spill]] }
 0x116   :  { %v619_v2 = vmul.f32 %v3880_v63, %v2808_v59  ;;  %v625_v7 = vmul.f32 %v3882_v52, %v2808_v59  ;;  %v584_v41 = vadd.f32 %v580_v40, %v512_v54  ;;  %v595_v33 = vadd.f32 %v591_v17, %v523_v1  ;;  %s3911_s4 = sld [smem:[#allocation10_spill]] }
 0x117   :  { %v596_v25 = vadd.f32 %v592_v60, %v524_v24  ;;  %v3885_v20 = vstv %s3797_s1  ;;  %v3887_v4 = vstv %s3878_s3  ;;  %v607_v62 = vadd.f32 %v603_v48, %v535_v8  ;;  %s3891_s1 = sld [smem:[#allocation55_spill]] }
 0x118   :  { %v630_v43 = vmul.f32 %v3885_v20, %v2804_v58  ;;  %v3886_v45 = vmov %v3885_v20  ;;  %v636_v44 = vmul.f32 %v3887_v4, %v2804_v58  ;;  %v3888_v14 = vmov %v3887_v4  ;;  %s3912_s7 = sld [smem:[#allocation11_spill]] }
 0x119   :  { %v631_v18 = vmul.f32 %v3886_v45, %v2808_v59  ;;  %v637_v53 = vmul.f32 %v3888_v14, %v2808_v59  ;;  %v608_v54 = vadd.f32 %v604_v26, %v536_v30  ;;  %v620_v55 = vadd.f32 %v618_v29, %v547_v13  ;;  %s3913_s3 = sld [smem:[#allocation58_spill]] }
 0x11a   :  { %v621_v23 = vadd.f32 %v619_v2, %v548_v21  ;;  %v626_v38 = vadd.f32 %v624_v56, %v559_v50  ;;  %v627_v49 = vadd.f32 %v625_v7, %v560_v16  ;;  %v3893_v27 = vstv %s3883_s6  ;;  %s3918_s6 = sld [smem:[#allocation59_spill]] }
 0x11b   :  { %v654_v31 = vmul.f32 %v3893_v27, %v2804_v58  ;;  %v3894_v47 = vmov %v3893_v27  ;;  %v3895_v24 = vstv %s3884_s21  ;;  %v632_v28 = vadd.f32 %v630_v43, %v571_v42  ;;  %s3919_s21 = sld [smem:[#allocation60_spill]] }
 0x11c   :  { %v655_v1 = vmul.f32 %v3894_v47, %v2808_v59  ;;  %v666_v6 = vmul.f32 %v3895_v24, %v2804_v58  ;;  %v3896_v5 = vmov %v3895_v24  ;;  %v633_v8 = vadd.f32 %v631_v18, %v572_v22 }
 0x11d   :  { %v667_v12 = vmul.f32 %v3896_v5, %v2808_v59  ;;  %v638_v30 = vadd.f32 %v636_v44, %v583_v10  ;;  %v639_v15 = vadd.f32 %v637_v53, %v584_v41  ;;  %v3899_v34 = vstv %s3889_s23  ;;  %s3924_s23 = sld [smem:[#allocation61_spill]] }
 0x11e   :  { %v642_v35 = vmul.f32 %v3899_v34, %v2804_v58  ;;  %v3900_v37 = vmov %v3899_v34  ;;  %v3901_v0 = vstv %s3890_s19  ;;  %v3903_v16 = vstv %s3891_s1  ;;  %s3925_s19 = sld [smem:[#allocation62_spill]] }
 0x11f   :  { %v643_v11 = vmul.f32 %v3900_v37, %v2808_v59  ;;  %v648_v13 = vmul.f32 %v3901_v0, %v2804_v58  ;;  %v3902_v21 = vmov %v3901_v0  ;;  %v678_v46 = vmul.f32 %v3903_v16, %v2804_v58  ;;  %s3935_s1 = sld [smem:[#allocation64_spill]] }
 0x120   :  { %v649_v50 = vmul.f32 %v3902_v21, %v2808_v59  ;;  %v3904_v57 = vmov %v3903_v16  ;;  %v3905_v40 = vstv %s3892_s5  ;;  %v658_v22 = vrot.slane %v654_v31, 1  ;;  %s3936_s5 = sld [smem:[#allocation65_spill]] }
 0x121   :  { %v679_v36 = vmul.f32 %v3904_v57, %v2808_v59  ;;  %v690_v17 = vmul.f32 %v3905_v40, %v2804_v58  ;;  %v3906_v60 = vmov %v3905_v40  ;;  %v659_v48 = vrot.slane %v655_v1, 1 }
 0x122   :  { %v691_v42 = vmul.f32 %v3906_v60, %v2808_v59  ;;  %v670_v26 = vrot.slane %v666_v6, 1  ;;  %v671_v51 = vrot.slane %v667_v12, 1  ;;  %v3907_v29 = vstv %s3897_s25  ;;  %s3937_s25 = sld [smem:[#allocation66_spill]] }
 0x123   :  { %v702_v63 = vmul.f32 %v3907_v29, %v2804_v58  ;;  %v3908_v2 = vmov %v3907_v29  ;;  %v3909_v56 = vstv %s3898_s28  ;;  %v644_v3 = vadd.f32 %v642_v35, %v595_v33  ;;  %s3145_s28 = sld [smem:[#allocation2 + $0x45]] }
 0x124   :  { %v703_v61 = vmul.f32 %v3908_v2, %v2808_v59  ;;  %v714_v52 = vmul.f32 %v3909_v56, %v2804_v58  ;;  %v3910_v7 = vmov %v3909_v56  ;;  %v645_v10 = vadd.f32 %v643_v11, %v596_v25 }
 0x125   :  { %v715_v32 = vmul.f32 %v3910_v7, %v2808_v59  ;;  %v650_v41 = vadd.f32 %v648_v13, %v607_v62  ;;  %v651_v20 = vadd.f32 %v649_v50, %v608_v54  ;;  %v682_v43 = vrot.slane %v678_v46, 1 }
 0x126   :  { %v683_v45 = vrot.slane %v679_v36, 1  ;;  %v694_v18 = vrot.slane %v690_v17, 1  ;;  %v695_v4 = vrot.slane %v691_v42, 1  ;;  %v706_v44 = vrot.slane %v702_v63, 1 }
 0x127   :  { %v707_v14 = vrot.slane %v703_v61, 1  ;;  %v718_v53 = vrot.slane %v714_v52, 1  ;;  %v719_v27 = vrot.slane %v715_v32, 1  ;;  %v662_v31 = vadd.f32 %v658_v22, %v620_v55 }
 0x128   :  { %v663_v47 = vadd.f32 %v659_v48, %v621_v23  ;;  %v674_v33 = vadd.f32 %v670_v26, %v626_v38  ;;  %v675_v25 = vadd.f32 %v671_v51, %v627_v49  ;;  %v3914_v62 = vstv %s3911_s4  ;;  %s3159_s4 = sld [smem:[#allocation2 + $0x60]] }
 0x129   :  { %v726_v54 = vmul.f32 %v3914_v62, %v2804_v58  ;;  %v3915_v1 = vmov %v3914_v62  ;;  %v3916_v6 = vstv %s3912_s7  ;;  %v686_v55 = vadd.f32 %v682_v43, %v632_v28  ;;  %s3162_s7 = sld [smem:[#allocation2 + $0x7b]] }
 0x12a   :  { %v727_v24 = vmul.f32 %v3915_v1, %v2808_v59  ;;  %v738_v5 = vmul.f32 %v3916_v6, %v2804_v58  ;;  %v3917_v12 = vmov %v3916_v6  ;;  %v687_v23 = vadd.f32 %v683_v45, %v633_v8 }
 0x12b   :  { %v739_v34 = vmul.f32 %v3917_v12, %v2808_v59  ;;  %v698_v38 = vadd.f32 %v694_v18, %v638_v30  ;;  %v699_v49 = vadd.f32 %v695_v4, %v639_v15  ;;  %v710_v35 = vadd.f32 %v706_v44, %v644_v3 }
 0x12c   :  { %v711_v37 = vadd.f32 %v707_v14, %v645_v10  ;;  %v722_v11 = vadd.f32 %v718_v53, %v650_v41  ;;  %v723_v0 = vadd.f32 %v719_v27, %v651_v20  ;;  %v3920_v13 = vstv %s3811_s27  ;;  %s3934_s27 = sld [smem:[#allocation63_spill]] }
 0x12d   :  { %v750_v21 = vmul.f32 %v3920_v13, %v2804_v58  ;;  %v3921_v50 = vmov %v3920_v13  ;;  %v3922_v46 = vstv %s3913_s3  ;;  %v730_v30 = vrot.slane %v726_v54, 2  ;;  %s3176_s3 = sld [smem:[#allocation2 + $0x96]] }
 0x12e   :  { %v751_v16 = vmul.f32 %v3921_v50, %v2808_v59  ;;  %v762_v28 = vmul.f32 %v3922_v46, %v2804_v58  ;;  %v3923_v8 = vmov %v3922_v46  ;;  %v731_v15 = vrot.slane %v727_v24, 2 }
 0x12f   :  { %v763_v57 = vmul.f32 %v3923_v8, %v2808_v59  ;;  %v742_v36 = vrot.slane %v738_v5, 2  ;;  %v743_v40 = vrot.slane %v739_v34, 2  ;;  %v3926_v17 = vstv %s3918_s6  ;;  %s3178_s6 = sld [smem:[#allocation2 + $0x18]] }
 0x130   :  { %v774_v60 = vmul.f32 %v3926_v17, %v2804_v58  ;;  %v3927_v42 = vmov %v3926_v17  ;;  %v3928_v48 = vstv %s3919_s21  ;;  %v734_v63 = vadd.f32 %v730_v30, %v662_v31  ;;  %s3180_s21 = sld [smem:[#allocation2 + $0x33]] }
 0x131   :  { %v775_v22 = vmul.f32 %v3927_v42, %v2808_v59  ;;  %v786_v26 = vmul.f32 %v3928_v48, %v2804_v58  ;;  %v3929_v51 = vmov %v3928_v48  ;;  %v735_v2 = vadd.f32 %v731_v15, %v663_v47 }
 0x132   :  { %v787_v29 = vmul.f32 %v3929_v51, %v2808_v59  ;;  %v746_v61 = vadd.f32 %v742_v36, %v674_v33  ;;  %v747_v56 = vadd.f32 %v743_v40, %v675_v25  ;;  %v754_v52 = vrot.slane %v750_v21, 2 }
 0x133   :  { %v755_v7 = vrot.slane %v751_v16, 2  ;;  %v766_v32 = vrot.slane %v762_v28, 2  ;;  %v767_v3 = vrot.slane %v763_v57, 2  ;;  %v3930_v10 = vstv %s3924_s23  ;;  %s3194_s23 = sld [smem:[#allocation2 + $0x4e]] }
 0x134   :  { %v805_v41 = vmul.f32 %v3930_v10, %v2836_v19  ;;  %v3931_v20 = vmov %v3930_v10  ;;  %v3932_v45 = vstv %s3925_s19  ;;  %v778_v4 = vrot.slane %v774_v60, 2  ;;  %s3196_s19 = sld [smem:[#allocation2 + $0x69]] }
 0x135   :  { %v806_v43 = vmul.f32 %v3931_v20, %v2840_v39  ;;  %v811_v58 = vmul.f32 %v3932_v45, %v2836_v19  ;;  %v3933_v18 = vmov %v3932_v45  ;;  %v779_v44 = vrot.slane %v775_v22, 2 }
 0x136   :  { %v812_v59 = vmul.f32 %v3933_v18, %v2840_v39  ;;  %v790_v14 = vrot.slane %v786_v26, 2  ;;  %v791_v53 = vrot.slane %v787_v29, 2  ;;  %v758_v27 = vadd.f32 %v754_v52, %v686_v55 }
 0x137   :  { %v759_v31 = vadd.f32 %v755_v7, %v687_v23  ;;  %v770_v47 = vadd.f32 %v766_v32, %v698_v38  ;;  %v771_v33 = vadd.f32 %v767_v3, %v699_v49  ;;  %v782_v25 = vadd.f32 %v778_v4, %v710_v35 }
 0x138   :  { %v783_v62 = vadd.f32 %v779_v44, %v711_v37  ;;  %v794_v54 = vadd.f32 %v790_v14, %v722_v11  ;;  %v795_v1 = vadd.f32 %v791_v53, %v723_v0  ;;  %v807_v24 = vadd.f32 %v805_v41, %v734_v63 }
 0x139   :  { %v808_v6 = vadd.f32 %v806_v43, %v735_v2  ;;  %v813_v5 = vadd.f32 %v811_v58, %v746_v61  ;;  %v814_v12 = vadd.f32 %v812_v59, %v747_v56  ;;  %v3938_v34 = vstv %s3934_s27  ;;  %s3198_s27 = sld [smem:[#allocation2 + $0x84]] }
 0x13a   :  { %v817_v55 = vmul.f32 %v3938_v34, %v2836_v19  ;;  %v3939_v23 = vmov %v3938_v34  ;;  %v3940_v49 = vstv %s3935_s1  ;;  %v3942_v0 = vstv %s2352_s30  ;;  %s3963_s30 = sld [smem:[#allocation75_spill]] }
 0x13b   :  { %v818_v38 = vmul.f32 %v3939_v23, %v2840_v39  ;;  %v823_v35 = vmul.f32 %v3940_v49, %v2836_v19  ;;  %v3941_v37 = vmov %v3940_v49  ;;  %v829_v13 = vmul.f32 %v3942_v0, %v2836_v19  ;;  %s3200_s1 = sld [smem:[#allocation2 + $0x9f]] }
 0x13c   :  { %v824_v11 = vmul.f32 %v3941_v37, %v2840_v39  ;;  %v3943_v21 = vmov %v3942_v0  ;;  %v3944_v16 = vstv %s3936_s5  ;;  %v3946_v57 = vstv %s2374_s13  ;;  %s3011_s13 = sld [smem:[#allocation2 + $0x4d]] }
 0x13d   :  { %v830_v50 = vmul.f32 %v3943_v21, %v2840_v39  ;;  %v835_v46 = vmul.f32 %v3944_v16, %v2836_v19  ;;  %v3945_v28 = vmov %v3944_v16  ;;  %v841_v30 = vmul.f32 %v3946_v57, %v2836_v19  ;;  %s3202_s5 = sld [smem:[#allocation2 + $0x7]] }
 0x13e   :  { %v836_v8 = vmul.f32 %v3945_v28, %v2840_v39  ;;  %v3947_v15 = vmov %v3946_v57  ;;  %v3948_v40 = vstv %s3937_s25  ;;  %v3950_v22 = vstv %s3817_s26  ;;  %s3962_s26 = sld [smem:[#allocation74_spill]] }
 0x13f   :  { %v842_v36 = vmul.f32 %v3947_v15, %v2840_v39  ;;  %v853_v17 = vmul.f32 %v3948_v40, %v2836_v19  ;;  %v3949_v60 = vmov %v3948_v40  ;;  %v865_v48 = vmul.f32 %v3950_v22, %v2836_v19  ;;  %s3257_s25 = sld [smem:[#allocation2 + $0x22]] }
 0x140   :  { %v854_v42 = vmul.f32 %v3949_v60, %v2840_v39  ;;  %v3951_v26 = vmov %v3950_v22  ;;  %v3952_v29 = vstv %s3818_s18  ;;  %v819_v56 = vadd.f32 %v817_v55, %v758_v27  ;;  %s3027_s18 = sld [smem:[#allocation2 + $0x83]] }
 0x141   :  { %v866_v51 = vmul.f32 %v3951_v26, %v2840_v39  ;;  %v877_v63 = vmul.f32 %v3952_v29, %v2836_v19  ;;  %v3953_v2 = vmov %v3952_v29  ;;  %v820_v52 = vadd.f32 %v818_v38, %v759_v31 }
 0x142   :  { %v878_v61 = vmul.f32 %v3953_v2, %v2840_v39  ;;  %v825_v7 = vadd.f32 %v823_v35, %v770_v47  ;;  %v826_v32 = vadd.f32 %v824_v11, %v771_v33  ;;  %v831_v3 = vadd.f32 %v829_v13, %v782_v25 }
 0x143   :  { %v832_v10 = vadd.f32 %v830_v50, %v783_v62  ;;  %v837_v41 = vadd.f32 %v835_v46, %v794_v54  ;;  %v838_v20 = vadd.f32 %v836_v8, %v795_v1  ;;  %v845_v43 = vrot.slane %v841_v30, 1 }
 0x144   :  { %v846_v45 = vrot.slane %v842_v36, 1  ;;  %v857_v58 = vrot.slane %v853_v17, 1  ;;  %v858_v18 = vrot.slane %v854_v42, 1  ;;  %v869_v59 = vrot.slane %v865_v48, 1 }
 0x145   :  { %v870_v4 = vrot.slane %v866_v51, 1  ;;  %v881_v44 = vrot.slane %v877_v63, 1  ;;  %v882_v14 = vrot.slane %v878_v61, 1  ;;  %v3954_v53 = vstv %s3819_s17  ;;  %s3013_s17 = sld [smem:[#allocation2 + $0x68]] }
 0x146   :  { %v889_v27 = vmul.f32 %v3954_v53, %v2836_v19  ;;  %v3955_v31 = vmov %v3954_v53  ;;  %v3956_v33 = vstv %s3820_s14  ;;  %v3958_v1 = vstv %s3821_s2  ;;  %s3043_s2 = sld [smem:[#allocation2 + $0x6]]  ;;  %v984_v53 = vpop.permute.xlu0 %983 }
 0x147   :  { %v890_v47 = vmul.f32 %v3955_v31, %v2840_v39  ;;  %v901_v25 = vmul.f32 %v3956_v33, %v2836_v19  ;;  %v3957_v62 = vmov %v3956_v33  ;;  %v913_v34 = vmul.f32 %v3958_v1, %v2836_v19  ;;  %s3143_s14 = sld [smem:[#allocation2 + $0x2a]] }
 0x148   :  { %v902_v54 = vmul.f32 %v3957_v62, %v2840_v39  ;;  %v3959_v55 = vmov %v3958_v1  ;;  %v3960_v38 = vstv %s3822_s12  ;;  %v849_v11 = vadd.f32 %v845_v43, %v807_v24  ;;  %s3045_s12 = sld [smem:[#allocation2 + $0x21]] }
 0x149   :  { %v914_v23 = vmul.f32 %v3959_v55, %v2840_v39  ;;  %v925_v49 = vmul.f32 %v3960_v38, %v2836_v19  ;;  %v3961_v35 = vmov %v3960_v38  ;;  %v850_v0 = vadd.f32 %v846_v45, %v808_v6 }
 0x14a   :  { %v926_v37 = vmul.f32 %v3961_v35, %v2840_v39  ;;  %v861_v13 = vadd.f32 %v857_v58, %v813_v5  ;;  %v862_v21 = vadd.f32 %v858_v18, %v814_v12  ;;  %v873_v50 = vadd.f32 %v869_v59, %v819_v56 }
 0x14b   :  { %v874_v16 = vadd.f32 %v870_v4, %v820_v52  ;;  %v885_v46 = vadd.f32 %v881_v44, %v825_v7  ;;  %v886_v28 = vadd.f32 %v882_v14, %v826_v32  ;;  %v893_v8 = vrot.slane %v889_v27, 1  ;;  %v986_v14 = vpop.permute.xlu1 %985 }
 0x14c   :  { %v894_v57 = vrot.slane %v890_v47, 1  ;;  %v905_v30 = vrot.slane %v901_v25, 1  ;;  %v906_v15 = vrot.slane %v902_v54, 1  ;;  %v917_v24 = vrot.slane %v913_v34, 2 }
 0x14d   :  { %v918_v6 = vrot.slane %v914_v23, 2  ;;  %v929_v5 = vrot.slane %v925_v49, 2  ;;  %v930_v12 = vrot.slane %v926_v37, 2  ;;  %v3964_v36 = vstv %s3823_s22  ;;  %s3041_s22 = sld [smem:[#allocation2 + $0x9e]] }
 0x14e   :  { %v937_v40 = vmul.f32 %v3964_v36, %v2836_v19  ;;  %v3965_v17 = vmov %v3964_v36  ;;  %v3966_v42 = vstv %s3962_s26  ;;  %v3968_v51 = vstv %s3963_s30  ;;  %s3259_s26 = sld [smem:[#allocation2 + $0x3d]] }
 0x14f   :  { %v938_v60 = vmul.f32 %v3965_v17, %v2840_v39  ;;  %v949_v22 = vmul.f32 %v3966_v42, %v2836_v19  ;;  %v3967_v48 = vmov %v3966_v42  ;;  %v961_v29 = vmul.f32 %v3968_v51, %v2836_v19  ;;  %s3265_s30 = sld [smem:[#allocation2 + $0x58]] }
 0x150   :  { %v950_v26 = vmul.f32 %v3967_v48, %v2840_v39  ;;  %v3969_v63 = vmov %v3968_v51  ;;  %v3970_v61 = vstv %s3826_s20  ;;  %v897_v32 = vadd.f32 %v893_v8, %v831_v3  ;;  %s3141_s20 = sld [smem:[#allocation2 + $0xf]] }
 0x151   :  { %v962_v2 = vmul.f32 %v3969_v63, %v2840_v39  ;;  %v973_v56 = vmul.f32 %v3970_v61, %v2836_v19  ;;  %v3971_v52 = vmov %v3970_v61  ;;  %v898_v43 = vadd.f32 %v894_v57, %v832_v10 }
 0x152   :  { %v974_v7 = vmul.f32 %v3971_v52, %v2840_v39  ;;  %v909_v45 = vadd.f32 %v905_v30, %v837_v41  ;;  %v910_v58 = vadd.f32 %v906_v15, %v838_v20  ;;  %v921_v18 = vadd.f32 %v917_v24, %v849_v11 }
 0x153   :  { %v922_v59 = vadd.f32 %v918_v6, %v850_v0  ;;  %v933_v4 = vadd.f32 %v929_v5, %v861_v13  ;;  %v934_v44 = vadd.f32 %v930_v12, %v862_v21  ;;  %v941_v19 = vrot.slane %v937_v40, 2 }
 0x154   :  { %v942_v27 = vrot.slane %v938_v60, 2  ;;  %v953_v39 = vrot.slane %v949_v22, 2  ;;  %v954_v3 = vrot.slane %v950_v26, 2  ;;  %v965_v10 = vrot.slane %v961_v29, 2 }
 0x155   :  { %v966_v41 = vrot.slane %v962_v2, 2  ;;  %v977_v20 = vrot.slane %v973_v56, 2  ;;  %v978_v31 = vrot.slane %v974_v7, 2  ;;  %v945_v47 = vadd.f32 %v941_v19, %v873_v50 }
 0x156   :  { %v946_v33 = vadd.f32 %v942_v27, %v874_v16  ;;  %v3049_v25 = vsel %vm987_vm4, %v984_v53, %v986_v14  ;;  %v3053_v62 = vsel %vm987_vm4, %v986_v14, %v984_v53  ;;  %v957_v54 = vadd.f32 %v953_v39, %v885_v46 }
 0x157   :  { %v958_v1 = vadd.f32 %v954_v3, %v886_v28  ;;  %v969_v34 = vadd.f32 %v965_v10, %v897_v32  ;;  %v970_v55 = vadd.f32 %v966_v41, %v898_v43  ;;  %v3972_v23 = vstv %s3827_s0  ;;  %s3980_s0 = sld [smem:[#allocation49_spill]] }
 0x158   :  { %v992_v38 = vmul.f32 %v3972_v23, %v3049_v25  ;;  %v3973_v49 = vmov %v3972_v23  ;;  %v3974_v37 = vstv %s2460_s16  ;;  %v981_v21 = vadd.f32 %v977_v20, %v909_v45  ;;  %s3981_s16 = sld [smem:[#allocation80_spill]] }
 0x159   :  { %v993_v35 = vmul.f32 %v3973_v49, %v3053_v62  ;;  %v998_v11 = vmul.f32 %v3974_v37, %v3049_v25  ;;  %v3975_v0 = vmov %v3974_v37  ;;  %v982_v50 = vadd.f32 %v978_v31, %v910_v58 }
 0x15a   :  { %v999_v13 = vmul.f32 %v3975_v0, %v3053_v62  ;;  %v1123_v16 = vstv %s3011_s13  ;;  %v1135_v46 = vstv %s3013_s17  ;;  %v3976_v28 = vstv %s3829_s10  ;;  %s3123_s10 = sld [smem:[#allocation2 + $0x57]] }
 0x15b   :  { %v1004_v8 = vmul.f32 %v3976_v28, %v3049_v25  ;;  %v3977_v57 = vmov %v3976_v28  ;;  %v3978_v15 = vstv %s3830_s9  ;;  %v1147_v12 = vstv %s3027_s18  ;;  %s3988_s9 = sld [smem:[#allocation57_spill]] }
 0x15c   :  { %v1005_v30 = vmul.f32 %v3977_v57, %v3053_v62  ;;  %v1010_v24 = vmul.f32 %v3978_v15, %v3049_v25  ;;  %v3979_v6 = vmov %v3978_v15  ;;  %v1159_v36 = vstv %s3041_s22  ;;  %s3267_s13 = sld [smem:[#allocation2 + $0x73]] }
 0x15d   :  { %v1011_v5 = vmul.f32 %v3979_v6, %v3053_v62  ;;  %v1178_v40 = vstv %s3043_s2  ;;  %v1184_v17 = vstv %s3045_s12  ;;  %v994_v60 = vadd.f32 %v992_v38, %v921_v18  ;;  %s3269_s17 = sld [smem:[#allocation2 + $0x8e]] }
 0x15e   :  { %v995_v42 = vadd.f32 %v993_v35, %v922_v59  ;;  %v1000_v22 = vadd.f32 %v998_v11, %v933_v4  ;;  %v1001_v48 = vadd.f32 %v999_v13, %v934_v44  ;;  %v3982_v26 = vstv %s2491_s8  ;;  %s3121_s8 = sld [smem:[#allocation2 + $0x3c]] }
 0x15f   :  { %v1028_v51 = vmul.f32 %v3982_v26, %v3049_v25  ;;  %v3983_v29 = vmov %v3982_v26  ;;  %v3984_v2 = vstv %s2497_s15  ;;  %v1006_v7 = vadd.f32 %v1004_v8, %v945_v47  ;;  %s3999_s15 = sld [smem:[#allocation67_spill]] }
 0x160   :  { %v1029_v63 = vmul.f32 %v3983_v29, %v3053_v62  ;;  %v1040_v61 = vmul.f32 %v3984_v2, %v3049_v25  ;;  %v3985_v56 = vmov %v3984_v2  ;;  %v1007_v32 = vadd.f32 %v1005_v30, %v946_v33  ;;  %s3271_s18 = sld [smem:[#allocation2 + $0x10]] }
 0x161   :  { %v1041_v52 = vmul.f32 %v3985_v56, %v3053_v62  ;;  %v1012_v43 = vadd.f32 %v1010_v24, %v957_v54  ;;  %v1013_v45 = vadd.f32 %v1011_v5, %v958_v1  ;;  %v3986_v58 = vstv %s3980_s0  ;;  %s3276_s22 = sld [smem:[#allocation2 + $0x2b]] }
 0x162   :  { %v1016_v18 = vmul.f32 %v3986_v58, %v3049_v25  ;;  %v3987_v59 = vmov %v3986_v58  ;;  %v3989_v44 = vstv %s3981_s16  ;;  %v3991_v27 = vstv %s2503_s24  ;;  %s3137_s24 = sld [smem:[#allocation2 + $0x72]] }
 0x163   :  { %v1017_v4 = vmul.f32 %v3987_v59, %v3053_v62  ;;  %v1022_v14 = vmul.f32 %v3989_v44, %v3049_v25  ;;  %v3990_v53 = vmov %v3989_v44  ;;  %v1052_v39 = vmul.f32 %v3991_v27, %v3049_v25  ;;  %s3287_s2 = sld [smem:[#allocation2 + $0x46]] }
 0x164   :  { %v1023_v19 = vmul.f32 %v3990_v53, %v3053_v62  ;;  %v3992_v3 = vmov %v3991_v27  ;;  %v3993_v41 = vstv %s2509_s29  ;;  %v1032_v33 = vrot.slane %v1028_v51, 1  ;;  %s3139_s29 = sld [smem:[#allocation2 + $0x8d]] }
 0x165   :  { %v1053_v10 = vmul.f32 %v3992_v3, %v3053_v62  ;;  %v1064_v20 = vmul.f32 %v3993_v41, %v3049_v25  ;;  %v3994_v31 = vmov %v3993_v41  ;;  %v1033_v54 = vrot.slane %v1029_v63, 1  ;;  %s3293_s12 = sld [smem:[#allocation2 + $0x61]] }
 0x166   :  { %v1065_v47 = vmul.f32 %v3994_v31, %v3053_v62  ;;  %v1044_v1 = vrot.slane %v1040_v61, 1  ;;  %v1045_v23 = vrot.slane %v1041_v52, 1  ;;  %v3995_v38 = vstv %s2516_s11  ;;  %s4000_s11 = sld [smem:[#allocation68_spill]] }
 0x167   :  { %v1076_v49 = vmul.f32 %v3995_v38, %v3049_v25  ;;  %v3996_v35 = vmov %v3995_v38  ;;  %v3997_v11 = vstv %s3988_s9  ;;  %v1018_v8 = vadd.f32 %v1016_v18, %v969_v34  ;;  %s3304_s0 = sld [smem:[#allocation2 + $0x7c]] }
 0x168   :  { %v1077_v37 = vmul.f32 %v3996_v35, %v3053_v62  ;;  %v1088_v0 = vmul.f32 %v3997_v11, %v3049_v25  ;;  %v3998_v13 = vmov %v3997_v11  ;;  %v1019_v57 = vadd.f32 %v1017_v4, %v970_v55  ;;  %s3306_s16 = sld [smem:[#allocation2 + $0x97]] }
 0x169   :  { %v1089_v28 = vmul.f32 %v3998_v13, %v3053_v62  ;;  %v1024_v30 = vadd.f32 %v1022_v14, %v981_v21  ;;  %v1025_v15 = vadd.f32 %v1023_v19, %v982_v50  ;;  %v1056_v24 = vrot.slane %v1052_v39, 1  ;;  %s3311_s9 = sld [smem:[#allocation2 + $0x19]] }
 0x16a   :  { %v1057_v6 = vrot.slane %v1053_v10, 1  ;;  %v1068_v5 = vrot.slane %v1064_v20, 1  ;;  %v1069_v26 = vrot.slane %v1065_v47, 1  ;;  %v1036_v51 = vadd.f32 %v1032_v33, %v994_v60 }
 0x16b   :  { %v1037_v29 = vadd.f32 %v1033_v54, %v995_v42  ;;  %v1048_v63 = vadd.f32 %v1044_v1, %v1000_v22  ;;  %v1049_v2 = vadd.f32 %v1045_v23, %v1001_v48  ;;  %v1080_v34 = vrot.slane %v1076_v49, 1 }
 0x16c   :  { %v1081_v55 = vrot.slane %v1077_v37, 1  ;;  %v1092_v21 = vrot.slane %v1088_v0, 1  ;;  %v1093_v50 = vrot.slane %v1089_v28, 1  ;;  %v4001_v61 = vstv %s3999_s15  ;;  %v1173_v28 = vpop.permute.xlu1 %1172  ;;  %s3331_s15 = sld [smem:[#allocation2 + $0xa0]] }
 0x16d   :  { %v1100_v56 = vmul.f32 %v4001_v61, %v3049_v25  ;;  %v4002_v60 = vmov %v4001_v61  ;;  %v4003_v22 = vstv %s4000_s11  ;;  %v1060_v18 = vadd.f32 %v1056_v24, %v1006_v7  ;;  %s3375_s11 = sld [smem:[#allocation2 + $0x8]] }
 0x16e   :  { %v1101_v42 = vmul.f32 %v4002_v60, %v3053_v62  ;;  %v1112_v48 = vmul.f32 %v4003_v22, %v3049_v25  ;;  %v4004_v52 = vmov %v4003_v22  ;;  %v1061_v59 = vadd.f32 %v1057_v6, %v1007_v32 }
 0x16f   :  { %v1113_v58 = vmul.f32 %v4004_v52, %v3053_v62  ;;  %v1072_v4 = vadd.f32 %v1068_v5, %v1012_v43  ;;  %v1073_v44 = vadd.f32 %v1069_v26, %v1013_v45  ;;  %v1124_v14 = vmul.f32 %v1123_v16, %v3049_v25 }
 0x170   :  { %v1125_v53 = vmul.f32 %v1123_v16, %v3053_v62  ;;  %v1136_v19 = vmul.f32 %v1135_v46, %v3049_v25  ;;  %v1137_v7 = vmul.f32 %v1135_v46, %v3053_v62  ;;  %v1084_v32 = vadd.f32 %v1080_v34, %v1018_v8  ;;  %v1171_v8 = vpop.permute.xlu0 %1170 }
 0x171   :  { %v1085_v43 = vadd.f32 %v1081_v55, %v1019_v57  ;;  %v1096_v45 = vadd.f32 %v1092_v21, %v1024_v30  ;;  %v1097_v27 = vadd.f32 %v1093_v50, %v1025_v15  ;;  %v1104_v39 = vrot.slane %v1100_v56, 2 }
 0x172   :  { %v1105_v3 = vrot.slane %v1101_v42, 2  ;;  %v1116_v10 = vrot.slane %v1112_v48, 2  ;;  %v1117_v16 = vrot.slane %v1113_v58, 2  ;;  %v1148_v41 = vmul.f32 %v1147_v12, %v3049_v25 }
 0x173   :  { %v1149_v46 = vmul.f32 %v1147_v12, %v3053_v62  ;;  %v1160_v20 = vmul.f32 %v1159_v36, %v3049_v25  ;;  %v1161_v31 = vmul.f32 %v1159_v36, %v3053_v62  ;;  %v1128_v47 = vrot.slane %v1124_v14, 2 }
 0x174   :  { %v1129_v33 = vrot.slane %v1125_v53, 2  ;;  %v1140_v54 = vrot.slane %v1136_v19, 2  ;;  %v1141_v1 = vrot.slane %v1137_v7, 2  ;;  %v1108_v23 = vadd.f32 %v1104_v39, %v1036_v51 }
 0x175   :  { %v1109_v38 = vadd.f32 %v1105_v3, %v1037_v29  ;;  %v1120_v49 = vadd.f32 %v1116_v10, %v1048_v63  ;;  %v1121_v12 = vadd.f32 %v1117_v16, %v1049_v2  ;;  %v1132_v25 = vadd.f32 %v1128_v47, %v1060_v18 }
 0x176   :  { %v1133_v62 = vadd.f32 %v1129_v33, %v1061_v59  ;;  %v1144_v36 = vadd.f32 %v1140_v54, %v1072_v4  ;;  %v1145_v35 = vadd.f32 %v1141_v1, %v1073_v44  ;;  %v1152_v37 = vrot.slane %v1148_v41, 2 }
 0x177   :  { %v1153_v11 = vrot.slane %v1149_v46, 2  ;;  %v1164_v0 = vrot.slane %v1160_v20, 2  ;;  %v1165_v13 = vrot.slane %v1161_v31, 2  ;;  %v1190_v57 = vstv %s3121_s8  ;;  %s3322_s8 = sld [smem:[#allocation2 + $0x34]] }
 0x178   :  { %v1196_v30 = vstv %s3123_s10  ;;  %v1202_v15 = vstv %s3137_s24  ;;  %v1208_v24 = vstv %s3139_s29  ;;  %v1156_v6 = vadd.f32 %v1152_v37, %v1084_v32  ;;  %s3324_s10 = sld [smem:[#allocation2 + $0x4f]] }
 0x179   :  { %v1157_v5 = vadd.f32 %v1153_v11, %v1085_v43  ;;  %v1168_v26 = vadd.f32 %v1164_v0, %v1096_v45  ;;  %v1169_v51 = vadd.f32 %v1165_v13, %v1097_v27  ;;  %v1214_v29 = vstv %s3141_s20  ;;  %s3326_s24 = sld [smem:[#allocation2 + $0x6a]] }
 0x17a   :  { %v1226_v63 = vstv %s3143_s14  ;;  %v3212_v2 = vsel %vm1174_vm5, %v1171_v8, %v1173_v28  ;;  %v3216_v34 = vsel %vm1174_vm5, %v1173_v28, %v1171_v8  ;;  %v1238_v55 = vstv %s3145_s28  ;;  %s3328_s29 = sld [smem:[#allocation2 + $0x85]] }
 0x17b   :  { %v1250_v21 = vstv %s3159_s4  ;;  %v1262_v50 = vstv %s3162_s7  ;;  %v1179_v61 = vmul.f32 %v1178_v40, %v3212_v2  ;;  %v1274_v56 = vstv %s3176_s3  ;;  %s3381_s20 = sld [smem:[#allocation2 + $0x23]] }
 0x17c   :  { %v1180_v60 = vmul.f32 %v1178_v40, %v3216_v34  ;;  %v1185_v42 = vmul.f32 %v1184_v17, %v3212_v2  ;;  %v1186_v22 = vmul.f32 %v1184_v17, %v3216_v34  ;;  %v1286_v48 = vstv %s3178_s6  ;;  %s3385_s14 = sld [smem:[#allocation2 + $0x3e]] }
 0x17d   :  { %v1298_v52 = vstv %s3180_s21  ;;  %v1310_v58 = vstv %s3194_s23  ;;  %v1322_v18 = vstv %s3196_s19  ;;  %v1191_v59 = vmul.f32 %v1190_v57, %v3212_v2  ;;  %s3387_s28 = sld [smem:[#allocation2 + $0x59]] }
 0x17e   :  { %v1192_v4 = vmul.f32 %v1190_v57, %v3216_v34  ;;  %v1197_v44 = vmul.f32 %v1196_v30, %v3212_v2  ;;  %v1198_v14 = vmul.f32 %v1196_v30, %v3216_v34  ;;  %v1334_v53 = vstv %s3198_s27  ;;  %s3393_s4 = sld [smem:[#allocation2 + $0x74]] }
 0x17f   :  { %v1346_v40 = vstv %s3200_s1  ;;  %v1181_v19 = vadd.f32 %v1179_v61, %v1108_v23  ;;  %v1365_v7 = vstv %s3202_s5  ;;  %v1182_v32 = vadd.f32 %v1180_v60, %v1109_v38  ;;  %s3395_s7 = sld [smem:[#allocation2 + $0x8f]] }
 0x180   :  { %v1187_v43 = vadd.f32 %v1185_v42, %v1120_v49  ;;  %v1188_v45 = vadd.f32 %v1186_v22, %v1121_v12  ;;  %v1215_v17 = vmul.f32 %v1214_v29, %v3212_v2  ;;  %v1203_v27 = vmul.f32 %v1202_v15, %v3212_v2  ;;  %s3397_s3 = sld [smem:[#allocation2 + $0x11]] }
 0x181   :  { %v1216_v39 = vmul.f32 %v1214_v29, %v3216_v34  ;;  %v1227_v3 = vmul.f32 %v1226_v63, %v3212_v2  ;;  %v1228_v10 = vmul.f32 %v1226_v63, %v3216_v34  ;;  %v1193_v16 = vadd.f32 %v1191_v59, %v1132_v25  ;;  %s3399_s6 = sld [smem:[#allocation2 + $0x2c]] }
 0x182   :  { %v1194_v41 = vadd.f32 %v1192_v4, %v1133_v62  ;;  %v1199_v46 = vadd.f32 %v1197_v44, %v1144_v36  ;;  %v1200_v20 = vadd.f32 %v1198_v14, %v1145_v35  ;;  %v1204_v31 = vmul.f32 %v1202_v15, %v3216_v34  ;;  %s3407_s21 = sld [smem:[#allocation2 + $0x47]] }
 0x183   :  { %v1209_v47 = vmul.f32 %v1208_v24, %v3212_v2  ;;  %v1210_v33 = vmul.f32 %v1208_v24, %v3216_v34  ;;  %v1239_v54 = vmul.f32 %v1238_v55, %v3212_v2  ;;  %v1219_v1 = vrot.slane %v1215_v17, 1  ;;  %s3415_s23 = sld [smem:[#allocation2 + $0x62]] }
 0x184   :  { %v1240_v23 = vmul.f32 %v1238_v55, %v3216_v34  ;;  %v1251_v38 = vmul.f32 %v1250_v21, %v3212_v2  ;;  %v1252_v49 = vmul.f32 %v1250_v21, %v3216_v34  ;;  %v1205_v12 = vadd.f32 %v1203_v27, %v1156_v6  ;;  %s3423_s19 = sld [smem:[#allocation2 + $0x7d]] }
 0x185   :  { %v1220_v25 = vrot.slane %v1216_v39, 1  ;;  %v1231_v62 = vrot.slane %v1227_v3, 1  ;;  %v1232_v36 = vrot.slane %v1228_v10, 1  ;;  %v1263_v35 = vmul.f32 %v1262_v50, %v3212_v2  ;;  %s3431_s27 = sld [smem:[#allocation2 + $0x98]] }
 0x186   :  { %v1264_v37 = vmul.f32 %v1262_v50, %v3216_v34  ;;  %v1275_v11 = vmul.f32 %v1274_v56, %v3212_v2  ;;  %v1276_v0 = vmul.f32 %v1274_v56, %v3216_v34  ;;  %v1206_v13 = vadd.f32 %v1204_v31, %v1157_v5  ;;  %s3434_s1 = sld [smem:[#allocation2 + $0x1a]] }
 0x187   :  { %v1211_v28 = vadd.f32 %v1209_v47, %v1168_v26  ;;  %v1212_v8 = vadd.f32 %v1210_v33, %v1169_v51  ;;  %v1243_v57 = vrot.slane %v1239_v54, 1  ;;  %v1223_v30 = vadd.f32 %v1219_v1, %v1181_v19  ;;  %s3442_s5 = sld [smem:[#allocation2 + $0x35]] }
 0x188   :  { %v1244_v15 = vrot.slane %v1240_v23, 1  ;;  %v1255_v24 = vrot.slane %v1251_v38, 1  ;;  %v1256_v6 = vrot.slane %v1252_v49, 1  ;;  %v1224_v29 = vadd.f32 %v1220_v25, %v1182_v32  ;;  %v1360_v25 = vpop.permute.xlu1 %1359 }
 0x189   :  { %v1235_v63 = vadd.f32 %v1231_v62, %v1187_v43  ;;  %v1236_v55 = vadd.f32 %v1232_v36, %v1188_v45  ;;  %v1267_v5 = vrot.slane %v1263_v35, 1  ;;  %v1268_v26 = vrot.slane %v1264_v37, 1  ;;  %v1358_v36 = vpop.permute.xlu0 %1357 }
 0x18a   :  { %v1279_v51 = vrot.slane %v1275_v11, 1  ;;  %v1280_v21 = vrot.slane %v1276_v0, 1  ;;  %v1287_v50 = vmul.f32 %v1286_v48, %v3212_v2  ;;  %v1247_v61 = vadd.f32 %v1243_v57, %v1193_v16 }
 0x18b   :  { %v1288_v56 = vmul.f32 %v1286_v48, %v3216_v34  ;;  %v1299_v60 = vmul.f32 %v1298_v52, %v3212_v2  ;;  %v1300_v42 = vmul.f32 %v1298_v52, %v3216_v34  ;;  %v1248_v22 = vadd.f32 %v1244_v15, %v1194_v41 }
 0x18c   :  { %v1259_v59 = vadd.f32 %v1255_v24, %v1199_v46  ;;  %v1260_v4 = vadd.f32 %v1256_v6, %v1200_v20  ;;  %v1311_v44 = vmul.f32 %v1310_v58, %v3212_v2  ;;  %v1271_v48 = vadd.f32 %v1267_v5, %v1205_v12 }
 0x18d   :  { %v1312_v14 = vmul.f32 %v1310_v58, %v3216_v34  ;;  %v1323_v52 = vmul.f32 %v1322_v18, %v3212_v2  ;;  %v1324_v19 = vmul.f32 %v1322_v18, %v3216_v34  ;;  %v1272_v32 = vadd.f32 %v1268_v26, %v1206_v13 }
 0x18e   :  { %v1283_v43 = vadd.f32 %v1279_v51, %v1211_v28  ;;  %v1284_v45 = vadd.f32 %v1280_v21, %v1212_v8  ;;  %v1291_v17 = vrot.slane %v1287_v50, 2  ;;  %v1292_v27 = vrot.slane %v1288_v56, 2 }
 0x18f   :  { %v1303_v39 = vrot.slane %v1299_v60, 2  ;;  %v1304_v3 = vrot.slane %v1300_v42, 2  ;;  %v1335_v58 = vmul.f32 %v1334_v53, %v3212_v2  ;;  %v1315_v10 = vrot.slane %v1311_v44, 2 }
 0x190   :  { %v1336_v18 = vmul.f32 %v1334_v53, %v3216_v34  ;;  %v1347_v16 = vmul.f32 %v1346_v40, %v3212_v2  ;;  %v1348_v41 = vmul.f32 %v1346_v40, %v3216_v34  ;;  %v1295_v46 = vadd.f32 %v1291_v17, %v1223_v30 }
 0x191   :  { %v1316_v20 = vrot.slane %v1312_v14, 2  ;;  %v1327_v31 = vrot.slane %v1323_v52, 2  ;;  %v1328_v47 = vrot.slane %v1324_v19, 2  ;;  %v1296_v33 = vadd.f32 %v1292_v27, %v1224_v29 }
 0x192   :  { %v1307_v54 = vadd.f32 %v1303_v39, %v1235_v63  ;;  %v1308_v1 = vadd.f32 %v1304_v3, %v1236_v55  ;;  %v1319_v53 = vadd.f32 %v1315_v10, %v1247_v61  ;;  %v1339_v23 = vrot.slane %v1335_v58, 2 }
 0x193   :  { %v1320_v2 = vadd.f32 %v1316_v20, %v1248_v22  ;;  %v1331_v34 = vadd.f32 %v1327_v31, %v1259_v59  ;;  %v1332_v40 = vadd.f32 %v1328_v47, %v1260_v4  ;;  %v1340_v38 = vrot.slane %v1336_v18, 2 }
 0x194   :  { %v1351_v49 = vrot.slane %v1347_v16, 2  ;;  %v1352_v12 = vrot.slane %v1348_v41, 2  ;;  %v1371_v62 = vstv %s3257_s25  ;;  %v1343_v35 = vadd.f32 %v1339_v23, %v1271_v48  ;;  %s3450_s25 = sld [smem:[#allocation2 + $0x50]] }
 0x195   :  { %v1377_v37 = vstv %s3259_s26  ;;  %v1383_v11 = vstv %s3265_s30  ;;  %v1389_v0 = vstv %s3267_s13  ;;  %v1344_v13 = vadd.f32 %v1340_v38, %v1272_v32  ;;  %s3452_s26 = sld [smem:[#allocation2 + $0x6b]] }
 0x196   :  { %v1355_v28 = vadd.f32 %v1351_v49, %v1283_v43  ;;  %v1356_v8 = vadd.f32 %v1352_v12, %v1284_v45  ;;  %v1395_v57 = vstv %s3269_s17  ;;  %v1401_v30 = vstv %s3271_s18  ;;  %s3454_s30 = sld [smem:[#allocation2 + $0x86]] }
 0x197   :  { %v1413_v15 = vstv %s3276_s22  ;;  %v3341_v24 = vsel %vm1361_vm6, %v1358_v36, %v1360_v25  ;;  %v3345_v6 = vsel %vm1361_vm6, %v1360_v25, %v1358_v36  ;;  %v1425_v29 = vstv %s3287_s2  ;;  %s3456_s13 = sld [smem:[#allocation2 + $0xa1]] }
 0x198   :  { %v1437_v63 = vstv %s3293_s12  ;;  %v1366_v55 = vmul.f32 %v1365_v7, %v3341_v24  ;;  %v1367_v5 = vmul.f32 %v1365_v7, %v3345_v6  ;;  %v1449_v26 = vstv %s3304_s0  ;;  %s4005_s22 = sld [smem:[#allocation81_spill]] }
 0x199   :  { %v1461_v51 = vstv %s3306_s16  ;;  %v1372_v21 = vmul.f32 %v1371_v62, %v3341_v24  ;;  %v1373_v50 = vmul.f32 %v1371_v62, %v3345_v6  ;;  %v1473_v61 = vstv %s3311_s9 }
 0x19a   :  { %v1485_v56 = vstv %s3322_s8  ;;  %v1497_v60 = vstv %s3324_s10  ;;  %v1509_v42 = vstv %s3326_s24  ;;  %v1378_v22 = vmul.f32 %v1377_v37, %v3341_v24 }
 0x19b   :  { %v1379_v59 = vmul.f32 %v1377_v37, %v3345_v6  ;;  %v1384_v4 = vmul.f32 %v1383_v11, %v3341_v24  ;;  %v1385_v44 = vmul.f32 %v1383_v11, %v3345_v6  ;;  %v1521_v48 = vstv %s3328_s29 }
 0x19c   :  { %v1533_v7 = vstv %s3331_s15  ;;  %v1368_v14 = vadd.f32 %v1366_v55, %v1295_v46  ;;  %v1369_v52 = vadd.f32 %v1367_v5, %v1296_v33  ;;  %v1374_v19 = vadd.f32 %v1372_v21, %v1307_v54 }
 0x19d   :  { %v1375_v32 = vadd.f32 %v1373_v50, %v1308_v1  ;;  %v1402_v43 = vmul.f32 %v1401_v30, %v3341_v24  ;;  %v1403_v45 = vmul.f32 %v1401_v30, %v3345_v6  ;;  %v1390_v17 = vmul.f32 %v1389_v0, %v3341_v24 }
 0x19e   :  { %v1391_v27 = vmul.f32 %v1389_v0, %v3345_v6  ;;  %v1414_v39 = vmul.f32 %v1413_v15, %v3341_v24  ;;  %v1415_v3 = vmul.f32 %v1413_v15, %v3345_v6  ;;  %v1380_v58 = vadd.f32 %v1378_v22, %v1319_v53 }
 0x19f   :  { %v1381_v10 = vadd.f32 %v1379_v59, %v1320_v2  ;;  %v1386_v18 = vadd.f32 %v1384_v4, %v1331_v34  ;;  %v1387_v16 = vadd.f32 %v1385_v44, %v1332_v40  ;;  %v1396_v41 = vmul.f32 %v1395_v57, %v3341_v24 }
 0x1a0   :  { %v1397_v46 = vmul.f32 %v1395_v57, %v3345_v6  ;;  %v1426_v20 = vmul.f32 %v1425_v29, %v3341_v24  ;;  %v1427_v31 = vmul.f32 %v1425_v29, %v3345_v6  ;;  %v1406_v47 = vrot.slane %v1402_v43, 1 }
 0x1a1   :  { %v1407_v33 = vrot.slane %v1403_v45, 1  ;;  %v1438_v54 = vmul.f32 %v1437_v63, %v3341_v24  ;;  %v1439_v1 = vmul.f32 %v1437_v63, %v3345_v6  ;;  %v1392_v53 = vadd.f32 %v1390_v17, %v1343_v35 }
 0x1a2   :  { %v1393_v2 = vadd.f32 %v1391_v27, %v1344_v13  ;;  %v1418_v34 = vrot.slane %v1414_v39, 1  ;;  %v1419_v40 = vrot.slane %v1415_v3, 1  ;;  %v1450_v23 = vmul.f32 %v1449_v26, %v3341_v24 }
 0x1a3   :  { %v1451_v38 = vmul.f32 %v1449_v26, %v3345_v6  ;;  %v1462_v49 = vmul.f32 %v1461_v51, %v3341_v24  ;;  %v1463_v12 = vmul.f32 %v1461_v51, %v3345_v6  ;;  %v1398_v25 = vadd.f32 %v1396_v41, %v1355_v28 }
 0x1a4   :  { %v1399_v62 = vadd.f32 %v1397_v46, %v1356_v8  ;;  %v1430_v36 = vrot.slane %v1426_v20, 1  ;;  %v1431_v35 = vrot.slane %v1427_v31, 1  ;;  %v1410_v37 = vadd.f32 %v1406_v47, %v1368_v14 }
 0x1a5   :  { %v1411_v11 = vadd.f32 %v1407_v33, %v1369_v52  ;;  %v1442_v0 = vrot.slane %v1438_v54, 1  ;;  %v1443_v13 = vrot.slane %v1439_v1, 1  ;;  %v1422_v57 = vadd.f32 %v1418_v34, %v1374_v19 }
 0x1a6   :  { %v1423_v30 = vadd.f32 %v1419_v40, %v1375_v32  ;;  %v1454_v15 = vrot.slane %v1450_v23, 1  ;;  %v1455_v28 = vrot.slane %v1451_v38, 1  ;;  %v1466_v8 = vrot.slane %v1462_v49, 1 }
 0x1a7   :  { %v1467_v29 = vrot.slane %v1463_v12, 1  ;;  %v1474_v63 = vmul.f32 %v1473_v61, %v3341_v24  ;;  %v1475_v55 = vmul.f32 %v1473_v61, %v3345_v6  ;;  %v1434_v5 = vadd.f32 %v1430_v36, %v1380_v58  ;;  %v1547_v12 = vpop.permute.xlu1 %1546  ;;  %v1545_v36 = vpop.permute.xlu0 %1544 }
 0x1a8   :  { %v1435_v26 = vadd.f32 %v1431_v35, %v1381_v10  ;;  %v1486_v51 = vmul.f32 %v1485_v56, %v3341_v24  ;;  %v1487_v21 = vmul.f32 %v1485_v56, %v3345_v6  ;;  %v1446_v50 = vadd.f32 %v1442_v0, %v1386_v18 }
 0x1a9   :  { %v1447_v22 = vadd.f32 %v1443_v13, %v1387_v16  ;;  %v1498_v59 = vmul.f32 %v1497_v60, %v3341_v24  ;;  %v1499_v61 = vmul.f32 %v1497_v60, %v3345_v6  ;;  %v1458_v4 = vadd.f32 %v1454_v15, %v1392_v53 }
 0x1aa   :  { %v1459_v44 = vadd.f32 %v1455_v28, %v1393_v2  ;;  %v1510_v14 = vmul.f32 %v1509_v42, %v3341_v24  ;;  %v1511_v56 = vmul.f32 %v1509_v42, %v3345_v6  ;;  %v1470_v52 = vadd.f32 %v1466_v8, %v1398_v25 }
 0x1ab   :  { %v1471_v19 = vadd.f32 %v1467_v29, %v1399_v62  ;;  %v1478_v32 = vrot.slane %v1474_v63, 2  ;;  %v1479_v43 = vrot.slane %v1475_v55, 2  ;;  %v1490_v60 = vrot.slane %v1486_v51, 2 }
 0x1ac   :  { %v1491_v45 = vrot.slane %v1487_v21, 2  ;;  %v1522_v17 = vmul.f32 %v1521_v48, %v3341_v24  ;;  %v1523_v27 = vmul.f32 %v1521_v48, %v3345_v6  ;;  %v1502_v42 = vrot.slane %v1498_v59, 2 }
 0x1ad   :  { %v1503_v39 = vrot.slane %v1499_v61, 2  ;;  %v1534_v3 = vmul.f32 %v1533_v7, %v3341_v24  ;;  %v1535_v58 = vmul.f32 %v1533_v7, %v3345_v6  ;;  %v1482_v10 = vadd.f32 %v1478_v32, %v1410_v37 }
 0x1ae   :  { %v1483_v18 = vadd.f32 %v1479_v43, %v1411_v11  ;;  %v1514_v16 = vrot.slane %v1510_v14, 2  ;;  %v1515_v41 = vrot.slane %v1511_v56, 2  ;;  %v1494_v48 = vadd.f32 %v1490_v60, %v1422_v57 }
 0x1af   :  { %v1495_v46 = vadd.f32 %v1491_v45, %v1423_v30  ;;  %v1506_v20 = vadd.f32 %v1502_v42, %v1434_v5  ;;  %v1507_v31 = vadd.f32 %v1503_v39, %v1435_v26  ;;  %v1526_v7 = vrot.slane %v1522_v17, 2 }
 0x1b0   :  { %v1518_v24 = vadd.f32 %v1514_v16, %v1446_v50  ;;  %v1519_v6 = vadd.f32 %v1515_v41, %v1447_v22  ;;  %v1527_v47 = vrot.slane %v1523_v27, 2  ;;  %v1538_v33 = vrot.slane %v1534_v3, 2 }
 0x1b1   :  { %v1539_v54 = vrot.slane %v1535_v58, 2  ;;  %v1552_v1 = vstv %s3375_s11  ;;  %v1558_v53 = vstv %s3381_s20  ;;  %v1530_v2 = vadd.f32 %v1526_v7, %v1458_v4 }
 0x1b2   :  { %v1531_v34 = vadd.f32 %v1527_v47, %v1459_v44  ;;  %v1564_v40 = vstv %s3385_s14  ;;  %v1570_v23 = vstv %s3387_s28  ;;  %v1542_v38 = vadd.f32 %v1538_v33, %v1470_v52 }
 0x1b3   :  { %v1543_v49 = vadd.f32 %v1539_v54, %v1471_v19  ;;  %v1576_v25 = vstv %s3393_s4  ;;  %v1582_v62 = vstv %s3395_s7  ;;  %v1588_v35 = vstv %s3397_s3 }
 0x1b4   :  { %v1600_v37 = vstv %s3399_s6  ;;  %v1612_v11 = vstv %s3407_s21  ;;  %v1624_v0 = vstv %s3415_s23  ;;  %v1636_v13 = vstv %s3423_s19 }
 0x1b5   :  { %v1648_v57 = vstv %s3431_s27  ;;  %v1660_v30 = vstv %s3434_s1  ;;  %v1672_v15 = vstv %s3442_s5  ;;  %v1684_v28 = vstv %s3450_s25 }
 0x1b6   :  { %v1696_v8 = vstv %s3452_s26  ;;  %v3476_v29 = vsel %vm1548_vm7, %v1545_v36, %v1547_v12  ;;  %v3480_v63 = vsel %vm1548_vm7, %v1547_v12, %v1545_v36  ;;  %v1708_v21 = vstv %s3454_s30 }
 0x1b7   :  { %v1553_v55 = vmul.f32 %v1552_v1, %v3476_v29  ;;  %v1554_v5 = vmul.f32 %v1552_v1, %v3480_v63  ;;  %v1559_v26 = vmul.f32 %v1558_v53, %v3476_v29  ;;  %v1560_v51 = vmul.f32 %v1558_v53, %v3480_v63 }
 0x1b8   :  { %v1720_v50 = vstv %s3456_s13  ;;  %v1565_v22 = vmul.f32 %v1564_v40, %v3476_v29  ;;  %v1566_v59 = vmul.f32 %v1564_v40, %v3480_v63  ;;  %v1571_v9 = vmul.f32 %v1570_v23, %v3476_v29 }
 0x1b9   :  { %v1555_v61 = vadd.f32 %v1553_v55, %v1482_v10  ;;  %v1556_v4 = vadd.f32 %v1554_v5, %v1483_v18  ;;  %v1572_v44 = vmul.f32 %v1570_v23, %v3480_v63  ;;  %v1561_v14 = vadd.f32 %v1559_v26, %v1494_v48 }
 0x1ba   :  { %v1562_v56 = vadd.f32 %v1560_v51, %v1495_v46  ;;  %v1567_v52 = vadd.f32 %v1565_v22, %v1506_v20  ;;  %v1568_v19 = vadd.f32 %v1566_v59, %v1507_v31  ;;  %v1577_v32 = vmul.f32 %v1576_v25, %v3476_v29 }
 0x1bb   :  { %v1578_v43 = vmul.f32 %v1576_v25, %v3480_v63  ;;  %v1583_v60 = vmul.f32 %v1582_v62, %v3476_v29  ;;  %v1584_v45 = vmul.f32 %v1582_v62, %v3480_v63  ;;  %v1589_v17 = vmul.f32 %v1588_v35, %v3476_v29 }
 0x1bc   :  { %v1590_v27 = vmul.f32 %v1588_v35, %v3480_v63  ;;  %v1601_v42 = vmul.f32 %v1600_v37, %v3476_v29  ;;  %v1602_v39 = vmul.f32 %v1600_v37, %v3480_v63  ;;  %v1573_v3 = vadd.f32 %v1571_v9, %v1518_v24 }
 0x1bd   :  { %v1574_v58 = vadd.f32 %v1572_v44, %v1519_v6  ;;  %v1579_v10 = vadd.f32 %v1577_v32, %v1530_v2  ;;  %v1580_v18 = vadd.f32 %v1578_v43, %v1531_v34  ;;  %v1593_v16 = vrot.slane %v1589_v17, 1 }
 0x1be   :  { %v1594_v41 = vrot.slane %v1590_v27, 1  ;;  %v1605_v48 = vrot.slane %v1601_v42, 1  ;;  %v1606_v46 = vrot.slane %v1602_v39, 1  ;;  %v1613_v20 = vmul.f32 %v1612_v11, %v3476_v29 }
 0x1bf   :  { %v1614_v31 = vmul.f32 %v1612_v11, %v3480_v63  ;;  %v1625_v7 = vmul.f32 %v1624_v0, %v3476_v29  ;;  %v1626_v47 = vmul.f32 %v1624_v0, %v3480_v63  ;;  %v1585_v33 = vadd.f32 %v1583_v60, %v1542_v38 }
 0x1c0   :  { %v1586_v54 = vadd.f32 %v1584_v45, %v1543_v49  ;;  %v1597_v1 = vadd.f32 %v1593_v16, %v1555_v61  ;;  %v1598_v53 = vadd.f32 %v1594_v41, %v1556_v4  ;;  %v1617_v24 = vrot.slane %v1613_v20, 1 }
 0x1c1   :  { %v1618_v6 = vrot.slane %v1614_v31, 1  ;;  %v1629_v2 = vrot.slane %v1625_v7, 1  ;;  %v1630_v34 = vrot.slane %v1626_v47, 1  ;;  %v1637_v40 = vmul.f32 %v1636_v13, %v3476_v29 }
 0x1c2   :  { %v1638_v23 = vmul.f32 %v1636_v13, %v3480_v63  ;;  %v1649_v12 = vmul.f32 %v1648_v57, %v3476_v29  ;;  %v1650_v25 = vmul.f32 %v1648_v57, %v3480_v63  ;;  %v1609_v38 = vadd.f32 %v1605_v48, %v1561_v14 }
 0x1c3   :  { %v1610_v49 = vadd.f32 %v1606_v46, %v1562_v56  ;;  %v1621_v62 = vadd.f32 %v1617_v24, %v1567_v52  ;;  %v1622_v36 = vadd.f32 %v1618_v6, %v1568_v19  ;;  %v1641_v35 = vrot.slane %v1637_v40, 1 }
 0x1c4   :  { %v1642_v37 = vrot.slane %v1638_v23, 1  ;;  %v1653_v11 = vrot.slane %v1649_v12, 1  ;;  %v1654_v0 = vrot.slane %v1650_v25, 1  ;;  %v1661_v55 = vmul.f32 %v1660_v30, %v3476_v29 }
 0x1c5   :  { %v1662_v13 = vmul.f32 %v1660_v30, %v3480_v63  ;;  %v1673_v57 = vmul.f32 %v1672_v15, %v3476_v29  ;;  %v1674_v5 = vmul.f32 %v1672_v15, %v3480_v63  ;;  %v1633_v26 = vadd.f32 %v1629_v2, %v1573_v3 }
 0x1c6   :  { %v1634_v51 = vadd.f32 %v1630_v34, %v1574_v58  ;;  %v1645_v22 = vadd.f32 %v1641_v35, %v1579_v10  ;;  %v1646_v59 = vadd.f32 %v1642_v37, %v1580_v18  ;;  %v1657_v61 = vadd.f32 %v1653_v11, %v1585_v33 }
 0x1c7   :  { %v1658_v4 = vadd.f32 %v1654_v0, %v1586_v54  ;;  %v1677_v9 = vrot.slane %v1673_v57, 2  ;;  %v1678_v44 = vrot.slane %v1674_v5, 2  ;;  %v1685_v14 = vmul.f32 %v1684_v28, %v3476_v29 }
 0x1c8   :  { %v1686_v30 = vmul.f32 %v1684_v28, %v3480_v63  ;;  %v1697_v15 = vmul.f32 %v1696_v8, %v3476_v29  ;;  %v1698_v56 = vmul.f32 %v1696_v8, %v3480_v63  ;;  %v1665_v52 = vrot.slane %v1661_v55, 2 }
 0x1c9   :  { %v1666_v19 = vrot.slane %v1662_v13, 2  ;;  %v3532_v32 = vadd.f32 %v1677_v9, %v1609_v38  ;;  %v3534_v43 = vadd.f32 %v1678_v44, %v1610_v49  ;;  %v1689_v60 = vrot.slane %v1685_v14, 2 }
 0x1ca   :  { %v1690_v45 = vrot.slane %v1686_v30, 2  ;;  %v1701_v17 = vrot.slane %v1697_v15, 2  ;;  %v1702_v28 = vrot.slane %v1698_v56, 2  ;;  %v1709_v27 = vmul.f32 %v1708_v21, %v3476_v29 }
 0x1cb   :  { %v1710_v42 = vmul.f32 %v1708_v21, %v3480_v63  ;;  %v1721_v8 = vmul.f32 %v1720_v50, %v3476_v29  ;;  %v1722_v39 = vmul.f32 %v1720_v50, %v3480_v63  ;;  %v1669_v3 = vadd.f32 %v1665_v52, %v1597_v1 }
 0x1cc   :  { %v1670_v58 = vadd.f32 %v1666_v19, %v1598_v53  ;;  %v1693_v10 = vadd.f32 %v1689_v60, %v1621_v62  ;;  %v1694_v18 = vadd.f32 %v1690_v45, %v1622_v36  ;;  %v1705_v16 = vadd.f32 %v1701_v17, %v1633_v26 }
 0x1cd   :  { %v1706_v41 = vadd.f32 %v1702_v28, %v1634_v51  ;;  %v1713_v48 = vrot.slane %v1709_v27, 2  ;;  %v1714_v46 = vrot.slane %v1710_v42, 2  ;;  %v1725_v20 = vrot.slane %v1721_v8, 2 }
 0x1ce   :  { %v1726_v31 = vrot.slane %v1722_v39, 2  ;;  %v1733_v29 = vrot.slane %v3532_v32, 7  ;;  %v1734_v63 = vrot.slane %v3534_v43, 7  ;;  %v1739_v33 = vrot.slane %v1693_v10, 6 }
 0x1cf   :  { %v1717_v21 = vadd.f32 %v1713_v48, %v1645_v22  ;;  %v1718_v7 = vadd.f32 %v1714_v46, %v1646_v59  ;;  %v1729_v50 = vadd.f32 %v1725_v20, %v1657_v61  ;;  %v1740_v54 = vrot.slane %v1694_v18, 6 }
 0x1d0   :  { %v1730_v47 = vadd.f32 %v1726_v31, %v1658_v4  ;;  %v1745_v1 = vrot.slane %v1705_v16, 5  ;;  %v1746_v53 = vrot.slane %v1706_v41, 5  ;;  %v1763_v24 = vrot.slane %v1669_v3, 5 }
 0x1d1   :  { %v1764_v6 = vrot.slane %v1670_v58, 5  ;;  %v1751_v2 = vrot.slane %v1717_v21, 4  ;;  %v1752_v34 = vrot.slane %v1718_v7, 4  ;;  %v1771_v40 = vrot.slane %v1693_v10, 3 }
 0x1d2   :  { %v1772_v23 = vrot.slane %v1694_v18, 3  ;;  %v1775_v12 = vrot.slane %v1705_v16, 2  ;;  %v1776_v25 = vrot.slane %v1706_v41, 2  ;;  %v1779_v38 = vrot.slane %v1717_v21, 1 }
 0x1d3   :  { %v1780_v49 = vrot.slane %v1718_v7, 1  ;;  %v1757_v62 = vrot.slane %v1729_v50, 3  ;;  %v1758_v36 = vrot.slane %v1730_v47, 3  ;;  %v1784_v35 = vsel %vm1783_vm8, %v1669_v3, %v1733_v29 }
 0x1d4   :  { %v1785_v37 = vsel %vm1783_vm8, %v1670_v58, %v1734_v63  ;;  %v1787_v11 = vsel %vm1786_vm9, %v1784_v35, %v1739_v33  ;;  %v1804_v55 = vsel %vm1783_vm8, %v1771_v40, %v1775_v12  ;;  %v1805_v13 = vsel %vm1783_vm8, %v1772_v23, %v1776_v25 }
 0x1d5   :  { %v1788_v0 = vsel %vm1786_vm9, %v1785_v37, %v1740_v54  ;;  %v1790_v57 = vsel %vm1789_vm10, %v1787_v11, %v1745_v1  ;;  %v1806_v26 = vsel %vm1786_vm9, %v1804_v55, %v1779_v38  ;;  %v1807_v51 = vsel %vm1786_vm9, %v1805_v13, %v1780_v49 }
 0x1d6   :  { %v1791_v5 = vsel %vm1789_vm10, %v1788_v0, %v1746_v53  ;;  %v1793_v22 = vsel %vm1792_vm11, %v1790_v57, %v1751_v2  ;;  %v1808_v61 = vsel %vm1789_vm10, %v1806_v26, %v1729_v50  ;;  %v1809_v4 = vsel %vm1789_vm10, %v1807_v51, %v1730_v47 }
 0x1d7   :  { %v1794_v59 = vsel %vm1792_vm11, %v1791_v5, %v1752_v34  ;;  %v1767_v9 = vrot.slane %v3532_v32, 4  ;;  %v1768_v44 = vrot.slane %v3534_v43, 4  ;;  %v1796_v14 = vsel %vm1795_vm12, %v1793_v22, %v1757_v62  ;;  %1812 = vst [vmem:[%s4005_s22 + $0x10] sm:$0xf] %v1808_v61  ;;  %1813 = vst [vmem:[%s4005_s22 + $0x18] sm:$0xf] %v1809_v4 }
 0x1d8   :  { %v1797_v30 = vsel %vm1795_vm12, %v1794_v59, %v1758_v36  ;;  %v1799_v15 = vsel %vm1798_vm13, %v1796_v14, %v1763_v24 }
 0x1d9   :  { %v1800_v56 = vsel %vm1798_vm13, %v1797_v30, %v1764_v6  ;;  %v1802_v52 = vsel %vm1801_vm14, %v1799_v15, %v1767_v9 }
 0x1da   :  { %v1803_v19 = vsel %vm1801_vm14, %v1800_v56, %v1768_v44  ;;  %1810 = vst [vmem:[%s4005_s22] sm:$0xff] %v1802_v52 }
 0x1db   :  { %1811 = vst [vmem:[%s4005_s22 + $0x8] sm:$0xff] %v1803_v19 }
 0x1dc   :  { %1818 = vsyncpa [#allocation3], 1 }
 0x1dd   :  { %1819 = vsyncpa [#allocation5], 1 }

</bundles_post_ra>
